<compile_context>
chip_gen: v6e
topology: v6e:2x2x1
jax: 0.10.0
libtpu: 0.0.40
codegen_flags: <defaults>
</compile_context>

<pallas_src>
import functools

import jax
import jax.numpy as jnp
from jax.experimental import pallas as pl
from jax.experimental.pallas import tpu as pltpu

_NEG = -1e30        # max-pool padding value (stands in for -inf)
_LANE = 128


# ------------------------------ small helpers -------------------------------

def _round_up(x, m):
    return (x + m - 1) // m * m


def _pick_tile(hwp):
    """Largest 128-multiple tile dividing hwp that still leaves >=2 grid steps."""
    for t in (1024, 512, 256, 128):
        if hwp % t == 0 and hwp // t >= 2:
            return t
    return hwp


def _mish(y):
    # Mish(y) = y * tanh(softplus(y)).  With t = exp(-|y|):
    #   y >= 0: tanh(softplus(y)) = (1 + 2t) / (1 + 2t + 2t^2)
    #   y <  0: tanh(softplus(y)) = (2t + t^2) / (2 + 2t + t^2)
    t = jnp.exp(-jnp.abs(y))
    pos = y >= 0
    num = jnp.where(pos, 1.0 + 2.0 * t, t * (2.0 + t))
    den = jnp.where(pos, 1.0 + 2.0 * t + 2.0 * t * t, 2.0 + 2.0 * t + t * t)
    return y * num * pl.reciprocal(den, approx=True)


def _fold_bn(p, eps=1e-5):
    """Fold Conv bias + BatchNorm (eval / running stats) into scale & shift."""
    s = p["gamma"] / jnp.sqrt(p["var"] + eps)
    scale = s.astype(jnp.float32)
    shift = (p["beta"] + (p["b"] - p["mean"]) * s).astype(jnp.float32)
    return scale, shift


def _compiler_params():
    return pltpu.CompilerParams(
        dimension_semantics=("parallel", "parallel"),
        vmem_limit_bytes=48 * 1024 * 1024,   # explicit, v7x-safe scoped limit
    )


# ------------------------------ Pallas kernels -------------------------------

def _stem_kernel(x_ref, w_ref, scale_ref, shift_ref,
                 b1_ref, r2_ref, r3_ref, b4_ref,
                 *, W, T, PXL, s1, s2, s3, s4, f1, f2r, f3r):
    # x_ref:   (1, Cin, Ls) bf16 row-slab, valid data starts at element PXL,
    #          borders are _NEG; the block is constant over the HW-tile axis.
    # w_ref:   (Ctp, 2*Cin) bf16 block-diagonal stacked 1x1 weights
    #          (rows: branch1 | branch2-reduce | branch3-reduce | branch4,
    #           branch4 reads the pooled half of the K axis).
    base = pl.multiple_of(pl.program_id(1) * T, _LANE)

    # Lane-aligned dynamic window load, then static (cheap) in-vreg slices.
    win = x_ref[0, :, pl.ds(base, T + 2 * PXL)]          # (Cin, T + 2*PXL) bf16
    ctr = win[:, PXL:PXL + T]                            # (Cin, T) bf16

    lane = jax.lax.broadcasted_iota(jnp.int32, (1, T), 1) + base
    w_idx = lane % W                                     # column within image
    neg = jnp.asarray(_NEG, dtype=ctr.dtype)

    # 3x3 max-pool (stride 1, pad 1), all in bf16 (exact for bf16 inputs).
    pooled = ctr
    for dy in (-1, 0, 1):
        for dx in (-1, 0, 1):
            if dy == 0 and dx == 0:
                continue
            off = PXL + dy * W + dx
            tap = win[:, off:off + T]
            if dx != 0:
                bad = jnp.logical_or(w_idx + dx < 0, w_idx + dx >= W)
                tap = jnp.where(bad, neg, tap)
            pooled = jnp.maximum(pooled, tap)

    # One matmul for all four 1x1 heads.
    operand = jnp.concatenate([ctr, pooled], axis=0)     # (2*Cin, T) bf16
    y = jnp.dot(w_ref[...], operand, preferred_element_type=jnp.float32)
    y = y * scale_ref[...] + shift_ref[...]
    out = _mish(y)                                       # (Ctp, T) f32

    # Channel splits start at sublane-aligned offsets (s* are multiples of 8).
    b1_ref[0] = out[s1:s1 + f1, :].astype(b1_ref.dtype)
    r2_ref[0] = out[s2:s2 + f2r, :].astype(r2_ref.dtype)
    r3_ref[0] = out[s3:s3 + f3r, :].astype(r3_ref.dtype)
    b4_ref[0] = out[s4:s4 + f1, :].astype(b4_ref.dtype)


def _conv_tile(r_ref, w_ref, scale_ref, shift_ref, slab_ref, *, k, W, HW, T):
    # KxK conv (stride 1, zero 'same' padding) on one HW tile as ONE matmul
    # over the k*k stacked taps (contraction K = k*k*Cr).
    pad = (k - 1) // 2
    P = pad * W + pad
    PL = _round_up(P, _LANE)
    Cr = r_ref.shape[1]
    slab_len = slab_ref.shape[1]

    # In-VMEM zero-padded row-slab of the full-spatial input block (the column
    # 'same' padding is handled with lane masks below); nothing padded or
    # k^2-expanded is ever written to HBM.
    slab_ref[:, :PL] = jnp.zeros((Cr, PL), slab_ref.dtype)
    slab_ref[:, PL:PL + HW] = r_ref[0, :, :HW]
    slab_ref[:, PL + HW:] = jnp.zeros((Cr, slab_len - PL - HW), slab_ref.dtype)

    base = pl.multiple_of(pl.program_id(1) * T, _LANE)
    win = slab_ref[:, pl.ds(base, T + 2 * PL)]           # (Cr, T + 2*PL) bf16

    lane = jax.lax.broadcasted_iota(jnp.int32, (1, T), 1) + base
    w_idx = lane % W

    taps = []
    for ky in range(k):
        for kx in range(k):
            dy, dx = ky - pad, kx - pad
            off = PL + dy * W + dx
            tap = win[:, off:off + T]
            if dx != 0:
                bad = jnp.logical_or(w_idx + dx < 0, w_idx + dx >= W)
                tap = jnp.where(bad, jnp.zeros_like(tap), tap)
            taps.append(tap)
    stk = jnp.concatenate(taps, axis=0)                  # (k*k*Cr, T) bf16

    y = jnp.dot(w_ref[...], stk, preferred_element_type=jnp.float32)
    y = y * scale_ref[...] + shift_ref[...]
    return _mish(y)                                      # (Cout, T) f32


def _conv_kernel(r_ref, w_ref, scale_ref, shift_ref, o_ref, slab_ref,
                 *, k, W, HW, T):
    y = _conv_tile(r_ref, w_ref, scale_ref, shift_ref, slab_ref,
                   k=k, W=W, HW=HW, T=T)
    o_ref[0] = y.astype(o_ref.dtype)


def _conv_concat_kernel(r_ref, w_ref, scale_ref, shift_ref,
                        b1_ref, b2_ref, b4_ref, o_ref, slab_ref,
                        *, k, W, HW, T, f1, f2, f3):
    # 5x5 ConvBNMish fused with the channel concatenation: branch1 / branch2 /
    # branch4 tiles pass through into their channel slices of the final output.
    y3 = _conv_tile(r_ref, w_ref, scale_ref, shift_ref, slab_ref,
                    k=k, W=W, HW=HW, T=T)
    o_ref[0, 0:f1, :] = b1_ref[0]
    o_ref[0, f1:f1 + f2, :] = b2_ref[0]
    o_ref[0, f1 + f2:f1 + f2 + f3, :] = y3.astype(o_ref.dtype)
    o_ref[0, f1 + f2 + f3:, :] = b4_ref[0]


# ------------------------------ weight packing -------------------------------

def _prep_stem(params, cin):
    """Stack branch1 / branch2a / branch3a / branch4 1x1 weights block-diagonally.

    Row segments start at sublane-aligned (multiple-of-8) offsets; padding rows
    have zero weight/scale/shift so they contribute nothing.
    """
    p1, p2a, p3a, p4 = (params["branch1"], params["branch2a"],
                        params["branch3a"], params["branch4"])
    f1 = p1["w"].shape[0]
    f2r = p2a["w"].shape[0]
    f3r = p3a["w"].shape[0]
    s1 = 0
    s2 = _round_up(f1, 8)
    s3 = s2 + _round_up(f2r, 8)
    s4 = s3 + _round_up(f3r, 8)
    ctp = s4 + _round_up(f1, 8)

    w = jnp.zeros((ctp, 2 * cin), jnp.float32)
    scale = jnp.zeros((ctp, 1), jnp.float32)
    shift = jnp.zeros((ctp, 1), jnp.float32)
    for p, s, use_pool in ((p1, s1, False), (p2a, s2, False),
                           (p3a, s3, False), (p4, s4, True)):
        f = p["w"].shape[0]
        col = cin if use_pool else 0
        w = w.at[s:s + f, col:col + cin].set(p["w"].reshape(f, cin))
        sc, sh = _fold_bn(p)
        scale = scale.at[s:s + f, 0].set(sc)
        shift = shift.at[s:s + f, 0].set(sh)
    seg = dict(s1=s1, s2=s2, s3=s3, s4=s4, f1=f1, f2r=f2r, f3r=f3r)
    return w.astype(jnp.bfloat16), scale, shift, seg


def _prep_conv(p):
    cout, cr, k, _ = p["w"].shape
    # (Cout, Cr, k, k) -> (Cout, k, k, Cr) -> (Cout, k*k*Cr): tap-major columns
    # matching the stacked-tap operand built in _conv_tile.
    w = jnp.transpose(p["w"], (0, 2, 3, 1)).reshape(cout, k * k * cr)
    sc, sh = _fold_bn(p)
    return w.astype(jnp.bfloat16), sc.reshape(cout, 1), sh.reshape(cout, 1)


# --------------------------- block forward (wrapper) --------------------------

def inception_block(x_nchw, params):
    N, Cin, H, W = x_nchw.shape
    HW = H * W
    HWp = _round_up(HW, _LANE)
    T = _pick_tile(HWp)
    n_t = HWp // T

    # Row-slab layout of the input: lane-aligned "-inf" borders so the max-pool
    # taps never leave the slab; the 1x1 heads read the interior.
    PXL = _round_up(W + 1, _LANE)
    Ls = HWp + 2 * PXL
    x_flat = x_nchw.astype(jnp.bfloat16).reshape(N, Cin, HW)
    x_slab = jnp.pad(x_flat, ((0, 0), (0, 0), (PXL, Ls - HW - PXL)),
                     constant_values=_NEG)
    # TODO(synk): this slab pad is the one remaining XLA-side pass over x; it
    # could be removed by having an upstream producer emit the slab directly.

    w_stem, sc_stem, sh_stem, seg = _prep_stem(params, Cin)
    ctp = w_stem.shape[0]
    f1, f2r, f3r = seg["f1"], seg["f2r"], seg["f3r"]

    stem = functools.partial(
        _stem_kernel, W=W, T=T, PXL=PXL, s1=seg["s1"], s2=seg["s2"],
        s3=seg["s3"], s4=seg["s4"], f1=f1, f2r=f2r, f3r=f3r)
    b1, r2, r3, b4 = pl.pallas_call(
        stem,
        out_shape=(
            jax.ShapeDtypeStruct((N, f1, HWp), jnp.bfloat16),
            jax.ShapeDtypeStruct((N, f2r, HWp), jnp.bfloat16),
            jax.ShapeDtypeStruct((N, f3r, HWp), jnp.bfloat16),
            jax.ShapeDtypeStruct((N, f1, HWp), jnp.bfloat16),
        ),
        grid=(N, n_t),
        in_specs=[
            pl.BlockSpec((1, Cin, Ls), lambda n, t: (n, 0, 0)),
            pl.BlockSpec((ctp, 2 * Cin), lambda n, t: (0, 0)),
            pl.BlockSpec((ctp, 1), lambda n, t: (0, 0)),
            pl.BlockSpec((ctp, 1), lambda n, t: (0, 0)),
        ],
        out_specs=(
            pl.BlockSpec((1, f1, T), lambda n, t: (n, 0, t)),
            pl.BlockSpec((1, f2r, T), lambda n, t: (n, 0, t)),
            pl.BlockSpec((1, f3r, T), lambda n, t: (n, 0, t)),
            pl.BlockSpec((1, f1, T), lambda n, t: (n, 0, t)),
        ),
        compiler_params=_compiler_params(),
    )(x_slab, w_stem, sc_stem, sh_stem)

    # branch2: 3x3 ConvBNMish on the branch2 reduce output.
    p2b = params["branch2b"]
    w2, sc2, sh2 = _prep_conv(p2b)
    f2o, k2 = p2b["w"].shape[0], p2b["w"].shape[2]
    pl2 = _round_up(((k2 - 1) // 2) * W + (k2 - 1) // 2, _LANE)
    conv2 = functools.partial(_conv_kernel, k=k2, W=W, HW=HW, T=T)
    b2 = pl.pallas_call(
        conv2,
        out_shape=jax.ShapeDtypeStruct((N, f2o, HWp), jnp.bfloat16),
        grid=(N, n_t),
        in_specs=[
            pl.BlockSpec((1, f2r, HWp), lambda n, t: (n, 0, 0)),
            pl.BlockSpec((f2o, k2 * k2 * f2r), lambda n, t: (0, 0)),
            pl.BlockSpec((f2o, 1), lambda n, t: (0, 0)),
            pl.BlockSpec((f2o, 1), lambda n, t: (0, 0)),
        ],
        out_specs=pl.BlockSpec((1, f2o, T), lambda n, t: (n, 0, t)),
        scratch_shapes=[pltpu.VMEM((f2r, HWp + 2 * pl2), jnp.bfloat16)],
        compiler_params=_compiler_params(),
    )(r2, w2, sc2, sh2)

    # branch3: 5x5 ConvBNMish, fused with the final channel concatenation.
    p3b = params["branch3b"]
    w3, sc3, sh3 = _prep_conv(p3b)
    f3o, k3 = p3b["w"].shape[0], p3b["w"].shape[2]
    pl3 = _round_up(((k3 - 1) // 2) * W + (k3 - 1) // 2, _LANE)
    ctot = f1 + f2o + f3o + f1
    conv3 = functools.partial(_conv_concat_kernel, k=k3, W=W, HW=HW, T=T,
                              f1=f1, f2=f2o, f3=f3o)
    out = pl.pallas_call(
        conv3,
        out_shape=jax.ShapeDtypeStruct((N, ctot, HWp), jnp.bfloat16),
        grid=(N, n_t),
        in_specs=[
            pl.BlockSpec((1, f3r, HWp), lambda n, t: (n, 0, 0)),
            pl.BlockSpec((f3o, k3 * k3 * f3r), lambda n, t: (0, 0)),
            pl.BlockSpec((f3o, 1), lambda n, t: (0, 0)),
            pl.BlockSpec((f3o, 1), lambda n, t: (0, 0)),
            pl.BlockSpec((1, f1, T), lambda n, t: (n, 0, t)),
            pl.BlockSpec((1, f2o, T), lambda n, t: (n, 0, t)),
            pl.BlockSpec((1, f1, T), lambda n, t: (n, 0, t)),
        ],
        out_specs=pl.BlockSpec((1, ctot, T), lambda n, t: (n, 0, t)),
        scratch_shapes=[pltpu.VMEM((f3r, HWp + 2 * pl3), jnp.bfloat16)],
        compiler_params=_compiler_params(),
    )(r3, w3, sc3, sh3, b1, b2, b4)

    if HWp != HW:
        out = out[:, :, :HW]
    return out.reshape(N, ctot, H, W)


# ------------------------------- params init ---------------------------------

def init_conv_bn(key, cin, cout, k):
    kw, kb = jax.random.split(key)
    return dict(
        w=0.1 * jax.random.normal(kw, (cout, cin, k, k), jnp.float32),
        b=0.1 * jax.random.normal(kb, (cout,), jnp.float32),
        gamma=jnp.ones((cout,), jnp.float32),
        beta=jnp.zeros((cout,), jnp.float32),
        mean=jnp.zeros((cout,), jnp.float32),   # BN running stats at init
        var=jnp.ones((cout,), jnp.float32),
    )


def init_inception_params(key, in_channels, filters):
    f1, f2, f3 = filters
    keys = jax.random.split(key, 6)
    return dict(
        branch1=init_conv_bn(keys[0], in_channels, f1, 1),
        branch2a=init_conv_bn(keys[1], in_channels, f2[0], 1),
        branch2b=init_conv_bn(keys[2], f2[0], f2[1], 3),
        branch3a=init_conv_bn(keys[3], in_channels, f3[0], 1),
        branch3b=init_conv_bn(keys[4], f3[0], f3[1], 5),
        branch4=init_conv_bn(keys[5], in_channels, f1, 1),
    )


# ----------------------------------- main -------------------------------------

if __name__ == "__main__":
    key = jax.random.PRNGKey(0)
    kx, kp = jax.random.split(key)

    in_channels = 4
    filters = (8, (4, 8), (4, 8))        # f1, f2=(reduce, out), f3=(reduce, out)
    x = jax.random.normal(kx, (2, in_channels, 16, 16), jnp.float32)   # NCHW

    params = init_inception_params(kp, in_channels, filters)

    fwd = jax.jit(inception_block)
    out = fwd(x, params)
    jax.block_until_ready(out)

    expected_c = filters[0] + filters[1][1] + filters[2][1] + filters[0]
    assert out.shape == (2, expected_c, 16, 16), out.shape
    assert bool(jnp.all(jnp.isfinite(out.astype(jnp.float32))))
    print("KERNEL_OK")
</pallas_src>

<mosaic_0001>
module attributes {stable_mosaic.version = 11 : i64} {
  func.func @_stem_kernel(%arg0: i32, %arg1: i32, %arg2: memref<1x4x512xbf16, #tpu.memory_space<vmem>>, %arg3: memref<32x8xbf16, #tpu.memory_space<vmem>>, %arg4: memref<32x1xf32, #tpu.memory_space<vmem>>, %arg5: memref<32x1xf32, #tpu.memory_space<vmem>>, %arg6: memref<1x8x128xbf16, #tpu.memory_space<vmem>>, %arg7: memref<1x4x128xbf16, #tpu.memory_space<vmem>>, %arg8: memref<1x4x128xbf16, #tpu.memory_space<vmem>>, %arg9: memref<1x8x128xbf16, #tpu.memory_space<vmem>>) attributes {dimension_semantics = [#tpu.dimension_semantics<parallel>, #tpu.dimension_semantics<parallel>], iteration_bounds = array<i64: 2, 2>, scalar_prefetch = 0 : i64, scratch_operands = 0 : i64, tpu.core_type = #tpu.core_type<tc>, window_params = [{transform_indices = @transform_0, window_bounds = array<i64: 1, 4, 512>}, {pipeline_mode = #tpu.pipeline_mode<synchronous>, transform_indices = @transform_1, window_bounds = array<i64: 32, 8>}, {pipeline_mode = #tpu.pipeline_mode<synchronous>, transform_indices = @transform_2, window_bounds = array<i64: 32, 1>}, {pipeline_mode = #tpu.pipeline_mode<synchronous>, transform_indices = @transform_3, window_bounds = array<i64: 32, 1>}, {transform_indices = @transform_4, window_bounds = array<i64: 1, 8, 128>}, {transform_indices = @transform_5, window_bounds = array<i64: 1, 4, 128>}, {transform_indices = @transform_6, window_bounds = array<i64: 1, 4, 128>}, {transform_indices = @transform_7, window_bounds = array<i64: 1, 8, 128>}]} {
    %c128_i32 = arith.constant 128 : i32
    %0 = arith.muli %arg1, %c128_i32 : i32
    %1 = tpu.assume_multiple %0, 128 : i32
    %c0 = arith.constant 0 : index
    %c0_0 = arith.constant 0 : index
    %2 = arith.index_cast %1 : i32 to index
    %3 = vector.load %arg2[%c0, %c0_0, %2] : memref<1x4x512xbf16, #tpu.memory_space<vmem>>, vector<1x4x384xbf16>
    %4 = vector.shape_cast %3 : vector<1x4x384xbf16> to vector<4x384xbf16>
    %5 = vector.extract_strided_slice %4 {offsets = [0, 128], sizes = [4, 128], strides = [1, 1]} : vector<4x384xbf16> to vector<4x128xbf16>
    %6 = tpu.iota {dimensions = array<i32: 1>} : vector<1x128xi32>
    %7 = vector.broadcast %1 : i32 to vector<1x128xi32>
    %8 = arith.addi %6, %7 : vector<1x128xi32>
    %c16_i32 = arith.constant 16 : i32
    %c0_i32 = arith.constant 0 : i32
    %9 = arith.cmpi eq, %c16_i32, %c0_i32 : i32
    %c1_i32 = arith.constant 1 : i32
    %10 = arith.select %9, %c1_i32, %c16_i32 : i32
    %11 = vector.broadcast %10 : i32 to vector<1x128xi32>
    %12 = arith.remsi %8, %11 : vector<1x128xi32>
    %c0_i32_1 = arith.constant 0 : i32
    %13 = vector.broadcast %c0_i32_1 : i32 to vector<1x128xi32>
    %14 = arith.cmpi ne, %12, %13 : vector<1x128xi32>
    %c0_i32_2 = arith.constant 0 : i32
    %15 = vector.broadcast %c0_i32_2 : i32 to vector<1x128xi32>
    %16 = arith.cmpi slt, %12, %15 : vector<1x128xi32>
    %c0_i32_3 = arith.constant 0 : i32
    %17 = arith.cmpi slt, %10, %c0_i32_3 : i32
    %18 = vector.broadcast %17 : i1 to vector<1x128xi1>
    %19 = vector.broadcast %18 : vector<1x128xi1> to vector<1x128xi1>
    %20 = arith.xori %16, %19 : vector<1x128xi1>
    %21 = arith.andi %20, %14 : vector<1x128xi1>
    %22 = vector.broadcast %10 : i32 to vector<1x128xi32>
    %23 = arith.addi %12, %22 : vector<1x128xi32>
    %24 = arith.select %21, %23, %12 : vector<1x128xi1>, vector<1x128xi32>
    %25 = vector.extract_strided_slice %4 {offsets = [0, 111], sizes = [4, 128], strides = [1, 1]} : vector<4x384xbf16> to vector<4x128xbf16>
    %c-1_i32 = arith.constant -1 : i32
    %26 = vector.broadcast %c-1_i32 : i32 to vector<1x128xi32>
    %27 = arith.addi %24, %26 : vector<1x128xi32>
    %c0_i32_4 = arith.constant 0 : i32
    %28 = vector.broadcast %c0_i32_4 : i32 to vector<1x128xi32>
    %29 = arith.cmpi slt, %27, %28 : vector<1x128xi32>
    %c-1_i32_5 = arith.constant -1 : i32
    %30 = vector.broadcast %c-1_i32_5 : i32 to vector<1x128xi32>
    %31 = arith.addi %24, %30 : vector<1x128xi32>
    %c16_i32_6 = arith.constant 16 : i32
    %32 = vector.broadcast %c16_i32_6 : i32 to vector<1x128xi32>
    %33 = arith.cmpi sge, %31, %32 : vector<1x128xi32>
    %34 = arith.ori %29, %33 : vector<1x128xi1>
    %cst = arith.constant -1.000260e+30 : bf16
    %35 = vector.shape_cast %34 : vector<1x128xi1> to vector<1x128xi1>
    %36 = vector.broadcast %35 : vector<1x128xi1> to vector<4x128xi1>
    %37 = vector.broadcast %cst : bf16 to vector<4x128xbf16>
    %38 = arith.select %36, %37, %25 : vector<4x128xi1>, vector<4x128xbf16>
    %39 = arith.maximumf %5, %38 : vector<4x128xbf16>
    %40 = vector.extract_strided_slice %4 {offsets = [0, 112], sizes = [4, 128], strides = [1, 1]} : vector<4x384xbf16> to vector<4x128xbf16>
    %41 = arith.maximumf %39, %40 : vector<4x128xbf16>
    %42 = vector.extract_strided_slice %4 {offsets = [0, 113], sizes = [4, 128], strides = [1, 1]} : vector<4x384xbf16> to vector<4x128xbf16>
    %c1_i32_7 = arith.constant 1 : i32
    %43 = vector.broadcast %c1_i32_7 : i32 to vector<1x128xi32>
    %44 = arith.addi %24, %43 : vector<1x128xi32>
    %c0_i32_8 = arith.constant 0 : i32
    %45 = vector.broadcast %c0_i32_8 : i32 to vector<1x128xi32>
    %46 = arith.cmpi slt, %44, %45 : vector<1x128xi32>
    %c1_i32_9 = arith.constant 1 : i32
    %47 = vector.broadcast %c1_i32_9 : i32 to vector<1x128xi32>
    %48 = arith.addi %24, %47 : vector<1x128xi32>
    %c16_i32_10 = arith.constant 16 : i32
    %49 = vector.broadcast %c16_i32_10 : i32 to vector<1x128xi32>
    %50 = arith.cmpi sge, %48, %49 : vector<1x128xi32>
    %51 = arith.ori %46, %50 : vector<1x128xi1>
    %cst_11 = arith.constant -1.000260e+30 : bf16
    %52 = vector.shape_cast %51 : vector<1x128xi1> to vector<1x128xi1>
    %53 = vector.broadcast %52 : vector<1x128xi1> to vector<4x128xi1>
    %54 = vector.broadcast %cst_11 : bf16 to vector<4x128xbf16>
    %55 = arith.select %53, %54, %42 : vector<4x128xi1>, vector<4x128xbf16>
    %56 = arith.maximumf %41, %55 : vector<4x128xbf16>
    %57 = vector.extract_strided_slice %4 {offsets = [0, 127], sizes = [4, 128], strides = [1, 1]} : vector<4x384xbf16> to vector<4x128xbf16>
    %c-1_i32_12 = arith.constant -1 : i32
    %58 = vector.broadcast %c-1_i32_12 : i32 to vector<1x128xi32>
    %59 = arith.addi %24, %58 : vector<1x128xi32>
    %c0_i32_13 = arith.constant 0 : i32
    %60 = vector.broadcast %c0_i32_13 : i32 to vector<1x128xi32>
    %61 = arith.cmpi slt, %59, %60 : vector<1x128xi32>
    %c-1_i32_14 = arith.constant -1 : i32
    %62 = vector.broadcast %c-1_i32_14 : i32 to vector<1x128xi32>
    %63 = arith.addi %24, %62 : vector<1x128xi32>
    %c16_i32_15 = arith.constant 16 : i32
    %64 = vector.broadcast %c16_i32_15 : i32 to vector<1x128xi32>
    %65 = arith.cmpi sge, %63, %64 : vector<1x128xi32>
    %66 = arith.ori %61, %65 : vector<1x128xi1>
    %cst_16 = arith.constant -1.000260e+30 : bf16
    %67 = vector.shape_cast %66 : vector<1x128xi1> to vector<1x128xi1>
    %68 = vector.broadcast %67 : vector<1x128xi1> to vector<4x128xi1>
    %69 = vector.broadcast %cst_16 : bf16 to vector<4x128xbf16>
    %70 = arith.select %68, %69, %57 : vector<4x128xi1>, vector<4x128xbf16>
    %71 = arith.maximumf %56, %70 : vector<4x128xbf16>
    %72 = vector.extract_strided_slice %4 {offsets = [0, 129], sizes = [4, 128], strides = [1, 1]} : vector<4x384xbf16> to vector<4x128xbf16>
    %c1_i32_17 = arith.constant 1 : i32
    %73 = vector.broadcast %c1_i32_17 : i32 to vector<1x128xi32>
    %74 = arith.addi %24, %73 : vector<1x128xi32>
    %c0_i32_18 = arith.constant 0 : i32
    %75 = vector.broadcast %c0_i32_18 : i32 to vector<1x128xi32>
    %76 = arith.cmpi slt, %74, %75 : vector<1x128xi32>
    %c1_i32_19 = arith.constant 1 : i32
    %77 = vector.broadcast %c1_i32_19 : i32 to vector<1x128xi32>
    %78 = arith.addi %24, %77 : vector<1x128xi32>
    %c16_i32_20 = arith.constant 16 : i32
    %79 = vector.broadcast %c16_i32_20 : i32 to vector<1x128xi32>
    %80 = arith.cmpi sge, %78, %79 : vector<1x128xi32>
    %81 = arith.ori %76, %80 : vector<1x128xi1>
    %cst_21 = arith.constant -1.000260e+30 : bf16
    %82 = vector.shape_cast %81 : vector<1x128xi1> to vector<1x128xi1>
    %83 = vector.broadcast %82 : vector<1x128xi1> to vector<4x128xi1>
    %84 = vector.broadcast %cst_21 : bf16 to vector<4x128xbf16>
    %85 = arith.select %83, %84, %72 : vector<4x128xi1>, vector<4x128xbf16>
    %86 = arith.maximumf %71, %85 : vector<4x128xbf16>
    %87 = vector.extract_strided_slice %4 {offsets = [0, 143], sizes = [4, 128], strides = [1, 1]} : vector<4x384xbf16> to vector<4x128xbf16>
    %c-1_i32_22 = arith.constant -1 : i32
    %88 = vector.broadcast %c-1_i32_22 : i32 to vector<1x128xi32>
    %89 = arith.addi %24, %88 : vector<1x128xi32>
    %c0_i32_23 = arith.constant 0 : i32
    %90 = vector.broadcast %c0_i32_23 : i32 to vector<1x128xi32>
    %91 = arith.cmpi slt, %89, %90 : vector<1x128xi32>
    %c-1_i32_24 = arith.constant -1 : i32
    %92 = vector.broadcast %c-1_i32_24 : i32 to vector<1x128xi32>
    %93 = arith.addi %24, %92 : vector<1x128xi32>
    %c16_i32_25 = arith.constant 16 : i32
    %94 = vector.broadcast %c16_i32_25 : i32 to vector<1x128xi32>
    %95 = arith.cmpi sge, %93, %94 : vector<1x128xi32>
    %96 = arith.ori %91, %95 : vector<1x128xi1>
    %cst_26 = arith.constant -1.000260e+30 : bf16
    %97 = vector.shape_cast %96 : vector<1x128xi1> to vector<1x128xi1>
    %98 = vector.broadcast %97 : vector<1x128xi1> to vector<4x128xi1>
    %99 = vector.broadcast %cst_26 : bf16 to vector<4x128xbf16>
    %100 = arith.select %98, %99, %87 : vector<4x128xi1>, vector<4x128xbf16>
    %101 = arith.maximumf %86, %100 : vector<4x128xbf16>
    %102 = vector.extract_strided_slice %4 {offsets = [0, 144], sizes = [4, 128], strides = [1, 1]} : vector<4x384xbf16> to vector<4x128xbf16>
    %103 = arith.maximumf %101, %102 : vector<4x128xbf16>
    %104 = vector.extract_strided_slice %4 {offsets = [0, 145], sizes = [4, 128], strides = [1, 1]} : vector<4x384xbf16> to vector<4x128xbf16>
    %c1_i32_27 = arith.constant 1 : i32
    %105 = vector.broadcast %c1_i32_27 : i32 to vector<1x128xi32>
    %106 = arith.addi %24, %105 : vector<1x128xi32>
    %c0_i32_28 = arith.constant 0 : i32
    %107 = vector.broadcast %c0_i32_28 : i32 to vector<1x128xi32>
    %108 = arith.cmpi slt, %106, %107 : vector<1x128xi32>
    %c1_i32_29 = arith.constant 1 : i32
    %109 = vector.broadcast %c1_i32_29 : i32 to vector<1x128xi32>
    %110 = arith.addi %24, %109 : vector<1x128xi32>
    %c16_i32_30 = arith.constant 16 : i32
    %111 = vector.broadcast %c16_i32_30 : i32 to vector<1x128xi32>
    %112 = arith.cmpi sge, %110, %111 : vector<1x128xi32>
    %113 = arith.ori %108, %112 : vector<1x128xi1>
    %cst_31 = arith.constant -1.000260e+30 : bf16
    %114 = vector.shape_cast %113 : vector<1x128xi1> to vector<1x128xi1>
    %115 = vector.broadcast %114 : vector<1x128xi1> to vector<4x128xi1>
    %116 = vector.broadcast %cst_31 : bf16 to vector<4x128xbf16>
    %117 = arith.select %115, %116, %104 : vector<4x128xi1>, vector<4x128xbf16>
    %118 = arith.maximumf %103, %117 : vector<4x128xbf16>
    %119 = tpu.concatenate %5, %118 in 0 : vector<4x128xbf16>, vector<4x128xbf16> -> vector<8x128xbf16>
    %c0_32 = arith.constant 0 : index
    %c0_33 = arith.constant 0 : index
    %120 = vector.load %arg3[%c0_32, %c0_33] : memref<32x8xbf16, #tpu.memory_space<vmem>>, vector<32x8xbf16>
    %cst_34 = arith.constant dense<0.000000e+00> : vector<32x128xf32>
    %121 = tpu.matmul %120, %119, %cst_34 {dimension_numbers = #tpu.dot_dimension_numbers<[1], [0], [0], [1], [0, 0, 1, 1], [], []>} : vector<32x8xbf16>, vector<8x128xbf16>, vector<32x128xf32> -> vector<32x128xf32>
    %c0_35 = arith.constant 0 : index
    %c0_36 = arith.constant 0 : index
    %122 = vector.load %arg4[%c0_35, %c0_36] : memref<32x1xf32, #tpu.memory_space<vmem>>, vector<32x1xf32>
    %123 = vector.broadcast %122 : vector<32x1xf32> to vector<32x128xf32>
    %124 = arith.mulf %121, %123 : vector<32x128xf32>
    %c0_37 = arith.constant 0 : index
    %c0_38 = arith.constant 0 : index
    %125 = vector.load %arg5[%c0_37, %c0_38] : memref<32x1xf32, #tpu.memory_space<vmem>>, vector<32x1xf32>
    %126 = vector.broadcast %125 : vector<32x1xf32> to vector<32x128xf32>
    %127 = arith.addf %124, %126 : vector<32x128xf32>
    %128 = math.absf %127 : vector<32x128xf32>
    %cst_39 = arith.constant 0.000000e+00 : f32
    %129 = vector.broadcast %cst_39 : f32 to vector<32x128xf32>
    %130 = arith.subf %129, %128 : vector<32x128xf32>
    %131 = math.exp %130 : vector<32x128xf32>
    %cst_40 = arith.constant 0.000000e+00 : f32
    %132 = vector.broadcast %cst_40 : f32 to vector<32x128xf32>
    %133 = arith.cmpf oge, %127, %132 : vector<32x128xf32>
    %cst_41 = arith.constant 2.000000e+00 : f32
    %134 = vector.broadcast %cst_41 : f32 to vector<32x128xf32>
    %135 = arith.mulf %134, %131 : vector<32x128xf32>
    %cst_42 = arith.constant 1.000000e+00 : f32
    %136 = vector.broadcast %cst_42 : f32 to vector<32x128xf32>
    %137 = arith.addf %136, %135 : vector<32x128xf32>
    %cst_43 = arith.constant 2.000000e+00 : f32
    %138 = vector.broadcast %cst_43 : f32 to vector<32x128xf32>
    %139 = arith.addf %138, %131 : vector<32x128xf32>
    %140 = arith.mulf %131, %139 : vector<32x128xf32>
    %141 = arith.select %133, %137, %140 : vector<32x128xi1>, vector<32x128xf32>
    %cst_44 = arith.constant 2.000000e+00 : f32
    %142 = vector.broadcast %cst_44 : f32 to vector<32x128xf32>
    %143 = arith.mulf %142, %131 : vector<32x128xf32>
    %cst_45 = arith.constant 1.000000e+00 : f32
    %144 = vector.broadcast %cst_45 : f32 to vector<32x128xf32>
    %145 = arith.addf %144, %143 : vector<32x128xf32>
    %cst_46 = arith.constant 2.000000e+00 : f32
    %146 = vector.broadcast %cst_46 : f32 to vector<32x128xf32>
    %147 = arith.mulf %146, %131 : vector<32x128xf32>
    %148 = arith.mulf %147, %131 : vector<32x128xf32>
    %149 = arith.addf %145, %148 : vector<32x128xf32>
    %cst_47 = arith.constant 2.000000e+00 : f32
    %150 = vector.broadcast %cst_47 : f32 to vector<32x128xf32>
    %151 = arith.mulf %150, %131 : vector<32x128xf32>
    %cst_48 = arith.constant 2.000000e+00 : f32
    %152 = vector.broadcast %cst_48 : f32 to vector<32x128xf32>
    %153 = arith.addf %152, %151 : vector<32x128xf32>
    %154 = arith.mulf %131, %131 : vector<32x128xf32>
    %155 = arith.addf %153, %154 : vector<32x128xf32>
    %156 = arith.select %133, %149, %155 : vector<32x128xi1>, vector<32x128xf32>
    %157 = arith.mulf %127, %141 : vector<32x128xf32>
    %158 = tpu.reciprocal %156 {approx = true} : vector<32x128xf32> -> vector<32x128xf32>
    %159 = arith.mulf %157, %158 : vector<32x128xf32>
    %160 = vector.extract_strided_slice %159 {offsets = [0, 0], sizes = [8, 128], strides = [1, 1]} : vector<32x128xf32> to vector<8x128xf32>
    %161 = arith.truncf %160 : vector<8x128xf32> to vector<8x128xbf16>
    %c0_49 = arith.constant 0 : index
    %c0_50 = arith.constant 0 : index
    %c0_51 = arith.constant 0 : index
    %162 = vector.load %arg6[%c0_49, %c0_50, %c0_51] : memref<1x8x128xbf16, #tpu.memory_space<vmem>>, vector<1x8x128xbf16>
    %163 = vector.shape_cast %162 : vector<1x8x128xbf16> to vector<8x128xbf16>
    %164 = vector.shape_cast %161 : vector<8x128xbf16> to vector<1x8x128xbf16>
    tpu.vector_store %arg6[%c0_49, %c0_50, %c0_51], %164 {strides = array<i32>} : memref<1x8x128xbf16, #tpu.memory_space<vmem>>, vector<1x8x128xbf16>,
    %165 = vector.extract_strided_slice %159 {offsets = [8, 0], sizes = [4, 128], strides = [1, 1]} : vector<32x128xf32> to vector<4x128xf32>
    %166 = arith.truncf %165 : vector<4x128xf32> to vector<4x128xbf16>
    %c0_52 = arith.constant 0 : index
    %c0_53 = arith.constant 0 : index
    %c0_54 = arith.constant 0 : index
    %167 = vector.load %arg7[%c0_52, %c0_53, %c0_54] : memref<1x4x128xbf16, #tpu.memory_space<vmem>>, vector<1x4x128xbf16>
    %168 = vector.shape_cast %167 : vector<1x4x128xbf16> to vector<4x128xbf16>
    %169 = vector.shape_cast %166 : vector<4x128xbf16> to vector<1x4x128xbf16>
    tpu.vector_store %arg7[%c0_52, %c0_53, %c0_54], %169 {strides = array<i32>} : memref<1x4x128xbf16, #tpu.memory_space<vmem>>, vector<1x4x128xbf16>,
    %170 = vector.extract_strided_slice %159 {offsets = [16, 0], sizes = [4, 128], strides = [1, 1]} : vector<32x128xf32> to vector<4x128xf32>
    %171 = arith.truncf %170 : vector<4x128xf32> to vector<4x128xbf16>
    %c0_55 = arith.constant 0 : index
    %c0_56 = arith.constant 0 : index
    %c0_57 = arith.constant 0 : index
    %172 = vector.load %arg8[%c0_55, %c0_56, %c0_57] : memref<1x4x128xbf16, #tpu.memory_space<vmem>>, vector<1x4x128xbf16>
    %173 = vector.shape_cast %172 : vector<1x4x128xbf16> to vector<4x128xbf16>
    %174 = vector.shape_cast %171 : vector<4x128xbf16> to vector<1x4x128xbf16>
    tpu.vector_store %arg8[%c0_55, %c0_56, %c0_57], %174 {strides = array<i32>} : memref<1x4x128xbf16, #tpu.memory_space<vmem>>, vector<1x4x128xbf16>,
    %175 = vector.extract_strided_slice %159 {offsets = [24, 0], sizes = [8, 128], strides = [1, 1]} : vector<32x128xf32> to vector<8x128xf32>
    %176 = arith.truncf %175 : vector<8x128xf32> to vector<8x128xbf16>
    %c0_58 = arith.constant 0 : index
    %c0_59 = arith.constant 0 : index
    %c0_60 = arith.constant 0 : index
    %177 = vector.load %arg9[%c0_58, %c0_59, %c0_60] : memref<1x8x128xbf16, #tpu.memory_space<vmem>>, vector<1x8x128xbf16>
    %178 = vector.shape_cast %177 : vector<1x8x128xbf16> to vector<8x128xbf16>
    %179 = vector.shape_cast %176 : vector<8x128xbf16> to vector<1x8x128xbf16>
    tpu.vector_store %arg9[%c0_58, %c0_59, %c0_60], %179 {strides = array<i32>} : memref<1x8x128xbf16, #tpu.memory_space<vmem>>, vector<1x8x128xbf16>,
    return
  }
  func.func @transform_0(%arg0: i32, %arg1: i32) -> (i32, i32, i32) {
    %c0_i32 = arith.constant 0 : i32
    %c0_i32_0 = arith.constant 0 : i32
    %c0_i32_1 = arith.constant 0 : i32
    return %arg0, %c0_i32, %c0_i32_0 : i32, i32, i32
  }
  func.func @transform_1(%arg0: i32, %arg1: i32) -> (i32, i32) {
    %c0_i32 = arith.constant 0 : i32
    %c0_i32_0 = arith.constant 0 : i32
    %c0_i32_1 = arith.constant 0 : i32
    return %c0_i32, %c0_i32_0 : i32, i32
  }
  func.func @transform_2(%arg0: i32, %arg1: i32) -> (i32, i32) {
    %c0_i32 = arith.constant 0 : i32
    %c0_i32_0 = arith.constant 0 : i32
    %c0_i32_1 = arith.constant 0 : i32
    return %c0_i32, %c0_i32_0 : i32, i32
  }
  func.func @transform_3(%arg0: i32, %arg1: i32) -> (i32, i32) {
    %c0_i32 = arith.constant 0 : i32
    %c0_i32_0 = arith.constant 0 : i32
    %c0_i32_1 = arith.constant 0 : i32
    return %c0_i32, %c0_i32_0 : i32, i32
  }
  func.func @transform_4(%arg0: i32, %arg1: i32) -> (i32, i32, i32) {
    %c0_i32 = arith.constant 0 : i32
    %c0_i32_0 = arith.constant 0 : i32
    return %arg0, %c0_i32, %arg1 : i32, i32, i32
  }
  func.func @transform_5(%arg0: i32, %arg1: i32) -> (i32, i32, i32) {
    %c0_i32 = arith.constant 0 : i32
    %c0_i32_0 = arith.constant 0 : i32
    return %arg0, %c0_i32, %arg1 : i32, i32, i32
  }
  func.func @transform_6(%arg0: i32, %arg1: i32) -> (i32, i32, i32) {
    %c0_i32 = arith.constant 0 : i32
    %c0_i32_0 = arith.constant 0 : i32
    return %arg0, %c0_i32, %arg1 : i32, i32, i32
  }
  func.func @transform_7(%arg0: i32, %arg1: i32) -> (i32, i32, i32) {
    %c0_i32 = arith.constant 0 : i32
    %c0_i32_0 = arith.constant 0 : i32
    return %arg0, %c0_i32, %arg1 : i32, i32, i32
  }
}

module attributes {stable_mosaic.version = 11 : i64} {
  func.func @_conv_kernel(%arg0: i32, %arg1: i32, %arg2: memref<1x4x256xbf16, #tpu.memory_space<vmem>>, %arg3: memref<8x36xbf16, #tpu.memory_space<vmem>>, %arg4: memref<8x1xf32, #tpu.memory_space<vmem>>, %arg5: memref<8x1xf32, #tpu.memory_space<vmem>>, %arg6: memref<1x8x128xbf16, #tpu.memory_space<vmem>>, %arg7: memref<4x512xbf16, #tpu.memory_space<vmem>>) attributes {dimension_semantics = [#tpu.dimension_semantics<parallel>, #tpu.dimension_semantics<parallel>], iteration_bounds = array<i64: 2, 2>, scalar_prefetch = 0 : i64, scratch_operands = 1 : i64, tpu.core_type = #tpu.core_type<tc>, window_params = [{transform_indices = @transform_0, window_bounds = array<i64: 1, 4, 256>}, {pipeline_mode = #tpu.pipeline_mode<synchronous>, transform_indices = @transform_1, window_bounds = array<i64: 8, 36>}, {pipeline_mode = #tpu.pipeline_mode<synchronous>, transform_indices = @transform_2, window_bounds = array<i64: 8, 1>}, {pipeline_mode = #tpu.pipeline_mode<synchronous>, transform_indices = @transform_3, window_bounds = array<i64: 8, 1>}, {transform_indices = @transform_4, window_bounds = array<i64: 1, 8, 128>}]} {
    %cst = arith.constant 0.000000e+00 : bf16
    %0 = vector.broadcast %cst : bf16 to vector<4x128xbf16>
    %c0 = arith.constant 0 : index
    %c0_0 = arith.constant 0 : index
    %1 = vector.load %arg7[%c0, %c0_0] : memref<4x512xbf16, #tpu.memory_space<vmem>>, vector<4x128xbf16>
    tpu.vector_store %arg7[%c0, %c0_0], %0 {strides = array<i32>} : memref<4x512xbf16, #tpu.memory_space<vmem>>, vector<4x128xbf16>,
    %c0_1 = arith.constant 0 : index
    %c0_2 = arith.constant 0 : index
    %c0_3 = arith.constant 0 : index
    %2 = vector.load %arg2[%c0_1, %c0_2, %c0_3] : memref<1x4x256xbf16, #tpu.memory_space<vmem>>, vector<1x4x256xbf16>
    %3 = vector.shape_cast %2 : vector<1x4x256xbf16> to vector<4x256xbf16>
    %c0_4 = arith.constant 0 : index
    %c128 = arith.constant 128 : index
    %4 = vector.load %arg7[%c0_4, %c128] : memref<4x512xbf16, #tpu.memory_space<vmem>>, vector<4x256xbf16>
    tpu.vector_store %arg7[%c0_4, %c128], %3 {strides = array<i32>} : memref<4x512xbf16, #tpu.memory_space<vmem>>, vector<4x256xbf16>,
    %cst_5 = arith.constant 0.000000e+00 : bf16
    %5 = vector.broadcast %cst_5 : bf16 to vector<4x128xbf16>
    %c0_6 = arith.constant 0 : index
    %c384 = arith.constant 384 : index
    %6 = vector.load %arg7[%c0_6, %c384] : memref<4x512xbf16, #tpu.memory_space<vmem>>, vector<4x128xbf16>
    tpu.vector_store %arg7[%c0_6, %c384], %5 {strides = array<i32>} : memref<4x512xbf16, #tpu.memory_space<vmem>>, vector<4x128xbf16>,
    %c128_i32 = arith.constant 128 : i32
    %7 = arith.muli %arg1, %c128_i32 : i32
    %8 = tpu.assume_multiple %7, 128 : i32
    %c0_7 = arith.constant 0 : index
    %9 = arith.index_cast %8 : i32 to index
    %10 = vector.load %arg7[%c0_7, %9] : memref<4x512xbf16, #tpu.memory_space<vmem>>, vector<4x384xbf16>
    %11 = tpu.iota {dimensions = array<i32: 1>} : vector<1x128xi32>
    %12 = vector.broadcast %8 : i32 to vector<1x128xi32>
    %13 = arith.addi %11, %12 : vector<1x128xi32>
    %c16_i32 = arith.constant 16 : i32
    %c0_i32 = arith.constant 0 : i32
    %14 = arith.cmpi eq, %c16_i32, %c0_i32 : i32
    %c1_i32 = arith.constant 1 : i32
    %15 = arith.select %14, %c1_i32, %c16_i32 : i32
    %16 = vector.broadcast %15 : i32 to vector<1x128xi32>
    %17 = arith.remsi %13, %16 : vector<1x128xi32>
    %c0_i32_8 = arith.constant 0 : i32
    %18 = vector.broadcast %c0_i32_8 : i32 to vector<1x128xi32>
    %19 = arith.cmpi ne, %17, %18 : vector<1x128xi32>
    %c0_i32_9 = arith.constant 0 : i32
    %20 = vector.broadcast %c0_i32_9 : i32 to vector<1x128xi32>
    %21 = arith.cmpi slt, %17, %20 : vector<1x128xi32>
    %c0_i32_10 = arith.constant 0 : i32
    %22 = arith.cmpi slt, %15, %c0_i32_10 : i32
    %23 = vector.broadcast %22 : i1 to vector<1x128xi1>
    %24 = vector.broadcast %23 : vector<1x128xi1> to vector<1x128xi1>
    %25 = arith.xori %21, %24 : vector<1x128xi1>
    %26 = arith.andi %25, %19 : vector<1x128xi1>
    %27 = vector.broadcast %15 : i32 to vector<1x128xi32>
    %28 = arith.addi %17, %27 : vector<1x128xi32>
    %29 = arith.select %26, %28, %17 : vector<1x128xi1>, vector<1x128xi32>
    %30 = vector.extract_strided_slice %10 {offsets = [0, 111], sizes = [4, 128], strides = [1, 1]} : vector<4x384xbf16> to vector<4x128xbf16>
    %c-1_i32 = arith.constant -1 : i32
    %31 = vector.broadcast %c-1_i32 : i32 to vector<1x128xi32>
    %32 = arith.addi %29, %31 : vector<1x128xi32>
    %c0_i32_11 = arith.constant 0 : i32
    %33 = vector.broadcast %c0_i32_11 : i32 to vector<1x128xi32>
    %34 = arith.cmpi slt, %32, %33 : vector<1x128xi32>
    %c-1_i32_12 = arith.constant -1 : i32
    %35 = vector.broadcast %c-1_i32_12 : i32 to vector<1x128xi32>
    %36 = arith.addi %29, %35 : vector<1x128xi32>
    %c16_i32_13 = arith.constant 16 : i32
    %37 = vector.broadcast %c16_i32_13 : i32 to vector<1x128xi32>
    %38 = arith.cmpi sge, %36, %37 : vector<1x128xi32>
    %39 = arith.ori %34, %38 : vector<1x128xi1>
    %cst_14 = arith.constant 0.000000e+00 : bf16
    %40 = vector.broadcast %cst_14 : bf16 to vector<4x128xbf16>
    %41 = vector.shape_cast %39 : vector<1x128xi1> to vector<1x128xi1>
    %42 = vector.broadcast %41 : vector<1x128xi1> to vector<4x128xi1>
    %43 = arith.select %42, %40, %30 : vector<4x128xi1>, vector<4x128xbf16>
    %44 = vector.extract_strided_slice %10 {offsets = [0, 112], sizes = [4, 128], strides = [1, 1]} : vector<4x384xbf16> to vector<4x128xbf16>
    %45 = vector.extract_strided_slice %10 {offsets = [0, 113], sizes = [4, 128], strides = [1, 1]} : vector<4x384xbf16> to vector<4x128xbf16>
    %c1_i32_15 = arith.constant 1 : i32
    %46 = vector.broadcast %c1_i32_15 : i32 to vector<1x128xi32>
    %47 = arith.addi %29, %46 : vector<1x128xi32>
    %c0_i32_16 = arith.constant 0 : i32
    %48 = vector.broadcast %c0_i32_16 : i32 to vector<1x128xi32>
    %49 = arith.cmpi slt, %47, %48 : vector<1x128xi32>
    %c1_i32_17 = arith.constant 1 : i32
    %50 = vector.broadcast %c1_i32_17 : i32 to vector<1x128xi32>
    %51 = arith.addi %29, %50 : vector<1x128xi32>
    %c16_i32_18 = arith.constant 16 : i32
    %52 = vector.broadcast %c16_i32_18 : i32 to vector<1x128xi32>
    %53 = arith.cmpi sge, %51, %52 : vector<1x128xi32>
    %54 = arith.ori %49, %53 : vector<1x128xi1>
    %cst_19 = arith.constant 0.000000e+00 : bf16
    %55 = vector.broadcast %cst_19 : bf16 to vector<4x128xbf16>
    %56 = vector.shape_cast %54 : vector<1x128xi1> to vector<1x128xi1>
    %57 = vector.broadcast %56 : vector<1x128xi1> to vector<4x128xi1>
    %58 = arith.select %57, %55, %45 : vector<4x128xi1>, vector<4x128xbf16>
    %59 = vector.extract_strided_slice %10 {offsets = [0, 127], sizes = [4, 128], strides = [1, 1]} : vector<4x384xbf16> to vector<4x128xbf16>
    %c-1_i32_20 = arith.constant -1 : i32
    %60 = vector.broadcast %c-1_i32_20 : i32 to vector<1x128xi32>
    %61 = arith.addi %29, %60 : vector<1x128xi32>
    %c0_i32_21 = arith.constant 0 : i32
    %62 = vector.broadcast %c0_i32_21 : i32 to vector<1x128xi32>
    %63 = arith.cmpi slt, %61, %62 : vector<1x128xi32>
    %c-1_i32_22 = arith.constant -1 : i32
    %64 = vector.broadcast %c-1_i32_22 : i32 to vector<1x128xi32>
    %65 = arith.addi %29, %64 : vector<1x128xi32>
    %c16_i32_23 = arith.constant 16 : i32
    %66 = vector.broadcast %c16_i32_23 : i32 to vector<1x128xi32>
    %67 = arith.cmpi sge, %65, %66 : vector<1x128xi32>
    %68 = arith.ori %63, %67 : vector<1x128xi1>
    %cst_24 = arith.constant 0.000000e+00 : bf16
    %69 = vector.broadcast %cst_24 : bf16 to vector<4x128xbf16>
    %70 = vector.shape_cast %68 : vector<1x128xi1> to vector<1x128xi1>
    %71 = vector.broadcast %70 : vector<1x128xi1> to vector<4x128xi1>
    %72 = arith.select %71, %69, %59 : vector<4x128xi1>, vector<4x128xbf16>
    %73 = vector.extract_strided_slice %10 {offsets = [0, 128], sizes = [4, 128], strides = [1, 1]} : vector<4x384xbf16> to vector<4x128xbf16>
    %74 = vector.extract_strided_slice %10 {offsets = [0, 129], sizes = [4, 128], strides = [1, 1]} : vector<4x384xbf16> to vector<4x128xbf16>
    %c1_i32_25 = arith.constant 1 : i32
    %75 = vector.broadcast %c1_i32_25 : i32 to vector<1x128xi32>
    %76 = arith.addi %29, %75 : vector<1x128xi32>
    %c0_i32_26 = arith.constant 0 : i32
    %77 = vector.broadcast %c0_i32_26 : i32 to vector<1x128xi32>
    %78 = arith.cmpi slt, %76, %77 : vector<1x128xi32>
    %c1_i32_27 = arith.constant 1 : i32
    %79 = vector.broadcast %c1_i32_27 : i32 to vector<1x128xi32>
    %80 = arith.addi %29, %79 : vector<1x128xi32>
    %c16_i32_28 = arith.constant 16 : i32
    %81 = vector.broadcast %c16_i32_28 : i32 to vector<1x128xi32>
    %82 = arith.cmpi sge, %80, %81 : vector<1x128xi32>
    %83 = arith.ori %78, %82 : vector<1x128xi1>
    %cst_29 = arith.constant 0.000000e+00 : bf16
    %84 = vector.broadcast %cst_29 : bf16 to vector<4x128xbf16>
    %85 = vector.shape_cast %83 : vector<1x128xi1> to vector<1x128xi1>
    %86 = vector.broadcast %85 : vector<1x128xi1> to vector<4x128xi1>
    %87 = arith.select %86, %84, %74 : vector<4x128xi1>, vector<4x128xbf16>
    %88 = vector.extract_strided_slice %10 {offsets = [0, 143], sizes = [4, 128], strides = [1, 1]} : vector<4x384xbf16> to vector<4x128xbf16>
    %c-1_i32_30 = arith.constant -1 : i32
    %89 = vector.broadcast %c-1_i32_30 : i32 to vector<1x128xi32>
    %90 = arith.addi %29, %89 : vector<1x128xi32>
    %c0_i32_31 = arith.constant 0 : i32
    %91 = vector.broadcast %c0_i32_31 : i32 to vector<1x128xi32>
    %92 = arith.cmpi slt, %90, %91 : vector<1x128xi32>
    %c-1_i32_32 = arith.constant -1 : i32
    %93 = vector.broadcast %c-1_i32_32 : i32 to vector<1x128xi32>
    %94 = arith.addi %29, %93 : vector<1x128xi32>
    %c16_i32_33 = arith.constant 16 : i32
    %95 = vector.broadcast %c16_i32_33 : i32 to vector<1x128xi32>
    %96 = arith.cmpi sge, %94, %95 : vector<1x128xi32>
    %97 = arith.ori %92, %96 : vector<1x128xi1>
    %cst_34 = arith.constant 0.000000e+00 : bf16
    %98 = vector.broadcast %cst_34 : bf16 to vector<4x128xbf16>
    %99 = vector.shape_cast %97 : vector<1x128xi1> to vector<1x128xi1>
    %100 = vector.broadcast %99 : vector<1x128xi1> to vector<4x128xi1>
    %101 = arith.select %100, %98, %88 : vector<4x128xi1>, vector<4x128xbf16>
    %102 = vector.extract_strided_slice %10 {offsets = [0, 144], sizes = [4, 128], strides = [1, 1]} : vector<4x384xbf16> to vector<4x128xbf16>
    %103 = vector.extract_strided_slice %10 {offsets = [0, 145], sizes = [4, 128], strides = [1, 1]} : vector<4x384xbf16> to vector<4x128xbf16>
    %c1_i32_35 = arith.constant 1 : i32
    %104 = vector.broadcast %c1_i32_35 : i32 to vector<1x128xi32>
    %105 = arith.addi %29, %104 : vector<1x128xi32>
    %c0_i32_36 = arith.constant 0 : i32
    %106 = vector.broadcast %c0_i32_36 : i32 to vector<1x128xi32>
    %107 = arith.cmpi slt, %105, %106 : vector<1x128xi32>
    %c1_i32_37 = arith.constant 1 : i32
    %108 = vector.broadcast %c1_i32_37 : i32 to vector<1x128xi32>
    %109 = arith.addi %29, %108 : vector<1x128xi32>
    %c16_i32_38 = arith.constant 16 : i32
    %110 = vector.broadcast %c16_i32_38 : i32 to vector<1x128xi32>
    %111 = arith.cmpi sge, %109, %110 : vector<1x128xi32>
    %112 = arith.ori %107, %111 : vector<1x128xi1>
    %cst_39 = arith.constant 0.000000e+00 : bf16
    %113 = vector.broadcast %cst_39 : bf16 to vector<4x128xbf16>
    %114 = vector.shape_cast %112 : vector<1x128xi1> to vector<1x128xi1>
    %115 = vector.broadcast %114 : vector<1x128xi1> to vector<4x128xi1>
    %116 = arith.select %115, %113, %103 : vector<4x128xi1>, vector<4x128xbf16>
    %117 = tpu.concatenate %43, %44, %58, %72, %73, %87, %101, %102, %116 in 0 : vector<4x128xbf16>, vector<4x128xbf16>, vector<4x128xbf16>, vector<4x128xbf16>, vector<4x128xbf16>, vector<4x128xbf16>, vector<4x128xbf16>, vector<4x128xbf16>, vector<4x128xbf16> -> vector<36x128xbf16>
    %c0_40 = arith.constant 0 : index
    %c0_41 = arith.constant 0 : index
    %118 = vector.load %arg3[%c0_40, %c0_41] : memref<8x36xbf16, #tpu.memory_space<vmem>>, vector<8x36xbf16>
    %cst_42 = arith.constant dense<0.000000e+00> : vector<8x128xf32>
    %119 = tpu.matmul %118, %117, %cst_42 {dimension_numbers = #tpu.dot_dimension_numbers<[1], [0], [0], [1], [0, 0, 1, 1], [], []>} : vector<8x36xbf16>, vector<36x128xbf16>, vector<8x128xf32> -> vector<8x128xf32>
    %c0_43 = arith.constant 0 : index
    %c0_44 = arith.constant 0 : index
    %120 = vector.load %arg4[%c0_43, %c0_44] : memref<8x1xf32, #tpu.memory_space<vmem>>, vector<8x1xf32>
    %121 = vector.broadcast %120 : vector<8x1xf32> to vector<8x128xf32>
    %122 = arith.mulf %119, %121 : vector<8x128xf32>
    %c0_45 = arith.constant 0 : index
    %c0_46 = arith.constant 0 : index
    %123 = vector.load %arg5[%c0_45, %c0_46] : memref<8x1xf32, #tpu.memory_space<vmem>>, vector<8x1xf32>
    %124 = vector.broadcast %123 : vector<8x1xf32> to vector<8x128xf32>
    %125 = arith.addf %122, %124 : vector<8x128xf32>
    %126 = math.absf %125 : vector<8x128xf32>
    %cst_47 = arith.constant 0.000000e+00 : f32
    %127 = vector.broadcast %cst_47 : f32 to vector<8x128xf32>
    %128 = arith.subf %127, %126 : vector<8x128xf32>
    %129 = math.exp %128 : vector<8x128xf32>
    %cst_48 = arith.constant 0.000000e+00 : f32
    %130 = vector.broadcast %cst_48 : f32 to vector<8x128xf32>
    %131 = arith.cmpf oge, %125, %130 : vector<8x128xf32>
    %cst_49 = arith.constant 2.000000e+00 : f32
    %132 = vector.broadcast %cst_49 : f32 to vector<8x128xf32>
    %133 = arith.mulf %132, %129 : vector<8x128xf32>
    %cst_50 = arith.constant 1.000000e+00 : f32
    %134 = vector.broadcast %cst_50 : f32 to vector<8x128xf32>
    %135 = arith.addf %134, %133 : vector<8x128xf32>
    %cst_51 = arith.constant 2.000000e+00 : f32
    %136 = vector.broadcast %cst_51 : f32 to vector<8x128xf32>
    %137 = arith.addf %136, %129 : vector<8x128xf32>
    %138 = arith.mulf %129, %137 : vector<8x128xf32>
    %139 = arith.select %131, %135, %138 : vector<8x128xi1>, vector<8x128xf32>
    %cst_52 = arith.constant 2.000000e+00 : f32
    %140 = vector.broadcast %cst_52 : f32 to vector<8x128xf32>
    %141 = arith.mulf %140, %129 : vector<8x128xf32>
    %cst_53 = arith.constant 1.000000e+00 : f32
    %142 = vector.broadcast %cst_53 : f32 to vector<8x128xf32>
    %143 = arith.addf %142, %141 : vector<8x128xf32>
    %cst_54 = arith.constant 2.000000e+00 : f32
    %144 = vector.broadcast %cst_54 : f32 to vector<8x128xf32>
    %145 = arith.mulf %144, %129 : vector<8x128xf32>
    %146 = arith.mulf %145, %129 : vector<8x128xf32>
    %147 = arith.addf %143, %146 : vector<8x128xf32>
    %cst_55 = arith.constant 2.000000e+00 : f32
    %148 = vector.broadcast %cst_55 : f32 to vector<8x128xf32>
    %149 = arith.mulf %148, %129 : vector<8x128xf32>
    %cst_56 = arith.constant 2.000000e+00 : f32
    %150 = vector.broadcast %cst_56 : f32 to vector<8x128xf32>
    %151 = arith.addf %150, %149 : vector<8x128xf32>
    %152 = arith.mulf %129, %129 : vector<8x128xf32>
    %153 = arith.addf %151, %152 : vector<8x128xf32>
    %154 = arith.select %131, %147, %153 : vector<8x128xi1>, vector<8x128xf32>
    %155 = arith.mulf %125, %139 : vector<8x128xf32>
    %156 = tpu.reciprocal %154 {approx = true} : vector<8x128xf32> -> vector<8x128xf32>
    %157 = arith.mulf %155, %156 : vector<8x128xf32>
    %158 = arith.truncf %157 : vector<8x128xf32> to vector<8x128xbf16>
    %c0_57 = arith.constant 0 : index
    %c0_58 = arith.constant 0 : index
    %c0_59 = arith.constant 0 : index
    %159 = vector.load %arg6[%c0_57, %c0_58, %c0_59] : memref<1x8x128xbf16, #tpu.memory_space<vmem>>, vector<1x8x128xbf16>
    %160 = vector.shape_cast %159 : vector<1x8x128xbf16> to vector<8x128xbf16>
    %161 = vector.shape_cast %158 : vector<8x128xbf16> to vector<1x8x128xbf16>
    tpu.vector_store %arg6[%c0_57, %c0_58, %c0_59], %161 {strides = array<i32>} : memref<1x8x128xbf16, #tpu.memory_space<vmem>>, vector<1x8x128xbf16>,
    return
  }
  func.func @transform_0(%arg0: i32, %arg1: i32) -> (i32, i32, i32) {
    %c0_i32 = arith.constant 0 : i32
    %c0_i32_0 = arith.constant 0 : i32
    %c0_i32_1 = arith.constant 0 : i32
    return %arg0, %c0_i32, %c0_i32_0 : i32, i32, i32
  }
  func.func @transform_1(%arg0: i32, %arg1: i32) -> (i32, i32) {
    %c0_i32 = arith.constant 0 : i32
    %c0_i32_0 = arith.constant 0 : i32
    %c0_i32_1 = arith.constant 0 : i32
    return %c0_i32, %c0_i32_0 : i32, i32
  }
  func.func @transform_2(%arg0: i32, %arg1: i32) -> (i32, i32) {
    %c0_i32 = arith.constant 0 : i32
    %c0_i32_0 = arith.constant 0 : i32
    %c0_i32_1 = arith.constant 0 : i32
    return %c0_i32, %c0_i32_0 : i32, i32
  }
  func.func @transform_3(%arg0: i32, %arg1: i32) -> (i32, i32) {
    %c0_i32 = arith.constant 0 : i32
    %c0_i32_0 = arith.constant 0 : i32
    %c0_i32_1 = arith.constant 0 : i32
    return %c0_i32, %c0_i32_0 : i32, i32
  }
  func.func @transform_4(%arg0: i32, %arg1: i32) -> (i32, i32, i32) {
    %c0_i32 = arith.constant 0 : i32
    %c0_i32_0 = arith.constant 0 : i32
    return %arg0, %c0_i32, %arg1 : i32, i32, i32
  }
}

module attributes {stable_mosaic.version = 11 : i64} {
  func.func @_conv_concat_kernel(%arg0: i32, %arg1: i32, %arg2: memref<1x4x256xbf16, #tpu.memory_space<vmem>>, %arg3: memref<8x100xbf16, #tpu.memory_space<vmem>>, %arg4: memref<8x1xf32, #tpu.memory_space<vmem>>, %arg5: memref<8x1xf32, #tpu.memory_space<vmem>>, %arg6: memref<1x8x128xbf16, #tpu.memory_space<vmem>>, %arg7: memref<1x8x128xbf16, #tpu.memory_space<vmem>>, %arg8: memref<1x8x128xbf16, #tpu.memory_space<vmem>>, %arg9: memref<1x32x128xbf16, #tpu.memory_space<vmem>>, %arg10: memref<4x512xbf16, #tpu.memory_space<vmem>>) attributes {dimension_semantics = [#tpu.dimension_semantics<parallel>, #tpu.dimension_semantics<parallel>], iteration_bounds = array<i64: 2, 2>, scalar_prefetch = 0 : i64, scratch_operands = 1 : i64, tpu.core_type = #tpu.core_type<tc>, window_params = [{transform_indices = @transform_0, window_bounds = array<i64: 1, 4, 256>}, {pipeline_mode = #tpu.pipeline_mode<synchronous>, transform_indices = @transform_1, window_bounds = array<i64: 8, 100>}, {pipeline_mode = #tpu.pipeline_mode<synchronous>, transform_indices = @transform_2, window_bounds = array<i64: 8, 1>}, {pipeline_mode = #tpu.pipeline_mode<synchronous>, transform_indices = @transform_3, window_bounds = array<i64: 8, 1>}, {transform_indices = @transform_4, window_bounds = array<i64: 1, 8, 128>}, {transform_indices = @transform_5, window_bounds = array<i64: 1, 8, 128>}, {transform_indices = @transform_6, window_bounds = array<i64: 1, 8, 128>}, {transform_indices = @transform_7, window_bounds = array<i64: 1, 32, 128>}]} {
    %cst = arith.constant 0.000000e+00 : bf16
    %0 = vector.broadcast %cst : bf16 to vector<4x128xbf16>
    %c0 = arith.constant 0 : index
    %c0_0 = arith.constant 0 : index
    %1 = vector.load %arg10[%c0, %c0_0] : memref<4x512xbf16, #tpu.memory_space<vmem>>, vector<4x128xbf16>
    tpu.vector_store %arg10[%c0, %c0_0], %0 {strides = array<i32>} : memref<4x512xbf16, #tpu.memory_space<vmem>>, vector<4x128xbf16>,
    %c0_1 = arith.constant 0 : index
    %c0_2 = arith.constant 0 : index
    %c0_3 = arith.constant 0 : index
    %2 = vector.load %arg2[%c0_1, %c0_2, %c0_3] : memref<1x4x256xbf16, #tpu.memory_space<vmem>>, vector<1x4x256xbf16>
    %3 = vector.shape_cast %2 : vector<1x4x256xbf16> to vector<4x256xbf16>
    %c0_4 = arith.constant 0 : index
    %c128 = arith.constant 128 : index
    %4 = vector.load %arg10[%c0_4, %c128] : memref<4x512xbf16, #tpu.memory_space<vmem>>, vector<4x256xbf16>
    tpu.vector_store %arg10[%c0_4, %c128], %3 {strides = array<i32>} : memref<4x512xbf16, #tpu.memory_space<vmem>>, vector<4x256xbf16>,
    %cst_5 = arith.constant 0.000000e+00 : bf16
    %5 = vector.broadcast %cst_5 : bf16 to vector<4x128xbf16>
    %c0_6 = arith.constant 0 : index
    %c384 = arith.constant 384 : index
    %6 = vector.load %arg10[%c0_6, %c384] : memref<4x512xbf16, #tpu.memory_space<vmem>>, vector<4x128xbf16>
    tpu.vector_store %arg10[%c0_6, %c384], %5 {strides = array<i32>} : memref<4x512xbf16, #tpu.memory_space<vmem>>, vector<4x128xbf16>,
    %c128_i32 = arith.constant 128 : i32
    %7 = arith.muli %arg1, %c128_i32 : i32
    %8 = tpu.assume_multiple %7, 128 : i32
    %c0_7 = arith.constant 0 : index
    %9 = arith.index_cast %8 : i32 to index
    %10 = vector.load %arg10[%c0_7, %9] : memref<4x512xbf16, #tpu.memory_space<vmem>>, vector<4x384xbf16>
    %11 = tpu.iota {dimensions = array<i32: 1>} : vector<1x128xi32>
    %12 = vector.broadcast %8 : i32 to vector<1x128xi32>
    %13 = arith.addi %11, %12 : vector<1x128xi32>
    %c16_i32 = arith.constant 16 : i32
    %c0_i32 = arith.constant 0 : i32
    %14 = arith.cmpi eq, %c16_i32, %c0_i32 : i32
    %c1_i32 = arith.constant 1 : i32
    %15 = arith.select %14, %c1_i32, %c16_i32 : i32
    %16 = vector.broadcast %15 : i32 to vector<1x128xi32>
    %17 = arith.remsi %13, %16 : vector<1x128xi32>
    %c0_i32_8 = arith.constant 0 : i32
    %18 = vector.broadcast %c0_i32_8 : i32 to vector<1x128xi32>
    %19 = arith.cmpi ne, %17, %18 : vector<1x128xi32>
    %c0_i32_9 = arith.constant 0 : i32
    %20 = vector.broadcast %c0_i32_9 : i32 to vector<1x128xi32>
    %21 = arith.cmpi slt, %17, %20 : vector<1x128xi32>
    %c0_i32_10 = arith.constant 0 : i32
    %22 = arith.cmpi slt, %15, %c0_i32_10 : i32
    %23 = vector.broadcast %22 : i1 to vector<1x128xi1>
    %24 = vector.broadcast %23 : vector<1x128xi1> to vector<1x128xi1>
    %25 = arith.xori %21, %24 : vector<1x128xi1>
    %26 = arith.andi %25, %19 : vector<1x128xi1>
    %27 = vector.broadcast %15 : i32 to vector<1x128xi32>
    %28 = arith.addi %17, %27 : vector<1x128xi32>
    %29 = arith.select %26, %28, %17 : vector<1x128xi1>, vector<1x128xi32>
    %30 = vector.extract_strided_slice %10 {offsets = [0, 94], sizes = [4, 128], strides = [1, 1]} : vector<4x384xbf16> to vector<4x128xbf16>
    %c-2_i32 = arith.constant -2 : i32
    %31 = vector.broadcast %c-2_i32 : i32 to vector<1x128xi32>
    %32 = arith.addi %29, %31 : vector<1x128xi32>
    %c0_i32_11 = arith.constant 0 : i32
    %33 = vector.broadcast %c0_i32_11 : i32 to vector<1x128xi32>
    %34 = arith.cmpi slt, %32, %33 : vector<1x128xi32>
    %c-2_i32_12 = arith.constant -2 : i32
    %35 = vector.broadcast %c-2_i32_12 : i32 to vector<1x128xi32>
    %36 = arith.addi %29, %35 : vector<1x128xi32>
    %c16_i32_13 = arith.constant 16 : i32
    %37 = vector.broadcast %c16_i32_13 : i32 to vector<1x128xi32>
    %38 = arith.cmpi sge, %36, %37 : vector<1x128xi32>
    %39 = arith.ori %34, %38 : vector<1x128xi1>
    %cst_14 = arith.constant 0.000000e+00 : bf16
    %40 = vector.broadcast %cst_14 : bf16 to vector<4x128xbf16>
    %41 = vector.shape_cast %39 : vector<1x128xi1> to vector<1x128xi1>
    %42 = vector.broadcast %41 : vector<1x128xi1> to vector<4x128xi1>
    %43 = arith.select %42, %40, %30 : vector<4x128xi1>, vector<4x128xbf16>
    %44 = vector.extract_strided_slice %10 {offsets = [0, 95], sizes = [4, 128], strides = [1, 1]} : vector<4x384xbf16> to vector<4x128xbf16>
    %c-1_i32 = arith.constant -1 : i32
    %45 = vector.broadcast %c-1_i32 : i32 to vector<1x128xi32>
    %46 = arith.addi %29, %45 : vector<1x128xi32>
    %c0_i32_15 = arith.constant 0 : i32
    %47 = vector.broadcast %c0_i32_15 : i32 to vector<1x128xi32>
    %48 = arith.cmpi slt, %46, %47 : vector<1x128xi32>
    %c-1_i32_16 = arith.constant -1 : i32
    %49 = vector.broadcast %c-1_i32_16 : i32 to vector<1x128xi32>
    %50 = arith.addi %29, %49 : vector<1x128xi32>
    %c16_i32_17 = arith.constant 16 : i32
    %51 = vector.broadcast %c16_i32_17 : i32 to vector<1x128xi32>
    %52 = arith.cmpi sge, %50, %51 : vector<1x128xi32>
    %53 = arith.ori %48, %52 : vector<1x128xi1>
    %cst_18 = arith.constant 0.000000e+00 : bf16
    %54 = vector.broadcast %cst_18 : bf16 to vector<4x128xbf16>
    %55 = vector.shape_cast %53 : vector<1x128xi1> to vector<1x128xi1>
    %56 = vector.broadcast %55 : vector<1x128xi1> to vector<4x128xi1>
    %57 = arith.select %56, %54, %44 : vector<4x128xi1>, vector<4x128xbf16>
    %58 = vector.extract_strided_slice %10 {offsets = [0, 96], sizes = [4, 128], strides = [1, 1]} : vector<4x384xbf16> to vector<4x128xbf16>
    %59 = vector.extract_strided_slice %10 {offsets = [0, 97], sizes = [4, 128], strides = [1, 1]} : vector<4x384xbf16> to vector<4x128xbf16>
    %c1_i32_19 = arith.constant 1 : i32
    %60 = vector.broadcast %c1_i32_19 : i32 to vector<1x128xi32>
    %61 = arith.addi %29, %60 : vector<1x128xi32>
    %c0_i32_20 = arith.constant 0 : i32
    %62 = vector.broadcast %c0_i32_20 : i32 to vector<1x128xi32>
    %63 = arith.cmpi slt, %61, %62 : vector<1x128xi32>
    %c1_i32_21 = arith.constant 1 : i32
    %64 = vector.broadcast %c1_i32_21 : i32 to vector<1x128xi32>
    %65 = arith.addi %29, %64 : vector<1x128xi32>
    %c16_i32_22 = arith.constant 16 : i32
    %66 = vector.broadcast %c16_i32_22 : i32 to vector<1x128xi32>
    %67 = arith.cmpi sge, %65, %66 : vector<1x128xi32>
    %68 = arith.ori %63, %67 : vector<1x128xi1>
    %cst_23 = arith.constant 0.000000e+00 : bf16
    %69 = vector.broadcast %cst_23 : bf16 to vector<4x128xbf16>
    %70 = vector.shape_cast %68 : vector<1x128xi1> to vector<1x128xi1>
    %71 = vector.broadcast %70 : vector<1x128xi1> to vector<4x128xi1>
    %72 = arith.select %71, %69, %59 : vector<4x128xi1>, vector<4x128xbf16>
    %73 = vector.extract_strided_slice %10 {offsets = [0, 98], sizes = [4, 128], strides = [1, 1]} : vector<4x384xbf16> to vector<4x128xbf16>
    %c2_i32 = arith.constant 2 : i32
    %74 = vector.broadcast %c2_i32 : i32 to vector<1x128xi32>
    %75 = arith.addi %29, %74 : vector<1x128xi32>
    %c0_i32_24 = arith.constant 0 : i32
    %76 = vector.broadcast %c0_i32_24 : i32 to vector<1x128xi32>
    %77 = arith.cmpi slt, %75, %76 : vector<1x128xi32>
    %c2_i32_25 = arith.constant 2 : i32
    %78 = vector.broadcast %c2_i32_25 : i32 to vector<1x128xi32>
    %79 = arith.addi %29, %78 : vector<1x128xi32>
    %c16_i32_26 = arith.constant 16 : i32
    %80 = vector.broadcast %c16_i32_26 : i32 to vector<1x128xi32>
    %81 = arith.cmpi sge, %79, %80 : vector<1x128xi32>
    %82 = arith.ori %77, %81 : vector<1x128xi1>
    %cst_27 = arith.constant 0.000000e+00 : bf16
    %83 = vector.broadcast %cst_27 : bf16 to vector<4x128xbf16>
    %84 = vector.shape_cast %82 : vector<1x128xi1> to vector<1x128xi1>
    %85 = vector.broadcast %84 : vector<1x128xi1> to vector<4x128xi1>
    %86 = arith.select %85, %83, %73 : vector<4x128xi1>, vector<4x128xbf16>
    %87 = vector.extract_strided_slice %10 {offsets = [0, 110], sizes = [4, 128], strides = [1, 1]} : vector<4x384xbf16> to vector<4x128xbf16>
    %c-2_i32_28 = arith.constant -2 : i32
    %88 = vector.broadcast %c-2_i32_28 : i32 to vector<1x128xi32>
    %89 = arith.addi %29, %88 : vector<1x128xi32>
    %c0_i32_29 = arith.constant 0 : i32
    %90 = vector.broadcast %c0_i32_29 : i32 to vector<1x128xi32>
    %91 = arith.cmpi slt, %89, %90 : vector<1x128xi32>
    %c-2_i32_30 = arith.constant -2 : i32
    %92 = vector.broadcast %c-2_i32_30 : i32 to vector<1x128xi32>
    %93 = arith.addi %29, %92 : vector<1x128xi32>
    %c16_i32_31 = arith.constant 16 : i32
    %94 = vector.broadcast %c16_i32_31 : i32 to vector<1x128xi32>
    %95 = arith.cmpi sge, %93, %94 : vector<1x128xi32>
    %96 = arith.ori %91, %95 : vector<1x128xi1>
    %cst_32 = arith.constant 0.000000e+00 : bf16
    %97 = vector.broadcast %cst_32 : bf16 to vector<4x128xbf16>
    %98 = vector.shape_cast %96 : vector<1x128xi1> to vector<1x128xi1>
    %99 = vector.broadcast %98 : vector<1x128xi1> to vector<4x128xi1>
    %100 = arith.select %99, %97, %87 : vector<4x128xi1>, vector<4x128xbf16>
    %101 = vector.extract_strided_slice %10 {offsets = [0, 111], sizes = [4, 128], strides = [1, 1]} : vector<4x384xbf16> to vector<4x128xbf16>
    %c-1_i32_33 = arith.constant -1 : i32
    %102 = vector.broadcast %c-1_i32_33 : i32 to vector<1x128xi32>
    %103 = arith.addi %29, %102 : vector<1x128xi32>
    %c0_i32_34 = arith.constant 0 : i32
    %104 = vector.broadcast %c0_i32_34 : i32 to vector<1x128xi32>
    %105 = arith.cmpi slt, %103, %104 : vector<1x128xi32>
    %c-1_i32_35 = arith.constant -1 : i32
    %106 = vector.broadcast %c-1_i32_35 : i32 to vector<1x128xi32>
    %107 = arith.addi %29, %106 : vector<1x128xi32>
    %c16_i32_36 = arith.constant 16 : i32
    %108 = vector.broadcast %c16_i32_36 : i32 to vector<1x128xi32>
    %109 = arith.cmpi sge, %107, %108 : vector<1x128xi32>
    %110 = arith.ori %105, %109 : vector<1x128xi1>
    %cst_37 = arith.constant 0.000000e+00 : bf16
    %111 = vector.broadcast %cst_37 : bf16 to vector<4x128xbf16>
    %112 = vector.shape_cast %110 : vector<1x128xi1> to vector<1x128xi1>
    %113 = vector.broadcast %112 : vector<1x128xi1> to vector<4x128xi1>
    %114 = arith.select %113, %111, %101 : vector<4x128xi1>, vector<4x128xbf16>
    %115 = vector.extract_strided_slice %10 {offsets = [0, 112], sizes = [4, 128], strides = [1, 1]} : vector<4x384xbf16> to vector<4x128xbf16>
    %116 = vector.extract_strided_slice %10 {offsets = [0, 113], sizes = [4, 128], strides = [1, 1]} : vector<4x384xbf16> to vector<4x128xbf16>
    %c1_i32_38 = arith.constant 1 : i32
    %117 = vector.broadcast %c1_i32_38 : i32 to vector<1x128xi32>
    %118 = arith.addi %29, %117 : vector<1x128xi32>
    %c0_i32_39 = arith.constant 0 : i32
    %119 = vector.broadcast %c0_i32_39 : i32 to vector<1x128xi32>
    %120 = arith.cmpi slt, %118, %119 : vector<1x128xi32>
    %c1_i32_40 = arith.constant 1 : i32
    %121 = vector.broadcast %c1_i32_40 : i32 to vector<1x128xi32>
    %122 = arith.addi %29, %121 : vector<1x128xi32>
    %c16_i32_41 = arith.constant 16 : i32
    %123 = vector.broadcast %c16_i32_41 : i32 to vector<1x128xi32>
    %124 = arith.cmpi sge, %122, %123 : vector<1x128xi32>
    %125 = arith.ori %120, %124 : vector<1x128xi1>
    %cst_42 = arith.constant 0.000000e+00 : bf16
    %126 = vector.broadcast %cst_42 : bf16 to vector<4x128xbf16>
    %127 = vector.shape_cast %125 : vector<1x128xi1> to vector<1x128xi1>
    %128 = vector.broadcast %127 : vector<1x128xi1> to vector<4x128xi1>
    %129 = arith.select %128, %126, %116 : vector<4x128xi1>, vector<4x128xbf16>
    %130 = vector.extract_strided_slice %10 {offsets = [0, 114], sizes = [4, 128], strides = [1, 1]} : vector<4x384xbf16> to vector<4x128xbf16>
    %c2_i32_43 = arith.constant 2 : i32
    %131 = vector.broadcast %c2_i32_43 : i32 to vector<1x128xi32>
    %132 = arith.addi %29, %131 : vector<1x128xi32>
    %c0_i32_44 = arith.constant 0 : i32
    %133 = vector.broadcast %c0_i32_44 : i32 to vector<1x128xi32>
    %134 = arith.cmpi slt, %132, %133 : vector<1x128xi32>
    %c2_i32_45 = arith.constant 2 : i32
    %135 = vector.broadcast %c2_i32_45 : i32 to vector<1x128xi32>
    %136 = arith.addi %29, %135 : vector<1x128xi32>
    %c16_i32_46 = arith.constant 16 : i32
    %137 = vector.broadcast %c16_i32_46 : i32 to vector<1x128xi32>
    %138 = arith.cmpi sge, %136, %137 : vector<1x128xi32>
    %139 = arith.ori %134, %138 : vector<1x128xi1>
    %cst_47 = arith.constant 0.000000e+00 : bf16
    %140 = vector.broadcast %cst_47 : bf16 to vector<4x128xbf16>
    %141 = vector.shape_cast %139 : vector<1x128xi1> to vector<1x128xi1>
    %142 = vector.broadcast %141 : vector<1x128xi1> to vector<4x128xi1>
    %143 = arith.select %142, %140, %130 : vector<4x128xi1>, vector<4x128xbf16>
    %144 = vector.extract_strided_slice %10 {offsets = [0, 126], sizes = [4, 128], strides = [1, 1]} : vector<4x384xbf16> to vector<4x128xbf16>
    %c-2_i32_48 = arith.constant -2 : i32
    %145 = vector.broadcast %c-2_i32_48 : i32 to vector<1x128xi32>
    %146 = arith.addi %29, %145 : vector<1x128xi32>
    %c0_i32_49 = arith.constant 0 : i32
    %147 = vector.broadcast %c0_i32_49 : i32 to vector<1x128xi32>
    %148 = arith.cmpi slt, %146, %147 : vector<1x128xi32>
    %c-2_i32_50 = arith.constant -2 : i32
    %149 = vector.broadcast %c-2_i32_50 : i32 to vector<1x128xi32>
    %150 = arith.addi %29, %149 : vector<1x128xi32>
    %c16_i32_51 = arith.constant 16 : i32
    %151 = vector.broadcast %c16_i32_51 : i32 to vector<1x128xi32>
    %152 = arith.cmpi sge, %150, %151 : vector<1x128xi32>
    %153 = arith.ori %148, %152 : vector<1x128xi1>
    %cst_52 = arith.constant 0.000000e+00 : bf16
    %154 = vector.broadcast %cst_52 : bf16 to vector<4x128xbf16>
    %155 = vector.shape_cast %153 : vector<1x128xi1> to vector<1x128xi1>
    %156 = vector.broadcast %155 : vector<1x128xi1> to vector<4x128xi1>
    %157 = arith.select %156, %154, %144 : vector<4x128xi1>, vector<4x128xbf16>
    %158 = vector.extract_strided_slice %10 {offsets = [0, 127], sizes = [4, 128], strides = [1, 1]} : vector<4x384xbf16> to vector<4x128xbf16>
    %c-1_i32_53 = arith.constant -1 : i32
    %159 = vector.broadcast %c-1_i32_53 : i32 to vector<1x128xi32>
    %160 = arith.addi %29, %159 : vector<1x128xi32>
    %c0_i32_54 = arith.constant 0 : i32
    %161 = vector.broadcast %c0_i32_54 : i32 to vector<1x128xi32>
    %162 = arith.cmpi slt, %160, %161 : vector<1x128xi32>
    %c-1_i32_55 = arith.constant -1 : i32
    %163 = vector.broadcast %c-1_i32_55 : i32 to vector<1x128xi32>
    %164 = arith.addi %29, %163 : vector<1x128xi32>
    %c16_i32_56 = arith.constant 16 : i32
    %165 = vector.broadcast %c16_i32_56 : i32 to vector<1x128xi32>
    %166 = arith.cmpi sge, %164, %165 : vector<1x128xi32>
    %167 = arith.ori %162, %166 : vector<1x128xi1>
    %cst_57 = arith.constant 0.000000e+00 : bf16
    %168 = vector.broadcast %cst_57 : bf16 to vector<4x128xbf16>
    %169 = vector.shape_cast %167 : vector<1x128xi1> to vector<1x128xi1>
    %170 = vector.broadcast %169 : vector<1x128xi1> to vector<4x128xi1>
    %171 = arith.select %170, %168, %158 : vector<4x128xi1>, vector<4x128xbf16>
    %172 = vector.extract_strided_slice %10 {offsets = [0, 128], sizes = [4, 128], strides = [1, 1]} : vector<4x384xbf16> to vector<4x128xbf16>
    %173 = vector.extract_strided_slice %10 {offsets = [0, 129], sizes = [4, 128], strides = [1, 1]} : vector<4x384xbf16> to vector<4x128xbf16>
    %c1_i32_58 = arith.constant 1 : i32
    %174 = vector.broadcast %c1_i32_58 : i32 to vector<1x128xi32>
    %175 = arith.addi %29, %174 : vector<1x128xi32>
    %c0_i32_59 = arith.constant 0 : i32
    %176 = vector.broadcast %c0_i32_59 : i32 to vector<1x128xi32>
    %177 = arith.cmpi slt, %175, %176 : vector<1x128xi32>
    %c1_i32_60 = arith.constant 1 : i32
    %178 = vector.broadcast %c1_i32_60 : i32 to vector<1x128xi32>
    %179 = arith.addi %29, %178 : vector<1x128xi32>
    %c16_i32_61 = arith.constant 16 : i32
    %180 = vector.broadcast %c16_i32_61 : i32 to vector<1x128xi32>
    %181 = arith.cmpi sge, %179, %180 : vector<1x128xi32>
    %182 = arith.ori %177, %181 : vector<1x128xi1>
    %cst_62 = arith.constant 0.000000e+00 : bf16
    %183 = vector.broadcast %cst_62 : bf16 to vector<4x128xbf16>
    %184 = vector.shape_cast %182 : vector<1x128xi1> to vector<1x128xi1>
    %185 = vector.broadcast %184 : vector<1x128xi1> to vector<4x128xi1>
    %186 = arith.select %185, %183, %173 : vector<4x128xi1>, vector<4x128xbf16>
    %187 = vector.extract_strided_slice %10 {offsets = [0, 130], sizes = [4, 128], strides = [1, 1]} : vector<4x384xbf16> to vector<4x128xbf16>
    %c2_i32_63 = arith.constant 2 : i32
    %188 = vector.broadcast %c2_i32_63 : i32 to vector<1x128xi32>
    %189 = arith.addi %29, %188 : vector<1x128xi32>
    %c0_i32_64 = arith.constant 0 : i32
    %190 = vector.broadcast %c0_i32_64 : i32 to vector<1x128xi32>
    %191 = arith.cmpi slt, %189, %190 : vector<1x128xi32>
    %c2_i32_65 = arith.constant 2 : i32
    %192 = vector.broadcast %c2_i32_65 : i32 to vector<1x128xi32>
    %193 = arith.addi %29, %192 : vector<1x128xi32>
    %c16_i32_66 = arith.constant 16 : i32
    %194 = vector.broadcast %c16_i32_66 : i32 to vector<1x128xi32>
    %195 = arith.cmpi sge, %193, %194 : vector<1x128xi32>
    %196 = arith.ori %191, %195 : vector<1x128xi1>
    %cst_67 = arith.constant 0.000000e+00 : bf16
    %197 = vector.broadcast %cst_67 : bf16 to vector<4x128xbf16>
    %198 = vector.shape_cast %196 : vector<1x128xi1> to vector<1x128xi1>
    %199 = vector.broadcast %198 : vector<1x128xi1> to vector<4x128xi1>
    %200 = arith.select %199, %197, %187 : vector<4x128xi1>, vector<4x128xbf16>
    %201 = vector.extract_strided_slice %10 {offsets = [0, 142], sizes = [4, 128], strides = [1, 1]} : vector<4x384xbf16> to vector<4x128xbf16>
    %c-2_i32_68 = arith.constant -2 : i32
    %202 = vector.broadcast %c-2_i32_68 : i32 to vector<1x128xi32>
    %203 = arith.addi %29, %202 : vector<1x128xi32>
    %c0_i32_69 = arith.constant 0 : i32
    %204 = vector.broadcast %c0_i32_69 : i32 to vector<1x128xi32>
    %205 = arith.cmpi slt, %203, %204 : vector<1x128xi32>
    %c-2_i32_70 = arith.constant -2 : i32
    %206 = vector.broadcast %c-2_i32_70 : i32 to vector<1x128xi32>
    %207 = arith.addi %29, %206 : vector<1x128xi32>
    %c16_i32_71 = arith.constant 16 : i32
    %208 = vector.broadcast %c16_i32_71 : i32 to vector<1x128xi32>
    %209 = arith.cmpi sge, %207, %208 : vector<1x128xi32>
    %210 = arith.ori %205, %209 : vector<1x128xi1>
    %cst_72 = arith.constant 0.000000e+00 : bf16
    %211 = vector.broadcast %cst_72 : bf16 to vector<4x128xbf16>
    %212 = vector.shape_cast %210 : vector<1x128xi1> to vector<1x128xi1>
    %213 = vector.broadcast %212 : vector<1x128xi1> to vector<4x128xi1>
    %214 = arith.select %213, %211, %201 : vector<4x128xi1>, vector<4x128xbf16>
    %215 = vector.extract_strided_slice %10 {offsets = [0, 143], sizes = [4, 128], strides = [1, 1]} : vector<4x384xbf16> to vector<4x128xbf16>
    %c-1_i32_73 = arith.constant -1 : i32
    %216 = vector.broadcast %c-1_i32_73 : i32 to vector<1x128xi32>
    %217 = arith.addi %29, %216 : vector<1x128xi32>
    %c0_i32_74 = arith.constant 0 : i32
    %218 = vector.broadcast %c0_i32_74 : i32 to vector<1x128xi32>
    %219 = arith.cmpi slt, %217, %218 : vector<1x128xi32>
    %c-1_i32_75 = arith.constant -1 : i32
    %220 = vector.broadcast %c-1_i32_75 : i32 to vector<1x128xi32>
    %221 = arith.addi %29, %220 : vector<1x128xi32>
    %c16_i32_76 = arith.constant 16 : i32
    %222 = vector.broadcast %c16_i32_76 : i32 to vector<1x128xi32>
    %223 = arith.cmpi sge, %221, %222 : vector<1x128xi32>
    %224 = arith.ori %219, %223 : vector<1x128xi1>
    %cst_77 = arith.constant 0.000000e+00 : bf16
    %225 = vector.broadcast %cst_77 : bf16 to vector<4x128xbf16>
    %226 = vector.shape_cast %224 : vector<1x128xi1> to vector<1x128xi1>
    %227 = vector.broadcast %226 : vector<1x128xi1> to vector<4x128xi1>
    %228 = arith.select %227, %225, %215 : vector<4x128xi1>, vector<4x128xbf16>
    %229 = vector.extract_strided_slice %10 {offsets = [0, 144], sizes = [4, 128], strides = [1, 1]} : vector<4x384xbf16> to vector<4x128xbf16>
    %230 = vector.extract_strided_slice %10 {offsets = [0, 145], sizes = [4, 128], strides = [1, 1]} : vector<4x384xbf16> to vector<4x128xbf16>
    %c1_i32_78 = arith.constant 1 : i32
    %231 = vector.broadcast %c1_i32_78 : i32 to vector<1x128xi32>
    %232 = arith.addi %29, %231 : vector<1x128xi32>
    %c0_i32_79 = arith.constant 0 : i32
    %233 = vector.broadcast %c0_i32_79 : i32 to vector<1x128xi32>
    %234 = arith.cmpi slt, %232, %233 : vector<1x128xi32>
    %c1_i32_80 = arith.constant 1 : i32
    %235 = vector.broadcast %c1_i32_80 : i32 to vector<1x128xi32>
    %236 = arith.addi %29, %235 : vector<1x128xi32>
    %c16_i32_81 = arith.constant 16 : i32
    %237 = vector.broadcast %c16_i32_81 : i32 to vector<1x128xi32>
    %238 = arith.cmpi sge, %236, %237 : vector<1x128xi32>
    %239 = arith.ori %234, %238 : vector<1x128xi1>
    %cst_82 = arith.constant 0.000000e+00 : bf16
    %240 = vector.broadcast %cst_82 : bf16 to vector<4x128xbf16>
    %241 = vector.shape_cast %239 : vector<1x128xi1> to vector<1x128xi1>
    %242 = vector.broadcast %241 : vector<1x128xi1> to vector<4x128xi1>
    %243 = arith.select %242, %240, %230 : vector<4x128xi1>, vector<4x128xbf16>
    %244 = vector.extract_strided_slice %10 {offsets = [0, 146], sizes = [4, 128], strides = [1, 1]} : vector<4x384xbf16> to vector<4x128xbf16>
    %c2_i32_83 = arith.constant 2 : i32
    %245 = vector.broadcast %c2_i32_83 : i32 to vector<1x128xi32>
    %246 = arith.addi %29, %245 : vector<1x128xi32>
    %c0_i32_84 = arith.constant 0 : i32
    %247 = vector.broadcast %c0_i32_84 : i32 to vector<1x128xi32>
    %248 = arith.cmpi slt, %246, %247 : vector<1x128xi32>
    %c2_i32_85 = arith.constant 2 : i32
    %249 = vector.broadcast %c2_i32_85 : i32 to vector<1x128xi32>
    %250 = arith.addi %29, %249 : vector<1x128xi32>
    %c16_i32_86 = arith.constant 16 : i32
    %251 = vector.broadcast %c16_i32_86 : i32 to vector<1x128xi32>
    %252 = arith.cmpi sge, %250, %251 : vector<1x128xi32>
    %253 = arith.ori %248, %252 : vector<1x128xi1>
    %cst_87 = arith.constant 0.000000e+00 : bf16
    %254 = vector.broadcast %cst_87 : bf16 to vector<4x128xbf16>
    %255 = vector.shape_cast %253 : vector<1x128xi1> to vector<1x128xi1>
    %256 = vector.broadcast %255 : vector<1x128xi1> to vector<4x128xi1>
    %257 = arith.select %256, %254, %244 : vector<4x128xi1>, vector<4x128xbf16>
    %258 = vector.extract_strided_slice %10 {offsets = [0, 158], sizes = [4, 128], strides = [1, 1]} : vector<4x384xbf16> to vector<4x128xbf16>
    %c-2_i32_88 = arith.constant -2 : i32
    %259 = vector.broadcast %c-2_i32_88 : i32 to vector<1x128xi32>
    %260 = arith.addi %29, %259 : vector<1x128xi32>
    %c0_i32_89 = arith.constant 0 : i32
    %261 = vector.broadcast %c0_i32_89 : i32 to vector<1x128xi32>
    %262 = arith.cmpi slt, %260, %261 : vector<1x128xi32>
    %c-2_i32_90 = arith.constant -2 : i32
    %263 = vector.broadcast %c-2_i32_90 : i32 to vector<1x128xi32>
    %264 = arith.addi %29, %263 : vector<1x128xi32>
    %c16_i32_91 = arith.constant 16 : i32
    %265 = vector.broadcast %c16_i32_91 : i32 to vector<1x128xi32>
    %266 = arith.cmpi sge, %264, %265 : vector<1x128xi32>
    %267 = arith.ori %262, %266 : vector<1x128xi1>
    %cst_92 = arith.constant 0.000000e+00 : bf16
    %268 = vector.broadcast %cst_92 : bf16 to vector<4x128xbf16>
    %269 = vector.shape_cast %267 : vector<1x128xi1> to vector<1x128xi1>
    %270 = vector.broadcast %269 : vector<1x128xi1> to vector<4x128xi1>
    %271 = arith.select %270, %268, %258 : vector<4x128xi1>, vector<4x128xbf16>
    %272 = vector.extract_strided_slice %10 {offsets = [0, 159], sizes = [4, 128], strides = [1, 1]} : vector<4x384xbf16> to vector<4x128xbf16>
    %c-1_i32_93 = arith.constant -1 : i32
    %273 = vector.broadcast %c-1_i32_93 : i32 to vector<1x128xi32>
    %274 = arith.addi %29, %273 : vector<1x128xi32>
    %c0_i32_94 = arith.constant 0 : i32
    %275 = vector.broadcast %c0_i32_94 : i32 to vector<1x128xi32>
    %276 = arith.cmpi slt, %274, %275 : vector<1x128xi32>
    %c-1_i32_95 = arith.constant -1 : i32
    %277 = vector.broadcast %c-1_i32_95 : i32 to vector<1x128xi32>
    %278 = arith.addi %29, %277 : vector<1x128xi32>
    %c16_i32_96 = arith.constant 16 : i32
    %279 = vector.broadcast %c16_i32_96 : i32 to vector<1x128xi32>
    %280 = arith.cmpi sge, %278, %279 : vector<1x128xi32>
    %281 = arith.ori %276, %280 : vector<1x128xi1>
    %cst_97 = arith.constant 0.000000e+00 : bf16
    %282 = vector.broadcast %cst_97 : bf16 to vector<4x128xbf16>
    %283 = vector.shape_cast %281 : vector<1x128xi1> to vector<1x128xi1>
    %284 = vector.broadcast %283 : vector<1x128xi1> to vector<4x128xi1>
    %285 = arith.select %284, %282, %272 : vector<4x128xi1>, vector<4x128xbf16>
    %286 = vector.extract_strided_slice %10 {offsets = [0, 160], sizes = [4, 128], strides = [1, 1]} : vector<4x384xbf16> to vector<4x128xbf16>
    %287 = vector.extract_strided_slice %10 {offsets = [0, 161], sizes = [4, 128], strides = [1, 1]} : vector<4x384xbf16> to vector<4x128xbf16>
    %c1_i32_98 = arith.constant 1 : i32
    %288 = vector.broadcast %c1_i32_98 : i32 to vector<1x128xi32>
    %289 = arith.addi %29, %288 : vector<1x128xi32>
    %c0_i32_99 = arith.constant 0 : i32
    %290 = vector.broadcast %c0_i32_99 : i32 to vector<1x128xi32>
    %291 = arith.cmpi slt, %289, %290 : vector<1x128xi32>
    %c1_i32_100 = arith.constant 1 : i32
    %292 = vector.broadcast %c1_i32_100 : i32 to vector<1x128xi32>
    %293 = arith.addi %29, %292 : vector<1x128xi32>
    %c16_i32_101 = arith.constant 16 : i32
    %294 = vector.broadcast %c16_i32_101 : i32 to vector<1x128xi32>
    %295 = arith.cmpi sge, %293, %294 : vector<1x128xi32>
    %296 = arith.ori %291, %295 : vector<1x128xi1>
    %cst_102 = arith.constant 0.000000e+00 : bf16
    %297 = vector.broadcast %cst_102 : bf16 to vector<4x128xbf16>
    %298 = vector.shape_cast %296 : vector<1x128xi1> to vector<1x128xi1>
    %299 = vector.broadcast %298 : vector<1x128xi1> to vector<4x128xi1>
    %300 = arith.select %299, %297, %287 : vector<4x128xi1>, vector<4x128xbf16>
    %301 = vector.extract_strided_slice %10 {offsets = [0, 162], sizes = [4, 128], strides = [1, 1]} : vector<4x384xbf16> to vector<4x128xbf16>
    %c2_i32_103 = arith.constant 2 : i32
    %302 = vector.broadcast %c2_i32_103 : i32 to vector<1x128xi32>
    %303 = arith.addi %29, %302 : vector<1x128xi32>
    %c0_i32_104 = arith.constant 0 : i32
    %304 = vector.broadcast %c0_i32_104 : i32 to vector<1x128xi32>
    %305 = arith.cmpi slt, %303, %304 : vector<1x128xi32>
    %c2_i32_105 = arith.constant 2 : i32
    %306 = vector.broadcast %c2_i32_105 : i32 to vector<1x128xi32>
    %307 = arith.addi %29, %306 : vector<1x128xi32>
    %c16_i32_106 = arith.constant 16 : i32
    %308 = vector.broadcast %c16_i32_106 : i32 to vector<1x128xi32>
    %309 = arith.cmpi sge, %307, %308 : vector<1x128xi32>
    %310 = arith.ori %305, %309 : vector<1x128xi1>
    %cst_107 = arith.constant 0.000000e+00 : bf16
    %311 = vector.broadcast %cst_107 : bf16 to vector<4x128xbf16>
    %312 = vector.shape_cast %310 : vector<1x128xi1> to vector<1x128xi1>
    %313 = vector.broadcast %312 : vector<1x128xi1> to vector<4x128xi1>
    %314 = arith.select %313, %311, %301 : vector<4x128xi1>, vector<4x128xbf16>
    %315 = tpu.concatenate %43, %57, %58, %72, %86, %100, %114, %115, %129, %143, %157, %171, %172, %186, %200, %214 in 0 : vector<4x128xbf16>, vector<4x128xbf16>, vector<4x128xbf16>, vector<4x128xbf16>, vector<4x128xbf16>, vector<4x128xbf16>, vector<4x128xbf16>, vector<4x128xbf16>, vector<4x128xbf16>, vector<4x128xbf16>, vector<4x128xbf16>, vector<4x128xbf16>, vector<4x128xbf16>, vector<4x128xbf16>, vector<4x128xbf16>, vector<4x128xbf16> -> vector<64x128xbf16>
    %316 = tpu.concatenate %228, %229, %243, %257, %271, %285, %286, %300, %314 in 0 : vector<4x128xbf16>, vector<4x128xbf16>, vector<4x128xbf16>, vector<4x128xbf16>, vector<4x128xbf16>, vector<4x128xbf16>, vector<4x128xbf16>, vector<4x128xbf16>, vector<4x128xbf16> -> vector<36x128xbf16>
    %317 = tpu.concatenate %315, %316 in 0 : vector<64x128xbf16>, vector<36x128xbf16> -> vector<100x128xbf16>
    %c0_108 = arith.constant 0 : index
    %c0_109 = arith.constant 0 : index
    %318 = vector.load %arg3[%c0_108, %c0_109] : memref<8x100xbf16, #tpu.memory_space<vmem>>, vector<8x100xbf16>
    %cst_110 = arith.constant dense<0.000000e+00> : vector<8x128xf32>
    %319 = tpu.matmul %318, %317, %cst_110 {dimension_numbers = #tpu.dot_dimension_numbers<[1], [0], [0], [1], [0, 0, 1, 1], [], []>} : vector<8x100xbf16>, vector<100x128xbf16>, vector<8x128xf32> -> vector<8x128xf32>
    %c0_111 = arith.constant 0 : index
    %c0_112 = arith.constant 0 : index
    %320 = vector.load %arg4[%c0_111, %c0_112] : memref<8x1xf32, #tpu.memory_space<vmem>>, vector<8x1xf32>
    %321 = vector.broadcast %320 : vector<8x1xf32> to vector<8x128xf32>
    %322 = arith.mulf %319, %321 : vector<8x128xf32>
    %c0_113 = arith.constant 0 : index
    %c0_114 = arith.constant 0 : index
    %323 = vector.load %arg5[%c0_113, %c0_114] : memref<8x1xf32, #tpu.memory_space<vmem>>, vector<8x1xf32>
    %324 = vector.broadcast %323 : vector<8x1xf32> to vector<8x128xf32>
    %325 = arith.addf %322, %324 : vector<8x128xf32>
    %326 = math.absf %325 : vector<8x128xf32>
    %cst_115 = arith.constant 0.000000e+00 : f32
    %327 = vector.broadcast %cst_115 : f32 to vector<8x128xf32>
    %328 = arith.subf %327, %326 : vector<8x128xf32>
    %329 = math.exp %328 : vector<8x128xf32>
    %cst_116 = arith.constant 0.000000e+00 : f32
    %330 = vector.broadcast %cst_116 : f32 to vector<8x128xf32>
    %331 = arith.cmpf oge, %325, %330 : vector<8x128xf32>
    %cst_117 = arith.constant 2.000000e+00 : f32
    %332 = vector.broadcast %cst_117 : f32 to vector<8x128xf32>
    %333 = arith.mulf %332, %329 : vector<8x128xf32>
    %cst_118 = arith.constant 1.000000e+00 : f32
    %334 = vector.broadcast %cst_118 : f32 to vector<8x128xf32>
    %335 = arith.addf %334, %333 : vector<8x128xf32>
    %cst_119 = arith.constant 2.000000e+00 : f32
    %336 = vector.broadcast %cst_119 : f32 to vector<8x128xf32>
    %337 = arith.addf %336, %329 : vector<8x128xf32>
    %338 = arith.mulf %329, %337 : vector<8x128xf32>
    %339 = arith.select %331, %335, %338 : vector<8x128xi1>, vector<8x128xf32>
    %cst_120 = arith.constant 2.000000e+00 : f32
    %340 = vector.broadcast %cst_120 : f32 to vector<8x128xf32>
    %341 = arith.mulf %340, %329 : vector<8x128xf32>
    %cst_121 = arith.constant 1.000000e+00 : f32
    %342 = vector.broadcast %cst_121 : f32 to vector<8x128xf32>
    %343 = arith.addf %342, %341 : vector<8x128xf32>
    %cst_122 = arith.constant 2.000000e+00 : f32
    %344 = vector.broadcast %cst_122 : f32 to vector<8x128xf32>
    %345 = arith.mulf %344, %329 : vector<8x128xf32>
    %346 = arith.mulf %345, %329 : vector<8x128xf32>
    %347 = arith.addf %343, %346 : vector<8x128xf32>
    %cst_123 = arith.constant 2.000000e+00 : f32
    %348 = vector.broadcast %cst_123 : f32 to vector<8x128xf32>
    %349 = arith.mulf %348, %329 : vector<8x128xf32>
    %cst_124 = arith.constant 2.000000e+00 : f32
    %350 = vector.broadcast %cst_124 : f32 to vector<8x128xf32>
    %351 = arith.addf %350, %349 : vector<8x128xf32>
    %352 = arith.mulf %329, %329 : vector<8x128xf32>
    %353 = arith.addf %351, %352 : vector<8x128xf32>
    %354 = arith.select %331, %347, %353 : vector<8x128xi1>, vector<8x128xf32>
    %355 = arith.mulf %325, %339 : vector<8x128xf32>
    %356 = tpu.reciprocal %354 {approx = true} : vector<8x128xf32> -> vector<8x128xf32>
    %357 = arith.mulf %355, %356 : vector<8x128xf32>
    %c0_125 = arith.constant 0 : index
    %c0_126 = arith.constant 0 : index
    %c0_127 = arith.constant 0 : index
    %358 = vector.load %arg6[%c0_125, %c0_126, %c0_127] : memref<1x8x128xbf16, #tpu.memory_space<vmem>>, vector<1x8x128xbf16>
    %359 = vector.shape_cast %358 : vector<1x8x128xbf16> to vector<8x128xbf16>
    %c0_128 = arith.constant 0 : index
    %c0_129 = arith.constant 0 : index
    %c0_130 = arith.constant 0 : index
    %360 = vector.load %arg9[%c0_128, %c0_129, %c0_130] : memref<1x32x128xbf16, #tpu.memory_space<vmem>>, vector<1x8x128xbf16>
    %361 = vector.shape_cast %360 : vector<1x8x128xbf16> to vector<8x128xbf16>
    %362 = vector.shape_cast %359 : vector<8x128xbf16> to vector<1x8x128xbf16>
    tpu.vector_store %arg9[%c0_128, %c0_129, %c0_130], %362 {strides = array<i32>} : memref<1x32x128xbf16, #tpu.memory_space<vmem>>, vector<1x8x128xbf16>,
    %c0_131 = arith.constant 0 : index
    %c0_132 = arith.constant 0 : index
    %c0_133 = arith.constant 0 : index
    %363 = vector.load %arg7[%c0_131, %c0_132, %c0_133] : memref<1x8x128xbf16, #tpu.memory_space<vmem>>, vector<1x8x128xbf16>
    %364 = vector.shape_cast %363 : vector<1x8x128xbf16> to vector<8x128xbf16>
    %c0_134 = arith.constant 0 : index
    %c8 = arith.constant 8 : index
    %c0_135 = arith.constant 0 : index
    %365 = vector.load %arg9[%c0_134, %c8, %c0_135] : memref<1x32x128xbf16, #tpu.memory_space<vmem>>, vector<1x8x128xbf16>
    %366 = vector.shape_cast %365 : vector<1x8x128xbf16> to vector<8x128xbf16>
    %367 = vector.shape_cast %364 : vector<8x128xbf16> to vector<1x8x128xbf16>
    tpu.vector_store %arg9[%c0_134, %c8, %c0_135], %367 {strides = array<i32>} : memref<1x32x128xbf16, #tpu.memory_space<vmem>>, vector<1x8x128xbf16>,
    %368 = arith.truncf %357 : vector<8x128xf32> to vector<8x128xbf16>
    %c0_136 = arith.constant 0 : index
    %c16 = arith.constant 16 : index
    %c0_137 = arith.constant 0 : index
    %369 = vector.load %arg9[%c0_136, %c16, %c0_137] : memref<1x32x128xbf16, #tpu.memory_space<vmem>>, vector<1x8x128xbf16>
    %370 = vector.shape_cast %369 : vector<1x8x128xbf16> to vector<8x128xbf16>
    %371 = vector.shape_cast %368 : vector<8x128xbf16> to vector<1x8x128xbf16>
    tpu.vector_store %arg9[%c0_136, %c16, %c0_137], %371 {strides = array<i32>} : memref<1x32x128xbf16, #tpu.memory_space<vmem>>, vector<1x8x128xbf16>,
    %c0_138 = arith.constant 0 : index
    %c0_139 = arith.constant 0 : index
    %c0_140 = arith.constant 0 : index
    %372 = vector.load %arg8[%c0_138, %c0_139, %c0_140] : memref<1x8x128xbf16, #tpu.memory_space<vmem>>, vector<1x8x128xbf16>
    %373 = vector.shape_cast %372 : vector<1x8x128xbf16> to vector<8x128xbf16>
    %c0_141 = arith.constant 0 : index
    %c24 = arith.constant 24 : index
    %c0_142 = arith.constant 0 : index
    %374 = vector.load %arg9[%c0_141, %c24, %c0_142] : memref<1x32x128xbf16, #tpu.memory_space<vmem>>, vector<1x8x128xbf16>
    %375 = vector.shape_cast %374 : vector<1x8x128xbf16> to vector<8x128xbf16>
    %376 = vector.shape_cast %373 : vector<8x128xbf16> to vector<1x8x128xbf16>
    tpu.vector_store %arg9[%c0_141, %c24, %c0_142], %376 {strides = array<i32>} : memref<1x32x128xbf16, #tpu.memory_space<vmem>>, vector<1x8x128xbf16>,
    return
  }
  func.func @transform_0(%arg0: i32, %arg1: i32) -> (i32, i32, i32) {
    %c0_i32 = arith.constant 0 : i32
    %c0_i32_0 = arith.constant 0 : i32
    %c0_i32_1 = arith.constant 0 : i32
    return %arg0, %c0_i32, %c0_i32_0 : i32, i32, i32
  }
  func.func @transform_1(%arg0: i32, %arg1: i32) -> (i32, i32) {
    %c0_i32 = arith.constant 0 : i32
    %c0_i32_0 = arith.constant 0 : i32
    %c0_i32_1 = arith.constant 0 : i32
    return %c0_i32, %c0_i32_0 : i32, i32
  }
  func.func @transform_2(%arg0: i32, %arg1: i32) -> (i32, i32) {
    %c0_i32 = arith.constant 0 : i32
    %c0_i32_0 = arith.constant 0 : i32
    %c0_i32_1 = arith.constant 0 : i32
    return %c0_i32, %c0_i32_0 : i32, i32
  }
  func.func @transform_3(%arg0: i32, %arg1: i32) -> (i32, i32) {
    %c0_i32 = arith.constant 0 : i32
    %c0_i32_0 = arith.constant 0 : i32
    %c0_i32_1 = arith.constant 0 : i32
    return %c0_i32, %c0_i32_0 : i32, i32
  }
  func.func @transform_4(%arg0: i32, %arg1: i32) -> (i32, i32, i32) {
    %c0_i32 = arith.constant 0 : i32
    %c0_i32_0 = arith.constant 0 : i32
    return %arg0, %c0_i32, %arg1 : i32, i32, i32
  }
  func.func @transform_5(%arg0: i32, %arg1: i32) -> (i32, i32, i32) {
    %c0_i32 = arith.constant 0 : i32
    %c0_i32_0 = arith.constant 0 : i32
    return %arg0, %c0_i32, %arg1 : i32, i32, i32
  }
  func.func @transform_6(%arg0: i32, %arg1: i32) -> (i32, i32, i32) {
    %c0_i32 = arith.constant 0 : i32
    %c0_i32_0 = arith.constant 0 : i32
    return %arg0, %c0_i32, %arg1 : i32, i32, i32
  }
  func.func @transform_7(%arg0: i32, %arg1: i32) -> (i32, i32, i32) {
    %c0_i32 = arith.constant 0 : i32
    %c0_i32_0 = arith.constant 0 : i32
    return %arg0, %c0_i32, %arg1 : i32, i32, i32
  }
}

</mosaic_0001>

<bundles_post_ra>
// kernel: inception_block.3
= control target key start
LH: loop header
LB: loop body
LE: loop exit
PB: predicated region body
PF: predicated region fallthrough
CT: control target
= control target key end

     0   :  { %s1145_s24 = smov 0   ;;  %s1147_s25 = smov 0   ;;  %s1336_s0 = inlined_call_operand.vmem [shape: bf16[2,4,512], index: 0, kind: input, shape index: {}]   ;;  %s1337_s1 = inlined_call_operand.vmem [shape: bf16[32,8], index: 1, kind: input, shape index: {}]   ;;  %s1338_s2 = inlined_call_operand.vmem [shape: f32[32,1], index: 2, kind: input, shape index: {}]   ;;  %s1339_s3 = inlined_call_operand.vmem [shape: f32[32,1], index: 3, kind: input, shape index: {}]   ;;  %s1340_s4 = inlined_call_operand.vmem [shape: bf16[2,8,256], index: 4, kind: output, shape index: {0}]   ;;  %s1341_s5 = inlined_call_operand.vmem [shape: bf16[2,4,256], index: 5, kind: output, shape index: {1}]   ;;  %s1342_s6 = inlined_call_operand.vmem [shape: bf16[2,4,256], index: 6, kind: output, shape index: {2}]   ;;  %s1343_s7 = inlined_call_operand.vmem [shape: bf16[2,8,256], index: 7, kind: output, shape index: {3}]  }
   0x1   :  { %s1149_s26 = smov 0   ;;  %s1151_s27 = smov 0  }
   0x2   :  { %s1153_s28 = smov 0  }
   0x3 LB: > { %s27_s29 = sadd.s32 1, %s1085_s26  ;;  %s30_s30 = sadd.s32 1, %s1089_s27  ;;  %s1093_s28 = sphi %s1153_s28, %s18_s28   ;;  %s1089_s27 = sphi %s1151_s27, %s1351_s27   ;;  %s1085_s26 = sphi %s1149_s26, %s1350_s26   ;;  %s1081_s25 = sphi %s1147_s25, %s1349_s25   ;;  %s1077_s24 = sphi %s1145_s24, %s1348_s24  }
   0x4   : > { %p28_p0 = scmp.ge.s32.totalorder %s27_s29, 2  ;;  %p954_p1 = scmp.ge.s32.totalorder %s1093_s28, 1 }
   0x5   : > { %p264_p2 = scmp.lt.s32.totalorder %s1093_s28, 5 }
   0x6   : > { %s1353_s29 = smov (%p28_p0, %s27_s29), 0  ;;  %s1355_s30 = smov (!%p28_p0, %s30_s30), %s1089_s27 }
   0x7   : > { %p265_p3 = pnand %p954_p1, %p264_p2  ;;  %p32_p4 = scmp.ge.s32.totalorder %s1355_s30, 2 }
   0x8   : > { %s965_s8 = sshll.u32 (!%p265_p3), %s1077_s24, 7  ;;  %p323_p5 = scmp.lt.s32.totalorder (!%p265_p3), %s1081_s25, 1 }
   0x9   : > { %s1357_s30 = smov (%p32_p4, %s1355_s30), 0  ;;  %268 = sbr.rel (%p265_p3) target bundleno = 555 (0x22b), region = 36 }
   0xa   : > { %s365_s10 = sshra.s32 (!%p265_p3), %s965_s8, 7  ;;  %s1096_s15 = smov (!%p265_p3), 111  }
   0xb   : > { %s966_s14 = sshll.u32 (!%p265_p3), %s365_s10, 1  ;;  %s1097_s16 = smov (!%p265_p3), 127  }
   0xc   : > { %s1098_s18 = smov (!%p265_p3), 113   ;;  %s1099_s19 = smov (!%p265_p3), 16  }
   0xd   : > { %s1100_s20 = smov (!%p265_p3), 17   ;;  %s1101_s21 = smov (!%p265_p3), 1  }
   0xe   : > { %v370_v0 = vlaneseq  ;;  %v372_v1 = vstv %s965_s8  ;;  %v1095_v2 = vmov 0   ;;  %s1359_s25 = smov (!%p323_p5, %s1081_s25), 1  ;;  %vm399_vm12 = vcmask 908288   ;;  %s1102_s22 = smov 15   ;;  %v1037_v35 = vld [vmem:[%s1337_s1] sm:$0xff]   ;;  %v588_v37 = vld [vmem:[%s1338_s2 + $0x8] sm:$0xff] }
   0xf   : > { %1035 = vset.pattern.permute.xlu1 %v1095_v2  ;;  %1036 = vset.pattern.permute.xlu0 %v1095_v2  ;;  %s974_s9 = sshll.u32 %s1359_s25, 3  ;;  %vm449_vm13 = vcmask 1039360   ;;  %s1103_s23 = smov 112   ;;  %v587_v36 = vld [vmem:[%s1338_s2] sm:$0xff]  ;;  %v589_v38 = vld [vmem:[%s1338_s2 + $0x10] sm:$0xff]  ;;  %v590_v40 = vld [vmem:[%s1338_s2 + $0x18] sm:$0xff] }
  0x10   : > { %v371_v3 = vand.u32 127, %v370_v0  ;;  %s327_s13 = scalar_lea.vmem %s1336_s0, %s974_s9  ;;  %v615_v39 = vld [vmem:[%s1339_s3] sm:$0xff]  ;;  %v617_v41 = vld [vmem:[%s1339_s3 + $0x10] sm:$0xff]  ;;  %v616_v42 = vld [vmem:[%s1339_s3 + $0x8] sm:$0xff]  ;;  %v1104_v51 = vmov 1983009808  }
  0x11   : > { %s368_s17 = scalar_lea.vmem %s327_s13, %s966_s14  ;;  %v618_v43 = vld [vmem:[%s1339_s3 + $0x18] sm:$0xff]  ;;  %v494_v52 = vunpack.c.l.s4 %v1104_v51  ;;  %p330_p6 = scmp.lt.s32.totalorder %s1077_s24, 1 }
  0x12   : > { %v373_v4 = vadd.s32 %v372_v1, %v371_v3  ;;  %v1207_v22 = vld [vmem:[%s368_s17] sm:$0x3f]  ;;  %s957_s12 = sshll.u32 %s1359_s25, 1 }
  0x13   : > { %v404_v45 = vrot.slane %v1207_v22, 2  ;;  %v495_v63 = vunpack.c.0.s8 %v494_v52  ;;  %s1361_s24 = smov (!%p330_p6, %s1077_s24), 1 }
  0x14   : > { %v375_v5 = vsub.s32 0, %v373_v4  ;;  %vm374_vm0 = vcmp.lt.s32.totalorder %v373_v4, 0  ;;  %s1291_s13 = sadd.s32 %s957_s12, %s1361_s24 }
  0x15   : > { %s960_s25 = sshll.u32 %s1291_s13, 1 }
  0x16   : > { %v967_v6 = vmin.u32 %v375_v5, %v373_v4  ;;  %s343_s9 = scalar_lea.vmem %s1341_s5, %s960_s25 }
  0x18   : > { %v378_v7 = vand.u32 15, %v967_v6  ;;  %v497_v6 = vshrl.u32 %v370_v0, 7 }
  0x1a   : > { %v379_v8 = vsub.s32 0, %v378_v7 }
  0x1c   : > { %v380_v9 = vsel %vm374_vm0, %v379_v8, %v378_v7  ;;  %vm434_vm0 = vcmask 924672  }
  0x1d   : > { %vm381_vm1 = vcmp.ne.s32.totalorder %v380_v9, 0  ;;  %vm382_vm2 = vcmp.lt.s32.totalorder %v380_v9, 0  ;;  %v384_v10 = vadd.s32 16, %v380_v9 }
  0x1e   : > { %vm383_vm3 = vmand %vm382_vm2, %vm381_vm1  ;;  %vm528_vm2 = vcmask 64512  }
  0x1f   : > { %v385_v11 = vsel %vm383_vm3, %v384_v10, %v380_v9  ;;  %980 = vmatprep.mubr.msk.bf16.mxu0 %vm528_vm2, %v1037_v35  ;;  %vm410_vm3 = vcmask 138240  }
  0x20   : > { %v386_v12 = vadd.s32 4294967295, %v385_v11  ;;  %v421_v13 = vadd.s32 1, %v385_v11 }
  0x22   : > { %vm387_vm4 = vcmp.lt.s32.totalorder %v386_v12, 0  ;;  %vm388_vm5 = vcmp.ge.s32.totalorder %v386_v12, 16  ;;  %vm422_vm6 = vcmp.lt.s32.totalorder %v421_v13, 0  ;;  %vm423_vm7 = vcmp.ge.s32.totalorder %v421_v13, 16 }
  0x23   : > { %vm389_vm8 = vmor %vm387_vm4, %vm388_vm5  ;;  %vm417_vm4 = vcmask 130048   ;;  %vm457_vm5 = vcmask 7168  }
  0x24   : > { %v392_v14 = vsel %vm389_vm8, 1, %v1095_v2  ;;  %vm424_vm9 = vmor %vm422_vm6, %vm423_vm7  ;;  %vm442_vm6 = vcmask 121856   ;;  %vm481_vm7 = vcmask 916480   ;;  %vm510_vm8 = vcmask 1041408  }
  0x25   : > { %v393_v15 = vpack.c.b16 %v392_v14, %v392_v14  ;;  %v427_v16 = vsel %vm424_vm9, 1, %v1095_v2  ;;  %vm535_vm9 = vcmask 1043456  }
  0x26   : > { %v428_v17 = vpack.c.b16 %v427_v16, %v427_v16  ;;  %v498_v16 = vsub.s32 %v495_v63, %v497_v6 }
  0x27   : > { %vm1190_vm10 = vcmp.ne.s16.totalorder %v393_v15, 0 }
  0x28   : > { %v395_v19 = vsel %vm1190_vm10, 65537, %v1095_v2  ;;  %vm1199_vm11 = vcmp.ne.s16.totalorder %v428_v17, 0 }
  0x29   : > { %396 = vrot.lane.b32.xlu0 %v395_v19, %s1096_s15  ;;  %446 = vrot.lane.b32.xlu1 %v395_v19, %s1097_s16  ;;  %v430_v21 = vsel %vm1199_vm11, 65537, %v1095_v2 }
  0x2d   : > { %431 = vrot.lane.b32.xlu0 %v430_v21, %s1098_s18 }
  0x31   : > { %414 = vrot.lane.b32.xlu0 %v1207_v22, %s1099_s19 }
  0x9b   : > { %v397_v23 = vpop.permute.xlu0 %396  ;;  %v447_v24 = vpop.permute.xlu1 %446 }
  0x9c   : > { %v398_v25 = vrot.slane %v397_v23, 6  ;;  %v448_v26 = vrot.slane %v447_v24, 6 }
  0x9e   : > { %v400_v27 = vsel %vm399_vm12, %v398_v25, %v397_v23  ;;  %v450_v28 = vsel %vm449_vm13, %v448_v26, %v447_v24 }
  0x9f   : > { %vm401_vm14 = vcmp.ne.s16.totalorder %v400_v27, 0  ;;  %vm451_vm15 = vcmp.ne.s16.totalorder %v450_v28, 0  ;;  %v432_v29 = vpop.permute.xlu0 %431  ;;  %v499_v27 = vrot.slane %v1207_v22, %v498_v16 }
  0xa0   : > { %v433_v30 = vrot.slane %v432_v29, 6  ;;  %v402_v31 = vsel %vm401_vm14, 4048220490, %v1207_v22  ;;  %v452_v32 = vsel %vm451_vm15, 4048220490, %v1207_v22 }
  0xa1   : > { %407 = vrot.lane.b32.xlu1 %v402_v31, %s1100_s20  ;;  %454 = vrot.lane.b32.xlu0 %v452_v32, %s1101_s21 }
  0xa2   : > { %v435_v33 = vsel %vm434_vm0, %v433_v30, %v432_v29  ;;  %v500_v29 = vcombine.high %v499_v27, %v499_v27 }
  0xa3   : > { %vm436_vm1 = vcmp.ne.s16.totalorder %v435_v33, 0  ;;  %v415_v44 = vpop.permute.xlu0 %414  ;;  %v1038_v33 = vld [vmem:[%s1337_s1 + $0x8] sm:$0xff]  }
  0xa4   : > { %v437_v34 = vsel %vm436_vm1, 4048220490, %v1207_v22  ;;  %v416_v48 = vrot.slane %v415_v44, 2 }
  0xa5   : > { %439 = vrot.lane.b32.xlu1 %v437_v34, %s1102_s22  ;;  %469 = vrot.lane.b32.xlu0 %v1207_v22, %s1098_s18 }
  0xa6   : > { %v418_v57 = vsel %vm417_vm4, %v415_v44, %v416_v48 }
  0xa9   : > { %461 = vrot.lane.b32.xlu1 %v1207_v22, %s1097_s16  ;;  %485 = vrot.lane.b32.xlu0 %v1207_v22, %s1096_s15  ;;  %s351_s15 = scalar_lea.vmem %s1342_s6, %s960_s25  ;;  %s958_s16 = sshll.u32 %s1291_s13, 2 }
  0xaa   : > { %s335_s19 = scalar_lea.vmem %s1340_s4, %s958_s16  ;;  %s359_s22 = scalar_lea.vmem %s1343_s7, %s958_s16 }
  0xad   : > { %477 = vrot.lane.b32.xlu1 %v1207_v22, %s1103_s23  ;;  %598 = vperm.xlu0 %1036, %v588_v37  }
  0xb1   : > { %593 = vperm.xlu1 %1035, %v587_v36   ;;  %621 = vperm.xlu0 %1036, %v615_v39  }
  0xb5   : > { %603 = vperm.xlu1 %1035, %v589_v38   ;;  %631 = vperm.xlu0 %1036, %v617_v41  }
  0xb9   : > { %608 = vperm.xlu1 %1035, %v590_v40  }
  0xbd   : > { %626 = vperm.xlu1 %1035, %v616_v42  }
  0xc1   : > { %636 = vperm.xlu1 %1035, %v618_v43  }
 0x113   : > { %v408_v46 = vpop.permute.xlu1 %407  ;;  %v455_v47 = vpop.permute.xlu0 %454 }
 0x114   : > { %v409_v49 = vrot.slane %v408_v46, 2  ;;  %v456_v54 = vrot.slane %v455_v47, 2 }
 0x116   : > { %v411_v50 = vsel %vm410_vm3, %v408_v46, %v409_v49  ;;  %v458_v1 = vsel %vm457_vm5, %v455_v47, %v456_v54 }
 0x117   : > { %v413_v53 = vmax.bf16 %v411_v50, %v404_v45  ;;  %v440_v55 = vpop.permute.xlu1 %439  ;;  %v470_v56 = vpop.permute.xlu0 %469 }
 0x118   : > { %v441_v58 = vrot.slane %v440_v55, 2  ;;  %v471_v59 = vrot.slane %v470_v56, 2  ;;  %v472_v60 = vrot.slane %v470_v56, 4 }
 0x119   : > { %v420_v61 = vmax.bf16 %v418_v57, %v413_v53 }
 0x11a   : > { %v443_v62 = vsel %vm442_vm6, %v440_v55, %v441_v58  ;;  %v473_v4 = vsel %vm434_vm0, %v471_v59, %v472_v60 }
 0x11b   : > { %v445_v2 = vmax.bf16 %v443_v62, %v420_v61  ;;  %v462_v3 = vpop.permute.xlu1 %461  ;;  %v486_v5 = vpop.permute.xlu0 %485  ;;  %v475_v14 = vsel %vm1190_vm10, 4048220490, %v473_v4 }
 0x11c   : > { %v463_v7 = vrot.slane %v462_v3, 2  ;;  %v464_v8 = vrot.slane %v462_v3, 4  ;;  %v487_v9 = vrot.slane %v486_v5, 2  ;;  %v488_v10 = vrot.slane %v486_v5, 4 }
 0x11d   : > { %v460_v11 = vmax.bf16 %v458_v1, %v445_v2 }
 0x11e   : > { %v465_v12 = vsel %vm449_vm13, %v463_v7, %v464_v8  ;;  %v489_v0 = vsel %vm399_vm12, %v487_v9, %v488_v10 }
 0x11f   : > { %v467_v13 = vsel %vm1199_vm11, 4048220490, %v465_v12  ;;  %v478_v15 = vpop.permute.xlu1 %477  ;;  %v491_v25 = vsel %vm1199_vm11, 4048220490, %v489_v0 }
 0x120   : > { %v468_v17 = vmax.bf16 %v467_v13, %v460_v11  ;;  %v479_v19 = vrot.slane %v478_v15, 2  ;;  %v480_v21 = vrot.slane %v478_v15, 4 }
 0x122   : > { %v476_v23 = vmax.bf16 %v475_v14, %v468_v17  ;;  %v482_v24 = vsel %vm481_vm7, %v479_v19, %v480_v21 }
 0x124   : > { %v484_v26 = vmax.bf16 %v482_v24, %v476_v23 }
 0x126   : > { %v492_v28 = vmax.bf16 %v491_v25, %v484_v26 }
 0x128   : > { %v502_v18 = vcombine.low %v492_v28, %v492_v28  ;;  %v599_v35 = vpop.permute.xlu0 %598 }
 0x12a   : > { %v509_v30 = vrot.slane %v502_v18, %v498_v16 }
 0x12c   : > { %v513_v31 = vsel %vm510_vm8, %v500_v29, %v509_v30  ;;  %v594_v20 = vpop.permute.xlu1 %593  ;;  %v622_v36 = vpop.permute.xlu0 %621 }
 0x12d   : > { %984 = vmatprep.subr.msk.bf16.mxu0 %vm535_vm9, %v513_v31  ;;  %v536_v32 = vsel %vm535_vm9, %v513_v31, 0 }
 0x12e   : > { %979 = vmatpush3.bf16.msra.mxu0 %v536_v32 }
 0x130   : > { %v604_v34 = vpop.permute.xlu1 %603  ;;  %v632_v40 = vpop.permute.xlu0 %631 }
 0x131   : > { %981 = vmatmul.mubr.msk.bf16.vlgmr.msra.gmra.mxu0 %vm528_vm2, %v1038_v33 }
 0x134   : > { %v609_v22 = vpop.permute.xlu1 %608 }
 0x138   : > { %v627_v37 = vpop.permute.xlu1 %626 }
 0x13c   : > { %v637_v48 = vpop.permute.xlu1 %636 }
 0x1f1   : > { %v982_v38 = vpop.f32.mrf.mxu0 }
 0x1f2   : > { %v613_v39 = vmul.f32 %v982_v38, %v604_v34 }
 0x1f3   : > { %v572_v41 = vpop.f32.mrf.mxu0 }
 0x1f4   : > { %v1266_v42 = vadd.f32 %v632_v40, %v613_v39  ;;  %v611_v43 = vmul.f32 %v594_v20, %v572_v41 }
 0x1f5   : > { %v983_v44 = vpop.f32.mrf.mxu0 }
 0x1f6   : > { %v645_v45 = vand.u32 2147483647, %v1266_v42  ;;  %v1269_v46 = vadd.f32 %v622_v36, %v611_v43  ;;  %v614_v47 = vmul.f32 %v983_v44, %v609_v22  ;;  %vm661_vm10 = vcmp.ge.f32.partialorder %v1266_v42, 0.0 }
 0x1f7   : > { %v575_v49 = vpop.f32.mrf.mxu0 }
 0x1f8   : > { %v649_v50 = vsub.f32 0.0, %v645_v45  ;;  %v643_v51 = vand.u32 2147483647, %v1269_v46  ;;  %v1272_v52 = vadd.f32 %v637_v48, %v614_v47  ;;  %v612_v53 = vmul.f32 %v599_v35, %v575_v49 }
 0x1f9   : > { %vm659_vm11 = vcmp.ge.f32.partialorder %v1269_v46, 0.0 }
 0x1fa   : > { %v655_v54 = vmul.f32 1.442695, %v649_v50  ;;  %v647_v55 = vsub.f32 0.0, %v643_v51  ;;  %v646_v56 = vand.u32 2147483647, %v1272_v52  ;;  %v1275_v57 = vadd.f32 %v627_v37, %v612_v53 }
 0x1fb   : > { %vm662_vm12 = vcmp.ge.f32.partialorder %v1272_v52, 0.0 }
 0x1fc   : > { %1039 = vpow2.f32 %v655_v54  ;;  %v651_v58 = vmul.f32 1.442695, %v647_v55  ;;  %v650_v59 = vsub.f32 0.0, %v646_v56  ;;  %v644_v60 = vand.u32 2147483647, %v1275_v57 }
 0x1fd   : > { %vm660_vm13 = vcmp.ge.f32.partialorder %v1275_v57, 0.0 }
 0x1fe   : > { %1041 = vpow2.f32 %v651_v58  ;;  %v657_v61 = vmul.f32 1.442695, %v650_v59  ;;  %v648_v62 = vsub.f32 0.0, %v644_v60 }
 0x200   : > { %1043 = vpow2.f32 %v657_v61  ;;  %v653_v63 = vmul.f32 1.442695, %v648_v62 }
 0x202   : > { %1045 = vpow2.f32 %v653_v63 }
 0x209   : > { %v1040_v1 = vpop.eup %1039 }
 0x20a   : > { %v665_v2 = vmul.f32 2.0, %v1040_v1  ;;  %v697_v7 = vmul.f32 %v1040_v1, %v1040_v1  ;;  %v673_v0 = vadd.f32 2.0, %v1040_v1 }
 0x20b   : > { %v1042_v3 = vpop.eup %1041 }
 0x20c   : > { %v669_v4 = vadd.f32 1.0, %v665_v2  ;;  %v685_v5 = vmul.f32 %v1040_v1, %v665_v2  ;;  %v693_v6 = vadd.f32 2.0, %v665_v2  ;;  %v663_v9 = vmul.f32 2.0, %v1042_v3 }
 0x20d   : > { %v1044_v8 = vpop.eup %1043  ;;  %v695_v19 = vmul.f32 %v1042_v3, %v1042_v3  ;;  %v677_v30 = vmul.f32 %v1040_v1, %v673_v0  ;;  %v671_v33 = vadd.f32 2.0, %v1042_v3 }
 0x20e   : > { %v689_v10 = vadd.f32 %v685_v5, %v669_v4  ;;  %v701_v11 = vadd.f32 %v697_v7, %v693_v6  ;;  %v666_v12 = vmul.f32 2.0, %v1044_v8  ;;  %v667_v13 = vadd.f32 1.0, %v663_v9 }
 0x20f   : > { %v683_v14 = vmul.f32 %v1042_v3, %v663_v9  ;;  %v1046_v15 = vpop.eup %1045  ;;  %v691_v17 = vadd.f32 2.0, %v663_v9  ;;  %v698_v28 = vmul.f32 %v1044_v8, %v1044_v8  ;;  %v674_v38 = vadd.f32 2.0, %v1044_v8 }
 0x210   : > { %v705_v16 = vsel %vm661_vm10, %v689_v10, %v701_v11  ;;  %v670_v21 = vadd.f32 1.0, %v666_v12  ;;  %v686_v24 = vmul.f32 %v1044_v8, %v666_v12  ;;  %v694_v26 = vadd.f32 2.0, %v666_v12 }
 0x211   : > { %1047 = vrcp.f32 %v705_v16  ;;  %v687_v23 = vadd.f32 %v683_v14, %v667_v13  ;;  %v699_v25 = vadd.f32 %v695_v19, %v691_v17  ;;  %v664_v29 = vmul.f32 2.0, %v1046_v15 }
 0x212   : > { %v690_v27 = vadd.f32 %v686_v24, %v670_v21  ;;  %v702_v31 = vadd.f32 %v698_v28, %v694_v26  ;;  %v696_v35 = vmul.f32 %v1046_v15, %v1046_v15  ;;  %v681_v39 = vsel %vm661_vm10, %v669_v4, %v677_v30 }
 0x213   : > { %v703_v18 = vsel %vm659_vm11, %v687_v23, %v699_v25  ;;  %v668_v32 = vadd.f32 1.0, %v664_v29  ;;  %v684_v20 = vmul.f32 %v1046_v15, %v664_v29  ;;  %v692_v34 = vadd.f32 2.0, %v664_v29 }
 0x214   : > { %1049 = vrcp.f32 %v703_v18  ;;  %v706_v22 = vsel %vm662_vm12, %v690_v27, %v702_v31  ;;  %v675_v40 = vmul.f32 %v1042_v3, %v671_v33  ;;  %v672_v43 = vadd.f32 2.0, %v1046_v15 }
 0x215   : > { %1051 = vrcp.f32 %v706_v22  ;;  %v688_v36 = vadd.f32 %v684_v20, %v668_v32  ;;  %v700_v37 = vadd.f32 %v696_v35, %v692_v34  ;;  %v709_v44 = vmul.f32 %v681_v39, %v1266_v42 }
 0x216   : > { %v678_v45 = vmul.f32 %v1044_v8, %v674_v38  ;;  %v679_v48 = vsel %vm659_vm11, %v667_v13, %v675_v40  ;;  %v676_v50 = vmul.f32 %v1046_v15, %v672_v43 }
 0x217   : > { %v704_v41 = vsel %vm660_vm13, %v688_v36, %v700_v37  ;;  %v707_v53 = vmul.f32 %v679_v48, %v1269_v46 }
 0x218   : > { %1053 = vrcp.f32 %v704_v41  ;;  %v682_v54 = vsel %vm662_vm12, %v670_v21, %v678_v45  ;;  %v680_v58 = vsel %vm660_vm13, %v668_v32, %v676_v50 }
 0x219   : > { %v710_v56 = vmul.f32 %v682_v54, %v1272_v52  ;;  %v708_v46 = vmul.f32 %v680_v58, %v1275_v57 }
 0x21e   : > { %v1048_v47 = vpop.eup %1047 }
 0x21f   : > { %v717_v49 = vmul.f32 %v1048_v47, %v709_v44 }
 0x221   : > { %v723_v51 = vpack.c.bf16 %v717_v49, %v717_v49  ;;  %v1050_v55 = vpop.eup %1049 }
 0x222   : > { %v715_v42 = vmul.f32 %v1050_v55, %v707_v53  ;;  %v1052_v59 = vpop.eup %1051 }
 0x223   : > { %724 = vst [vmem:[%s351_s15] sm:$0x3] %v723_v51  ;;  %v718_v61 = vmul.f32 %v1052_v59, %v710_v56 }
 0x224   : > { %v719_v60 = vpack.c.bf16 %v715_v42, %v715_v42 }
 0x225   : > { %v1054_v62 = vpop.eup %1053  ;;  %v725_v63 = vpack.c.bf16 %v718_v61, %v718_v61 }
 0x226   : > { %720 = vst [vmem:[%s335_s19] sm:$0xf] %v719_v60  ;;  %v716_v1 = vmul.f32 %v1054_v62, %v708_v46 }
 0x227   : > { %726 = vst [vmem:[%s359_s22] sm:$0xf] %v725_v63 }
 0x228   : > { %v721_v52 = vpack.c.bf16 %v716_v1, %v716_v1 }
 0x22a   : > { %722 = vst [vmem:[%s343_s9] sm:$0x3] %v721_v52 }
 0x22b PF: > { %s18_s28 = sadd.s32 1, %s1093_s28   ;;  %s1348_s24 = smov %s1085_s26 }
 0x22c   : > { %p15_p7 = scmp.ge.s32.totalorder %s18_s28, 6   ;;  %s1349_s25 = smov %s1089_s27 }
 0x22d   : > { %s1350_s26 = smov %s1353_s29  ;;  %s1351_s27 = smov %s1357_s30 }
 0x22e   :  { %17 = sbr.rel (!%p15_p7) target bundleno = 3 (0x3), region = 103 }

// kernel: inception_block.4
= control target key start
LH: loop header
LB: loop body
LE: loop exit
PB: predicated region body
PF: predicated region fallthrough
CT: control target
= control target key end

     0   :  { %s787_s15 = smov 0   ;;  %s789_s16 = smov 0   ;;  %s928_s0 = inlined_call_operand.vmem [shape: bf16[2,4,256], index: 0, kind: input, shape index: {}]   ;;  %s929_s1 = inlined_call_operand.vmem [shape: bf16[8,36], index: 1, kind: input, shape index: {}]   ;;  %s930_s2 = inlined_call_operand.vmem [shape: f32[8,1], index: 2, kind: input, shape index: {}]   ;;  %s931_s3 = inlined_call_operand.vmem [shape: f32[8,1], index: 3, kind: input, shape index: {}]   ;;  %s932_s4 = inlined_call_operand.vmem [shape: bf16[2,8,256], index: 4, kind: output, shape index: {}]  }
   0x1   :  { %s791_s17 = smov 0   ;;  %s793_s18 = smov 0  }
   0x2   :  { %s795_s19 = smov 0  }
   0x3 LB: > { %s23_s20 = sadd.s32 1, %s741_s17  ;;  %s26_s21 = sadd.s32 1, %s745_s18  ;;  %s749_s19 = sphi %s795_s19, %s14_s19   ;;  %s745_s18 = sphi %s793_s18, %s940_s18   ;;  %s741_s17 = sphi %s791_s17, %s939_s17   ;;  %s737_s16 = sphi %s789_s16, %s938_s16   ;;  %s733_s15 = sphi %s787_s15, %s937_s15  }
   0x4   : > { %p24_p0 = scmp.ge.s32.totalorder %s23_s20, 2  ;;  %p627_p1 = scmp.ge.s32.totalorder %s749_s19, 1 }
   0x5   : > { %p176_p2 = scmp.lt.s32.totalorder %s749_s19, 5 }
   0x6   : > { %s942_s20 = smov (%p24_p0, %s23_s20), 0  ;;  %s944_s21 = smov (!%p24_p0, %s26_s21), %s745_s18 }
   0x7   : > { %p177_p3 = pnand %p627_p1, %p176_p2  ;;  %p28_p4 = scmp.ge.s32.totalorder %s944_s21, 2 }
   0x8   : > { %p205_p5 = scmp.lt.s32.totalorder (!%p177_p3), %s737_s16, 1  ;;  %s632_s22 = sshll.u32 (!%p177_p3), %s733_s15, 7 }
   0x9   : > { %s946_s21 = smov (%p28_p4, %s944_s21), 0  ;;  %180 = sbr.rel (%p177_p3) target bundleno = 649 (0x289), region = 36 }
   0xa   : > { %s226_s27 = sshra.s32 (!%p177_p3), %s632_s22, 7  ;;  %s753_s30 = smov (!%p177_p3), 111  }
   0xb   : > { %s633_s28 = sshll.u32 (!%p177_p3), %s226_s27, 1  ;;  %s754_s5 = smov (!%p177_p3), 127  }
   0xc   : > { %s229_s29 = scalar_lea.vmem (!%p177_p3), [#allocation2], %s633_s28  ;;  %s755_s6 = smov (!%p177_p3), 113  }
   0xd   : > { %s756_s7 = smov (!%p177_p3), 95   ;;  %s757_s8 = smov (!%p177_p3), 126  }
   0xe   : > { %v231_v0 = vlaneseq  ;;  %v751_v1 = vmov 0   ;;  %v233_v2 = vstv %s632_s22  ;;  %s948_s16 = smov (!%p205_p5, %s737_s16), 1  ;;  %v752_v9 = vmov 1983009808   ;;  %s758_s9 = smov 112  }
   0xf   : > { %221 = vst [vmem:[#allocation2] sm:$0x3] %v751_v1  ;;  %224 = vst [vmem:[#allocation2 + $0x6] sm:$0x3] %v751_v1  ;;  %704 = vset.pattern.permute.xlu1 %v751_v1  ;;  %705 = vset.pattern.permute.xlu0 %v751_v1  ;;  %s638_s23 = sshll.u32 %s948_s16, 2  ;;  %v312_v10 = vunpack.c.l.s4 %v752_v9  ;;  %vm284_vm12 = vcmask 1039360  }
  0x10   : > { %v232_v3 = vand.u32 127, %v231_v0  ;;  %s209_s26 = scalar_lea.vmem %s928_s0, %s638_s23  ;;  %v315_v14 = vshrl.u32 %v231_v0, 7  ;;  %vm260_vm13 = vcmask 908288   ;;  %vm277_vm14 = vcmask 924672   ;;  %s760_s10 = smov 17  }
  0x11   : > { %v222_v5 = vld [vmem:[%s209_s26] sm:$0xf]  ;;  %v313_v16 = vunpack.c.0.s8 %v312_v10  ;;  %p212_p6 = scmp.lt.s32.totalorder %s733_s15, 1  ;;  %s630_s24 = sshll.u32 %s948_s16, 1 }
  0x12   : > { %v234_v4 = vadd.s32 %v233_v2, %v232_v3  ;;  %223 = vst [vmem:[#allocation2 + $0x2] sm:$0xf] %v222_v5 }
  0x13   : > { %v833_v20 = vsub.s32 %v313_v16, %v315_v14  ;;  %s950_s15 = smov (!%p212_p6, %s733_s15), 1 }
  0x14   : > { %v236_v6 = vsub.s32 0, %v234_v4  ;;  %vm235_vm0 = vcmp.lt.s32.totalorder %v234_v4, 0  ;;  %s215_s25 = sadd.s32 %s630_s24, %s950_s15 }
  0x15   : > { %s631_s26 = sshll.u32 %s215_s25, 2 }
  0x16   : > { %v634_v7 = vmin.u32 %v236_v6, %v234_v4 }
  0x18   : > { %v239_v8 = vand.u32 15, %v634_v7 }
  0x19   : > { %v826_v12 = vld [vmem:[%s229_s29] sm:$0x3f]  ;;  %s217_s29 = scalar_lea.vmem %s932_s4, %s631_s26 }
  0x1a   : > { %v240_v11 = vsub.s32 0, %v239_v8  ;;  %303 = vrot.lane.b32.xlu1 %v826_v12, %s753_s30  ;;  %289 = vrot.lane.b32.xlu0 %v826_v12, %s754_s5  ;;  %v333_v24 = vrot.slane %v826_v12, %v833_v20  ;;  %v319_v29 = vcombine.low %v826_v12, %v826_v12 }
  0x1c   : > { %v241_v13 = vsel %vm235_vm0, %v240_v11, %v239_v8  ;;  %v371_v31 = vcombine.high %v333_v24, %v333_v24  ;;  %v326_v32 = vrot.slane %v319_v29, %v833_v20  ;;  %v396_v33 = vcombine.low %v333_v24, %v333_v24 }
  0x1d   : > { %vm242_vm1 = vcmp.ne.s32.totalorder %v241_v13, 0  ;;  %vm243_vm2 = vcmp.lt.s32.totalorder %v241_v13, 0  ;;  %v245_v15 = vadd.s32 16, %v241_v13 }
  0x1e   : > { %vm244_vm3 = vmand %vm243_vm2, %vm242_vm1  ;;  %296 = vrot.lane.b32.xlu0 %v826_v12, %s755_s6  ;;  %v334_v34 = vcombine.high %v326_v32, %v326_v32  ;;  %vm413_vm2 = vcmask 1041408  }
  0x1f   : > { %v246_v17 = vsel %vm244_vm3, %v245_v15, %v241_v13  ;;  %vm401_vm3 = vcmask 777216  }
  0x20   : > { %v247_v18 = vadd.s32 4294967295, %v246_v17  ;;  %v264_v19 = vadd.s32 1, %v246_v17  ;;  %v759_v17 = vmov 0.0  }
  0x21   : > { %643 = vmatprep.subr.bf16.mxu0 %v759_v17 }
  0x22   : > { %vm248_vm4 = vcmp.lt.s32.totalorder %v247_v18, 0  ;;  %vm249_vm5 = vcmp.ge.s32.totalorder %v247_v18, 16  ;;  %vm265_vm6 = vcmp.lt.s32.totalorder %v264_v19, 0  ;;  %vm266_vm7 = vcmp.ge.s32.totalorder %v264_v19, 16 }
  0x23   : > { %vm250_vm8 = vmor %vm248_vm4, %vm249_vm5  ;;  %vm420_vm4 = vcmask 1043456   ;;  %vm425_vm5 = vcmask 1045504  }
  0x24   : > { %v253_v21 = vsel %vm250_vm8, 1, %v751_v1  ;;  %vm267_vm9 = vmor %vm265_vm6, %vm266_vm7  ;;  %vm761_vm6 = vmmov 0   ;;  %vm353_vm7 = vcmask 1031168   ;;  %vm369_vm8 = vcmask 916480  }
  0x25   : > { %v254_v22 = vpack.c.b16 %v253_v21, %v253_v21  ;;  %v270_v23 = vsel %vm267_vm9, 1, %v751_v1  ;;  %649 = vmatprep.mubr.msk.bf16.mxu0 %vm761_vm6, %v759_v17  ;;  %vm454_vm9 = vcmask 138240  }
  0x26   : > { %v271_v25 = vpack.c.b16 %v270_v23, %v270_v23 }
  0x27   : > { %vm837_vm10 = vcmp.ne.s16.totalorder %v254_v22, 0 }
  0x28   : > { %v256_v27 = vsel %vm837_vm10, 65537, %v751_v1  ;;  %vm843_vm11 = vcmp.ne.s16.totalorder %v271_v25, 0 }
  0x29   : > { %281 = vrot.lane.b32.xlu1 %v256_v27, %s754_s5  ;;  %v273_v30 = vsel %vm843_vm11, 65537, %v751_v1 }
  0x2a   : > { %274 = vrot.lane.b32.xlu0 %v273_v30, %s755_s6 }
  0x2d   : > { %372 = vrot.lane.b32.xlu1 %v371_v31, %s753_s30 }
  0x2e   : > { %397 = vrot.lane.b32.xlu0 %v326_v32, %s756_s7 }
  0x31   : > { %399 = vrot.lane.b32.xlu1 %v396_v33, %s756_s7 }
  0x32   : > { %335 = vrot.lane.b32.xlu0 %v326_v32, %s754_s5 }
  0x35   : > { %337 = vrot.lane.b32.xlu1 %v334_v34, %s754_s5 }
  0x39   : > { %257 = vrot.lane.b32.xlu1 %v256_v27, %s753_s30 }
  0x8c   : > { %v304_v35 = vpop.permute.xlu1 %303  ;;  %v290_v36 = vpop.permute.xlu0 %289 }
  0x8d   : > { %v305_v37 = vrot.slane %v304_v35, 2  ;;  %v306_v38 = vrot.slane %v304_v35, 4  ;;  %v291_v39 = vrot.slane %v290_v36, 2  ;;  %v292_v40 = vrot.slane %v290_v36, 4  ;;  %v513_v36 = vld [vmem:[%s931_s3] sm:$0xff] }
  0x8f   : > { %v293_v41 = vsel %vm284_vm12, %v291_v39, %v292_v40  ;;  %v307_v42 = vsel %vm260_vm13, %v305_v37, %v306_v38  ;;  %v506_v38 = vld [vmem:[%s930_s2] sm:$0xff] }
  0x90   : > { %v297_v43 = vpop.permute.xlu0 %296  ;;  %v309_v44 = vsel %vm843_vm11, 0, %v307_v42  ;;  %v295_v45 = vsel %vm843_vm11, 0, %v293_v41 }
  0x91   : > { %v298_v46 = vrot.slane %v297_v43, 2  ;;  %v299_v47 = vrot.slane %v297_v43, 4  ;;  %v410_v48 = vrot.slane %v309_v44, %v833_v20  ;;  %v375_v49 = vcombine.low %v295_v45, %v295_v45 }
  0x93   : > { %411 = vrot.lane.b32.xlu0 %v410_v48, %s753_s30  ;;  %v382_v50 = vrot.slane %v375_v49, %v833_v20  ;;  %v300_v51 = vsel %vm277_vm14, %v298_v46, %v299_v47  ;;  %v439_v47 = vld [vmem:[%s929_s1] sm:$0xf] }
  0x94   : > { %v302_v52 = vsel %vm837_vm10, 0, %v300_v51  ;;  %vm459_vm10 = vcmask 293888  }
  0x95   : > { %v392_v53 = vrot.slane %v302_v52, %v833_v20 }
  0x97   : > { %383 = vrot.lane.b32.xlu0 %v382_v50, %s753_s30  ;;  %v393_v54 = vcombine.low %v392_v53, %v392_v53 }
  0x99   : > { %394 = vrot.lane.b32.xlu1 %v393_v54, %s753_s30 }
  0x9b   : > { %v282_v55 = vpop.permute.xlu1 %281 }
  0x9c   : > { %v283_v56 = vrot.slane %v282_v55, 6  ;;  %v275_v57 = vpop.permute.xlu0 %274 }
  0x9d   : > { %v276_v58 = vrot.slane %v275_v57, 6 }
  0x9e   : > { %v285_v59 = vsel %vm284_vm12, %v283_v56, %v282_v55 }
  0x9f   : > { %vm286_vm15 = vcmp.ne.s16.totalorder %v285_v59, 0  ;;  %v278_v60 = vsel %vm277_vm14, %v276_v58, %v275_v57  ;;  %v373_v61 = vpop.permute.xlu1 %372 }
  0xa0   : > { %v287_v62 = vsel %vm286_vm15, 0, %v826_v12  ;;  %vm279_vm0 = vcmp.ne.s16.totalorder %v278_v60, 0  ;;  %v398_v7 = vpop.permute.xlu0 %397 }
  0xa1   : > { %v356_v63 = vcombine.low %v287_v62, %v287_v62  ;;  %v280_v0 = vsel %vm279_vm0, 0, %v826_v12 }
  0xa2   : > { %v347_v1 = vrot.slane %v280_v0, %v833_v20 }
  0xa3   : > { %v400_v2 = vpop.permute.xlu1 %399  ;;  %v363_v4 = vrot.slane %v356_v63, %v833_v20 }
  0xa4   : > { %351 = vrot.lane.b32.xlu1 %v347_v1, %s757_s8  ;;  %v348_v3 = vcombine.low %v347_v1, %v347_v1  ;;  %v336_v11 = vpop.permute.xlu0 %335  ;;  %v402_v22 = vsel %vm401_vm3, %v398_v7, %v400_v2 }
  0xa5   : > { %v364_v6 = vcombine.low %v363_v4, %v363_v4 }
  0xa6   : > { %349 = vrot.lane.b32.xlu0 %v348_v3, %s757_s8 }
  0xa7   : > { %v338_v5 = vpop.permute.xlu1 %337 }
  0xa8   : > { %367 = vrot.lane.b32.xlu1 %v363_v4, %s758_s9  ;;  %v339_v14 = vsel %vm284_vm12, %v336_v11, %v338_v5 }
  0xaa   : > { %365 = vrot.lane.b32.xlu0 %v364_v6, %s758_s9 }
  0xab   : > { %v258_v8 = vpop.permute.xlu1 %257 }
  0xac   : > { %v259_v9 = vrot.slane %v258_v8, 6 }
  0xae   : > { %v261_v10 = vsel %vm260_vm13, %v259_v9, %v258_v8 }
  0xaf   : > { %vm262_vm1 = vcmp.ne.s16.totalorder %v261_v10, 0 }
  0xb0   : > { %v263_v13 = vsel %vm262_vm1, 0, %v826_v12 }
  0xb1   : > { %v317_v15 = vrot.slane %v263_v13, %v833_v20 }
  0xb3   : > { %v416_v16 = vsel %vm413_vm2, %v317_v15, %v339_v14  ;;  %v318_v25 = vcombine.high %v317_v15, %v317_v15 }
  0xb5   : > { %v419_v28 = vsel %vm413_vm2, %v318_v25, %v338_v5 }
 0x105   : > { %v412_v18 = vpop.permute.xlu0 %411 }
 0x106   : > { %452 = vrot.lane.b32.xlu0 %v412_v18, %s760_s10 }
 0x109   : > { %v384_v19 = vpop.permute.xlu0 %383 }
 0x10a   : > { %v432_v21 = vsel %vm413_vm2, %v373_v61, %v384_v19 }
 0x10b   : > { %v395_v12 = vpop.permute.xlu1 %394 }
 0x10c   : > { %v434_v23 = vsel %vm420_vm4, %v432_v21, %v395_v12 }
 0x10d   : > { %v438_v20 = vsel %vm425_vm5, %v434_v23, %v402_v22  ;;  %v436_v24 = vsel %vm425_vm5, %v434_v23, %v398_v7 }
 0x10e   : > { %450 = vrot.lane.b32.xlu0 %v438_v20, %s760_s10  ;;  %448 = vrot.lane.b32.xlu1 %v436_v24, %s760_s10 }
 0x116   : > { %v352_v26 = vpop.permute.xlu1 %351 }
 0x117   : > { %v424_v29 = vsel %vm420_vm4, %v419_v28, %v352_v26 }
 0x118   : > { %v350_v27 = vpop.permute.xlu0 %349 }
 0x119   : > { %v354_v30 = vsel %vm353_vm7, %v350_v27, %v352_v26 }
 0x11a   : > { %v368_v31 = vpop.permute.xlu1 %367  ;;  %v422_v35 = vsel %vm420_vm4, %v416_v16, %v354_v30 }
 0x11b   : > { %v429_v32 = vsel %vm425_vm5, %v424_v29, %v368_v31 }
 0x11c   : > { %v366_v33 = vpop.permute.xlu0 %365  ;;  %446 = vrot.lane.b32.xlu0 %v429_v32, %s760_s10 }
 0x11d   : > { %v370_v34 = vsel %vm369_vm8, %v366_v33, %v368_v31 }
 0x11e   : > { %v427_v37 = vsel %vm425_vm5, %v422_v35, %v370_v34 }
 0x11f   : > { %444 = vrot.lane.b32.xlu1 %v427_v37, %s760_s10 }
 0x120   : > { %516 = vperm.xlu0 %705, %v513_v36  }
 0x123   : > { %509 = vperm.xlu1 %704, %v506_v38  }
 0x178   : > { %v453_v39 = vpop.permute.xlu0 %452 }
 0x179   : > { %v464_v40 = vsel %vm413_vm2, %v453_v39, 0 }
 0x17a   : > { %644 = vmatpush3.bf16.msra.mxu0 %v464_v40 }
 0x17b   : > { %645 = vmatprep.subr.bf16.mxu0 %v759_v17 }
 0x180   : > { %v451_v41 = vpop.permute.xlu0 %450  ;;  %v449_v42 = vpop.permute.xlu1 %448 }
 0x181   : > { %v456_v43 = vsel %vm454_vm9, %v449_v42, %v451_v41 }
 0x182   : > { %646 = vmatpush3.bf16.msra.mxu0 %v456_v43 }
 0x183   : > { %647 = vmatprep.subr.bf16.mxu0 %v759_v17 }
 0x18e   : > { %v447_v44 = vpop.permute.xlu0 %446 }
 0x191   : > { %v445_v45 = vpop.permute.xlu1 %444 }
 0x192   : > { %v455_v46 = vsel %vm454_vm9, %v445_v45, %v447_v44 }
 0x193   : > { %648 = vmatpush3.bf16.msra.mxu0 %v455_v46 }
 0x196   : > { %650 = vmatmul.mubr.msk.bf16.vlgmr.msra.gmra.mxu0 %vm459_vm10, %v439_v47 }
 0x19b   : > { %v517_v50 = vpop.permute.xlu0 %516 }
 0x19e   : > { %v510_v48 = vpop.permute.xlu1 %509 }
 0x256   : > { %v500_v49 = vpop.f32.mrf.mxu0 }
 0x257   : > { %v512_v51 = vmul.f32 %v510_v48, %v500_v49 }
 0x258   : > { %v651_v52 = vpop.f32.mrf.mxu0 }
 0x259   : > { %v519_v53 = vadd.f32 %v517_v50, %v512_v51 }
 0x25a   : > { %v503_v54 = vpop.f32.mrf.mxu0 }
 0x25b   : > { %v520_v55 = vand.u32 2147483647, %v519_v53  ;;  %vm524_vm11 = vcmp.ge.f32.partialorder %v519_v53, 0.0 }
 0x25c   : > { %v652_v56 = vpop.f32.mrf.mxu0 }
 0x25d   : > { %v521_v57 = vsub.f32 0.0, %v520_v55 }
 0x25f   : > { %v522_v58 = vmul.f32 1.442695, %v521_v57 }
 0x261   : > { %707 = vpow2.f32 %v522_v58 }
 0x26e   : > { %v708_v59 = vpop.eup %707 }
 0x26f   : > { %v525_v60 = vmul.f32 2.0, %v708_v59  ;;  %v533_v0 = vmul.f32 %v708_v59, %v708_v59  ;;  %v527_v4 = vadd.f32 2.0, %v708_v59 }
 0x271   : > { %v526_v61 = vadd.f32 1.0, %v525_v60  ;;  %v530_v62 = vmul.f32 %v708_v59, %v525_v60  ;;  %v532_v63 = vadd.f32 2.0, %v525_v60  ;;  %v528_v5 = vmul.f32 %v708_v59, %v527_v4 }
 0x273   : > { %v531_v1 = vadd.f32 %v530_v62, %v526_v61  ;;  %v534_v2 = vadd.f32 %v533_v0, %v532_v63  ;;  %v529_v6 = vsel %vm524_vm11, %v526_v61, %v528_v5 }
 0x274   : > { %v536_v7 = vmul.f32 %v529_v6, %v519_v53 }
 0x275   : > { %v535_v3 = vsel %vm524_vm11, %v531_v1, %v534_v2 }
 0x276   : > { %709 = vrcp.f32 %v535_v3 }
 0x283   : > { %v710_v8 = vpop.eup %709 }
 0x284   : > { %v538_v9 = vmul.f32 %v710_v8, %v536_v7 }
 0x286   : > { %v539_v10 = vpack.c.bf16 %v538_v9, %v538_v9 }
 0x288   : > { %540 = vst [vmem:[%s217_s29] sm:$0xf] %v539_v10 }
 0x289 PF: > { %s14_s19 = sadd.s32 1, %s749_s19   ;;  %s937_s15 = smov %s741_s17 }
 0x28a   : > { %p11_p7 = scmp.ge.s32.totalorder %s14_s19, 6   ;;  %s938_s16 = smov %s745_s18 }
 0x28b   : > { %s939_s17 = smov %s942_s20  ;;  %s940_s18 = smov %s946_s21 }
 0x28c   :  { %13 = sbr.rel (!%p11_p7) target bundleno = 3 (0x3), region = 67 }

// kernel: inception_block.5
= control target key start
LH: loop header
LB: loop body
LE: loop exit
PB: predicated region body
PF: predicated region fallthrough
CT: control target
= control target key end

     0   :  { %s1878_s0 = inlined_call_operand.vmem [shape: bf16[2,4,256], index: 0, kind: input, shape index: {}]   ;;  %s1879_s1 = inlined_call_operand.vmem [shape: bf16[8,100], index: 1, kind: input, shape index: {}]   ;;  %s1880_s2 = inlined_call_operand.vmem [shape: f32[8,1], index: 2, kind: input, shape index: {}]   ;;  %s1881_s3 = inlined_call_operand.vmem [shape: f32[8,1], index: 3, kind: input, shape index: {}]   ;;  %s1882_s4 = inlined_call_operand.vmem [shape: bf16[2,8,256], index: 4, kind: input, shape index: {}]   ;;  %s1883_s5 = inlined_call_operand.vmem [shape: bf16[2,8,256], index: 5, kind: input, shape index: {}]   ;;  %s1884_s6 = inlined_call_operand.vmem [shape: bf16[2,8,256], index: 6, kind: input, shape index: {}]   ;;  %s1885_s7 = inlined_call_operand.vmem [shape: bf16[2,32,256], index: 7, kind: output, shape index: {}]  }
   0x1   :  { %1888 = sst [smem:[#allocation5_spill]] %s1878_s0 }
   0x2   :  { %1889 = sst [smem:[#allocation6_spill]] %s1880_s2 }
   0x3   :  { %1890 = sst [smem:[#allocation7_spill]] %s1881_s3 }
   0x4   :  { %s1495_s24 = smov 0   ;;  %s1497_s25 = smov 0  }
   0x5   :  { %s1499_s26 = smov 0   ;;  %s1501_s27 = smov 0  }
   0x6   :  { %s1503_s28 = smov 0   ;;  %s1505_s29 = smov 0  }
   0x7   :  { %s1507_s30 = smov 0  }
   0x8 LB: > { %s26_s8 = sadd.s32 1, %s1424_s28  ;;  %s29_s9 = sadd.s32 1, %s1428_s29  ;;  %s1432_s30 = sphi %s1507_s30, %s17_s30   ;;  %s1428_s29 = sphi %s1505_s29, %s1911_s29   ;;  %s1424_s28 = sphi %s1503_s28, %s1910_s28   ;;  %s1420_s27 = sphi %s1501_s27, %s1909_s27   ;;  %s1416_s26 = sphi %s1499_s26, %s1908_s26   ;;  %s1412_s25 = sphi %s1497_s25, %s1907_s25   ;;  %s1408_s24 = sphi %s1495_s24, %s1906_s24  }
   0x9   : > { %p27_p0 = scmp.ge.s32.totalorder %s26_s8, 2  ;;  %s1243_s10 = sadd.s32 4294967295, %s1432_s30  }
   0xa   : > { %p221_p1 = scmp.ne.s32.totalorder %s1412_s25, %s1408_s24  ;;  %p222_p2 = scmp.eq.s32.totalorder %s1243_s10, 3 }
   0xb   : > { %s1913_s8 = smov (%p27_p0, %s26_s8), 0  ;;  %s1915_s9 = smov (!%p27_p0, %s29_s9), %s1428_s29 }
   0xc   : > { %s207_s11 = ssub.s32 %s1424_s28, %s1913_s8  ;;  %p31_p3 = scmp.ge.s32.totalorder %s1915_s9, 2 }
   0xd   : > { %p1247_p4 = scmp.ge.s32.totalorder %s1432_s30, 1  ;;  %p1541_p5 = por %p222_p2, %p221_p1 }
   0xe   : > { %p296_p6 = scmp.lt.s32.totalorder %s1432_s30, 5  ;;  %s1917_s9 = smov (%p31_p3, %s1915_s9), 0 }
   0xf   : > { %1892 = sst [smem:[#allocation4_spill]] %s1917_s9  ;;  %s206_s13 = ssub.s32 %s1428_s29, %s1917_s9 }
  0x10   : > { %p297_p7 = pnand %p1247_p4, %p296_p6  ;;  %s208_s14 = sor.u32 %s207_s11, %s206_s13 }
  0x11   : > { %s211_s15 = sadd.s32 1, %s1412_s25  ;;  %p209_p8 = scmp.eq.s32.totalorder %s208_s14, 0 }
  0x12   : > { %300 = sbr.rel (%p297_p7) target bundleno = 722 (0x2d2), region = 48  ;;  %p351_p9 = scmp.lt.s32.totalorder (!%p297_p7), %s1420_s27, 1 }
  0x13   : > { %s1552_s16 = scalar_select %p209_p8, %s1412_s25, %s211_s15  }
  0x14   : > { %s1257_s17 = sshll.u32 (!%p297_p7), %s1416_s26, 7  ;;  %s1893_s0 = sld [smem:[#allocation5_spill]] (!%p297_p7) }
  0x15   : > { %s388_s23 = sshra.s32 (!%p297_p7), %s1257_s17, 7  ;;  %s1435_s13 = smov (!%p297_p7), 94  }
  0x16   : > { %s1258_s10 = sshll.u32 (!%p297_p7), %s388_s23, 1  ;;  %s1436_s14 = smov (!%p297_p7), 97  }
  0x17   : > { %v393_v0 = vlaneseq  ;;  %v1434_v1 = vmov 0   ;;  %v395_v2 = vstv %s1257_s17  ;;  %s1561_s18 = scalar_select %p351_p9, %s1420_s27, 1  ;;  %v1437_v12 = vmov 1983009808  }
  0x18   : > { %383 = vst [vmem:[#allocation2] sm:$0x3] %v1434_v1  ;;  %386 = vst [vmem:[#allocation2 + $0x6] sm:$0x3] %v1434_v1  ;;  %1370 = vset.pattern.permute.xlu1 %v1434_v1  ;;  %1371 = vset.pattern.permute.xlu0 %v1434_v1  ;;  %s391_s11 = scalar_lea.vmem [#allocation2], %s1258_s10  ;;  %v592_v13 = vunpack.c.l.s4 %v1437_v12  ;;  %s1438_s15 = smov 110  }
  0x19   : > { %v394_v3 = vand.u32 127, %v393_v0  ;;  %s1266_s19 = sshll.u32 %s1561_s18, 2  ;;  %v595_v15 = vshrl.u32 %v393_v0, 7  ;;  %s1439_s17 = smov 95  }
  0x1a   : > { %s355_s22 = scalar_lea.vmem %s1893_s0, %s1266_s19  ;;  %v593_v17 = vunpack.c.0.s8 %v592_v13  ;;  %s1440_s19 = smov 111  }
  0x1b   : > { %v396_v4 = vadd.s32 %v395_v2, %v394_v3  ;;  %v384_v5 = vld [vmem:[%s355_s22] sm:$0xf]  ;;  %s1441_s20 = smov 98   ;;  %s1442_s21 = smov 127  }
  0x1c   : > { %385 = vst [vmem:[#allocation2 + $0x2] sm:$0xf] %v384_v5  ;;  %v1581_v22 = vsub.s32 %v593_v17, %v595_v15  ;;  %s1443_s22 = smov 114   ;;  %s1444_s23 = smov 113  }
  0x1d   : > { %v398_v6 = vsub.s32 0, %v396_v4  ;;  %vm397_vm0 = vcmp.lt.s32.totalorder %v396_v4, 0  ;;  %s1445_s10 = smov 96   ;;  %s1903_s3 = sld [smem:[#allocation7_spill]] }
  0x1e   : > { %s1904_s2 = sld [smem:[#allocation6_spill]]  ;;  %p358_p10 = scmp.lt.s32.totalorder %s1416_s26, 1 }
  0x1f   : > { %v1259_v7 = vmin.u32 %v398_v6, %v396_v4  ;;  %s1262_s0 = sshll.u32 (%p1541_p5), %s1420_s27, 3 }
  0x21   : > { %v401_v8 = vand.u32 15, %v1259_v7 }
  0x23   : > { %v402_v9 = vsub.s32 0, %v401_v8  ;;  %v1567_v10 = vld [vmem:[%s391_s11] sm:$0x3f]  ;;  %s1446_s11 = smov 126  }
  0x24   : > { %583 = vrot.lane.b32.xlu1 %v1567_v10, %s1435_s13  ;;  %569 = vrot.lane.b32.xlu0 %v1567_v10, %s1436_s14  ;;  %v886_v23 = vcombine.high %v1567_v10, %v1567_v10  ;;  %v1593_v28 = vrot.slane %v1567_v10, %v1581_v22  ;;  %v688_v39 = vcombine.low %v1567_v10, %v1567_v10 }
  0x25   : > { %v403_v11 = vsel %vm397_vm0, %v402_v9, %v401_v8 }
  0x26   : > { %vm404_vm1 = vcmp.ne.s32.totalorder %v403_v11, 0  ;;  %vm405_vm2 = vcmp.lt.s32.totalorder %v403_v11, 0  ;;  %v407_v14 = vadd.s32 16, %v403_v11  ;;  %v893_v29 = vrot.slane %v886_v23, %v1581_v22 }
  0x27   : > { %vm406_vm3 = vmand %vm405_vm2, %vm404_vm1  ;;  %v695_v43 = vrot.slane %v688_v39, %v1581_v22  ;;  %v763_v47 = vcombine.high %v1593_v28, %v1593_v28 }
  0x28   : > { %v408_v16 = vsel %vm406_vm3, %v407_v14, %v403_v11  ;;  %555 = vrot.lane.b32.xlu1 %v1567_v10, %s1438_s15  ;;  %576 = vrot.lane.b32.xlu0 %v1567_v10, %s1439_s17  ;;  %v894_v34 = vcombine.low %v893_v29, %v893_v29 }
  0x29   : > { %v460_v18 = vadd.s32 2, %v408_v16  ;;  %v443_v19 = vadd.s32 1, %v408_v16  ;;  %v426_v20 = vadd.s32 4294967295, %v408_v16  ;;  %v409_v21 = vadd.s32 4294967294, %v408_v16 }
  0x2a   : > { %v852_v45 = vcombine.high %v695_v43, %v695_v43  ;;  %v696_v46 = vcombine.low %v695_v43, %v695_v43 }
  0x2b   : > { %vm461_vm4 = vcmp.lt.s32.totalorder %v460_v18, 0  ;;  %vm462_vm5 = vcmp.ge.s32.totalorder %v460_v18, 16  ;;  %vm444_vm6 = vcmp.lt.s32.totalorder %v443_v19, 0  ;;  %vm445_vm7 = vcmp.ge.s32.totalorder %v443_v19, 16 }
  0x2c   : > { %vm463_vm8 = vmor %vm461_vm4, %vm462_vm5  ;;  %vm427_vm9 = vcmp.lt.s32.totalorder %v426_v20, 0  ;;  %vm428_vm10 = vcmp.ge.s32.totalorder %v426_v20, 16  ;;  %548 = vrot.lane.b32.xlu1 %v1567_v10, %s1440_s19  ;;  %562 = vrot.lane.b32.xlu0 %v1567_v10, %s1441_s20  ;;  %vm410_vm13 = vcmp.lt.s32.totalorder %v409_v21, 0  ;;  %vm411_vm14 = vcmp.ge.s32.totalorder %v409_v21, 16 }
  0x2d   : > { %v466_v24 = vsel %vm463_vm8, 1, %v1434_v1  ;;  %vm446_vm11 = vmor %vm444_vm6, %vm445_vm7  ;;  %vm422_vm4 = vcmask 769024   ;;  %vm515_vm5 = vcmask 1039360   ;;  %vm480_vm6 = vcmask 900096  }
  0x2e   : > { %vm429_vm12 = vmor %vm427_vm9, %vm428_vm10  ;;  %v467_v25 = vpack.c.b16 %v466_v24, %v466_v24  ;;  %v449_v26 = vsel %vm446_vm11, 1, %v1434_v1  ;;  %vm1886_vm7 = vcmask 793600   ;;  %vm439_vm8 = vcmask 777216  }
  0x2f   : > { %v432_v27 = vsel %vm429_vm12, 1, %v1434_v1  ;;  %vm412_vm15 = vmor %vm410_vm13, %vm411_vm14  ;;  %v450_v31 = vpack.c.b16 %v449_v26, %v449_v26  ;;  %vm501_vm9 = vcmask 932864   ;;  %vm487_vm10 = vcmask 908288  }
  0x30   : > { %520 = vrot.lane.b32.xlu1 %v1567_v10, %s1442_s21  ;;  %534 = vrot.lane.b32.xlu0 %v1567_v10, %s1443_s22  ;;  %vm1596_vm0 = vcmp.ne.s16.totalorder %v467_v25, 0  ;;  %v433_v32 = vpack.c.b16 %v432_v27, %v432_v27  ;;  %v415_v33 = vsel %vm412_vm15, 1, %v1434_v1  ;;  %vm508_vm11 = vcmask 1031168  }
  0x31   : > { %v469_v35 = vsel %vm1596_vm0, 65537, %v1434_v1  ;;  %vm1607_vm1 = vcmp.ne.s16.totalorder %v450_v31, 0  ;;  %v416_v38 = vpack.c.b16 %v415_v33, %v415_v33  ;;  %vm473_vm12 = vcmask 801792  }
  0x32   : > { %vm1611_vm2 = vcmp.ne.s16.totalorder %v433_v32, 0  ;;  %v452_v40 = vsel %vm1607_vm1, 65537, %v1434_v1  ;;  %vm494_vm13 = vcmask 924672   ;;  %vm746_vm14 = vcmask 785408  }
  0x33   : > { %v435_v41 = vsel %vm1611_vm2, 65537, %v1434_v1  ;;  %vm1624_vm3 = vcmp.ne.s16.totalorder %v416_v38, 0  ;;  %vm800_vm15 = vcmask 1041408  }
  0x34   : > { %541 = vrot.lane.b32.xlu1 %v1567_v10, %s1444_s23  ;;  %895 = vrot.lane.b32.xlu0 %v1593_v28, %s1445_s10  ;;  %v418_v44 = vsel %vm1624_vm3, 65537, %v1434_v1 }
  0x38   : > { %897 = vrot.lane.b32.xlu1 %v894_v34, %s1445_s10  ;;  %498 = vrot.lane.b32.xlu0 %v469_v35, %s1443_s22  ;;  %s1447_s22 = smov 112  }
  0x3c   : > { %491 = vrot.lane.b32.xlu0 %v452_v40, %s1444_s23  ;;  %512 = vrot.lane.b32.xlu1 %v435_v41, %s1442_s21 }
  0x40   : > { %527 = vrot.lane.b32.xlu0 %v1567_v10, %s1446_s11  ;;  %505 = vrot.lane.b32.xlu1 %v418_v44, %s1446_s11 }
  0x44   : > { %477 = vrot.lane.b32.xlu0 %v418_v44, %s1438_s15  ;;  %853 = vrot.lane.b32.xlu1 %v852_v45, %s1447_s22 }
  0x48   : > { %855 = vrot.lane.b32.xlu0 %v1593_v28, %s1447_s22  ;;  %470 = vrot.lane.b32.xlu1 %v469_v35, %s1441_s20 }
  0x4c   : > { %484 = vrot.lane.b32.xlu0 %v435_v41, %s1440_s19  ;;  %436 = vrot.lane.b32.xlu1 %v435_v41, %s1439_s17 }
  0x50   : > { %453 = vrot.lane.b32.xlu0 %v452_v40, %s1436_s14  ;;  %419 = vrot.lane.b32.xlu1 %v418_v44, %s1435_s13  ;;  %s1448_s14 = smov 124  }
  0x54   : > { %697 = vrot.lane.b32.xlu1 %v696_v46, %s1438_s15  ;;  %764 = vrot.lane.b32.xlu0 %v763_v47, %s1435_s13 }
  0x58   : > { %699 = vrot.lane.b32.xlu0 %v695_v43, %s1438_s15  ;;  %s1450_s15 = smov 108  }
  0x96   : > { %v584_v48 = vpop.permute.xlu1 %583  ;;  %v570_v49 = vpop.permute.xlu0 %569 }
  0x97   : > { %v585_v50 = vrot.slane %v584_v48, 2  ;;  %v586_v51 = vrot.slane %v584_v48, 4  ;;  %v571_v6 = vrot.slane %v570_v49, 2  ;;  %v572_v7 = vrot.slane %v570_v49, 4 }
  0x99   : > { %v587_v52 = vsel %vm422_vm4, %v585_v50, %v586_v51  ;;  %v573_v18 = vsel %vm1886_vm7, %v571_v6, %v572_v7  ;;  %vm807_vm7 = vcmask 1043456  }
  0x9a   : > { %v556_v53 = vpop.permute.xlu1 %555  ;;  %v577_v54 = vpop.permute.xlu0 %576  ;;  %v589_v55 = vsel %vm1596_vm0, 0, %v587_v52  ;;  %v575_v26 = vsel %vm1611_vm2, 0, %v573_v18 }
  0x9b   : > { %931 = vrot.lane.b32.xlu1 %v589_v55, %s1435_s13  ;;  %v557_v3 = vrot.slane %v556_v53, 2  ;;  %v558_v4 = vrot.slane %v556_v53, 4  ;;  %v578_v11 = vrot.slane %v577_v54, 2  ;;  %v579_v12 = vrot.slane %v577_v54, 4 }
  0x9c   : > { %v878_v45 = vcombine.low %v575_v26, %v575_v26 }
  0x9d   : > { %v559_v17 = vsel %vm480_vm6, %v557_v3, %v558_v4  ;;  %v580_v21 = vsel %vm439_vm8, %v578_v11, %v579_v12 }
  0x9e   : > { %v549_v56 = vpop.permute.xlu1 %548  ;;  %v1654_v57 = vpop.permute.xlu0 %562  ;;  %v561_v24 = vsel %vm1596_vm0, 0, %v559_v17  ;;  %v582_v27 = vsel %vm1607_vm1, 0, %v580_v21 }
  0x9f   : > { %v550_v15 = vrot.slane %v549_v56, 2  ;;  %v551_v16 = vrot.slane %v549_v56, 4  ;;  %v564_v29 = vrot.slane %v1654_v57, 2  ;;  %v868_v33 = vcombine.low %v561_v24, %v561_v24 }
  0xa0   : > { %v565_v38 = vrot.slane %v1654_v57, 4  ;;  %v901_v48 = vcombine.low %v582_v27, %v582_v27 }
  0xa1   : > { %v552_v25 = vsel %vm487_vm10, %v550_v15, %v551_v16  ;;  %v875_v52 = vrot.slane %v868_v33, %v1581_v22 }
  0xa2   : > { %v521_v58 = vpop.permute.xlu1 %520  ;;  %v535_v59 = vpop.permute.xlu0 %534  ;;  %v554_v35 = vsel %vm1607_vm1, 0, %v552_v25  ;;  %v566_v53 = vsel %vm473_vm12, %v564_v29, %v565_v38 }
  0xa3   : > { %v522_v60 = vrot.slane %v521_v58, 2  ;;  %v523_v61 = vrot.slane %v521_v58, 4  ;;  %v536_v13 = vrot.slane %v535_v59, 2  ;;  %v537_v14 = vrot.slane %v535_v59, 4 }
  0xa4   : > { %v865_v49 = vrot.slane %v554_v35, %v1581_v22  ;;  %v885_v58 = vrot.slane %v878_v45, %v1581_v22 }
  0xa5   : > { %v524_v62 = vsel %vm515_vm5, %v522_v60, %v523_v61  ;;  %v538_v23 = vsel %vm501_vm9, %v536_v13, %v537_v14  ;;  %v568_v61 = vsel %vm1624_vm3, 0, %v566_v53 }
  0xa6   : > { %v1657_v63 = vpop.permute.xlu1 %541  ;;  %v1659_v0 = vpop.permute.xlu0 %895  ;;  %v526_v1 = vsel %vm1607_vm1, 0, %v524_v62  ;;  %v540_v34 = vsel %vm1624_vm3, 0, %v538_v23  ;;  %vm672_vm1 = vcmask 916480   ;;  %vm812_vm3 = vcmask 1045504  }
  0xa7   : > { %v767_v2 = vcombine.low %v526_v1, %v526_v1  ;;  %v543_v41 = vrot.slane %v1657_v63, 2  ;;  %v544_v43 = vrot.slane %v1657_v63, 4  ;;  %v789_v47 = vcombine.low %v540_v34, %v540_v34 }
  0xa8   : > { %v866_v63 = vcombine.low %v865_v49, %v865_v49  ;;  %v876_v1 = vcombine.low %v875_v52, %v875_v52  ;;  %v919_v16 = vsel %vm800_vm15, %v568_v61, %v885_v58 }
  0xa9   : > { %v774_v5 = vrot.slane %v767_v2, %v1581_v22  ;;  %v545_v55 = vsel %vm494_vm13, %v543_v41, %v544_v43  ;;  %v796_v60 = vrot.slane %v789_v47, %v1581_v22  ;;  %v908_v2 = vrot.slane %v901_v48, %v1581_v22 }
  0xaa   : > { %v1664_v8 = vpop.permute.xlu1 %897  ;;  %v1666_v9 = vpop.permute.xlu0 %498  ;;  %v547_v3 = vsel %vm1611_vm2, 0, %v545_v55 }
  0xab   : > { %775 = vrot.lane.b32.xlu1 %v774_v5, %s1435_s13  ;;  %v899_v6 = vsel %vm746_vm14, %v1659_v0, %v1664_v8  ;;  %v797_v13 = vcombine.low %v796_v60, %v796_v60  ;;  %v909_v18 = vcombine.low %v908_v2, %v908_v2  ;;  %v500_v21 = vrot.slane %v1666_v9, 6 }
  0xad   : > { %v502_v34 = vsel %vm501_vm9, %v500_v21, %v1666_v9 }
  0xae   : > { %v492_v19 = vpop.permute.xlu0 %491  ;;  %v1671_v20 = vpop.permute.xlu1 %512 }
  0xaf   : > { %v493_v44 = vrot.slane %v492_v19, 6  ;;  %v514_v35 = vrot.slane %v1671_v20, 6 }
  0xb1   : > { %v495_v56 = vsel %vm494_vm13, %v493_v44, %v492_v19  ;;  %v921_v19 = vsel %vm807_vm7, %v919_v16, %v899_v6  ;;  %v516_v9 = vsel %vm515_vm5, %v514_v35, %v1671_v20 }
  0xb2   : > { %v528_v31 = vpop.permute.xlu0 %527  ;;  %v506_v32 = vpop.permute.xlu1 %505  ;;  %v923_v29 = vsel %vm812_vm3, %v921_v19, %v909_v18 }
  0xb3   : > { %v529_v39 = vrot.slane %v528_v31, 2  ;;  %v530_v40 = vrot.slane %v528_v31, 4  ;;  %v507_v57 = vrot.slane %v506_v32, 6 }
  0xb5   : > { %v531_v46 = vsel %vm508_vm11, %v529_v39, %v530_v40  ;;  %v509_v42 = vsel %vm508_vm11, %v507_v57, %v506_v32 }
  0xb6   : > { %v478_v36 = vpop.permute.xlu0 %477  ;;  %v854_v50 = vpop.permute.xlu1 %853  ;;  %v533_v51 = vsel %vm1596_vm0, 0, %v531_v46  ;;  %vm496_vm0 = vcmp.ne.s16.totalorder %v495_v56, 0  ;;  %vm510_vm13 = vcmp.ne.s16.totalorder %v509_v42, 0  ;;  %v1452_v42 = vmov 0.0  }
  0xb7   : > { %v784_v54 = vrot.slane %v533_v51, %v1581_v22  ;;  %v479_v7 = vrot.slane %v478_v36, 6  ;;  %v497_v14 = vsel %vm496_vm0, 0, %v1567_v10  ;;  %v511_v27 = vsel %vm510_vm13, 0, %v1567_v10  ;;  %1275 = vmatprep.subr.bf16.mxu0 %v1452_v42 }
  0xb8   : > { %v709_v26 = vrot.slane %v497_v14, %v1581_v22  ;;  %v740_v39 = vrot.slane %v511_v27, %v1581_v22  ;;  %vm503_vm0 = vcmp.ne.s16.totalorder %v502_v34, 0  ;;  %vm1902_vm13 = vcmask 793600  }
  0xb9   : > { %v785_v59 = vcombine.low %v784_v54, %v784_v54  ;;  %v481_v23 = vsel %vm480_vm6, %v479_v7, %v478_v36  ;;  %v504_v47 = vsel %vm503_vm0, 0, %v1567_v10  ;;  %vm715_vm0 = vcmask 891904  }
  0xba   : > { %v856_v30 = vpop.permute.xlu0 %855  ;;  %v471_v62 = vpop.permute.xlu1 %470  ;;  %v710_v40 = vcombine.high %v709_v26, %v709_v26  ;;  %v741_v46 = vcombine.low %v740_v39, %v740_v39 }
  0xbb   : > { %v857_v4 = vsel %vm672_vm1, %v854_v50, %v856_v30  ;;  %v472_v5 = vrot.slane %v471_v62, 6  ;;  %786 = vrot.lane.b32.xlu0 %v785_v59, %s1435_s13  ;;  %v718_v50 = vcombine.low %v504_v47, %v504_v47 }
  0xbc   : > { %v912_v11 = vsel %vm800_vm15, %v547_v3, %v857_v4  ;;  %v621_v3 = vcombine.low %v1593_v28, %v1593_v28 }
  0xbd   : > { %v474_v12 = vsel %vm473_vm12, %v472_v5, %v471_v62  ;;  %v914_v37 = vsel %vm807_vm7, %v912_v11, %v866_v63  ;;  %vm482_vm12 = vcmp.ne.s16.totalorder %v481_v23, 0  ;;  %v725_v57 = vrot.slane %v718_v50, %v1581_v22 }
  0xbe   : > { %vm475_vm2 = vcmp.ne.s16.totalorder %v474_v12, 0  ;;  %v916_v15 = vsel %vm812_vm3, %v914_v37, %v876_v1  ;;  %v485_v17 = vpop.permute.xlu0 %484  ;;  %v437_v0 = vpop.permute.xlu1 %436  ;;  %v483_v43 = vsel %vm482_vm12, 0, %v1567_v10 }
  0xbf   : > { %v476_v8 = vsel %vm475_vm2, 0, %v1567_v10  ;;  %927 = vrot.lane.b32.xlu1 %v916_v15, %s1435_s13  ;;  %798 = vrot.lane.b32.xlu0 %v797_v13, %s1435_s13  ;;  %v486_v25 = vrot.slane %v485_v17, 6  ;;  %v438_v31 = vrot.slane %v437_v0, 6  ;;  %v659_v45 = vcombine.low %v483_v43, %v483_v43 }
  0xc0   : > { %v650_v24 = vrot.slane %v476_v8, %v1581_v22  ;;  %v726_v61 = vcombine.high %v725_v57, %v725_v57 }
  0xc1   : > { %v488_v38 = vsel %vm487_vm10, %v486_v25, %v485_v17  ;;  %v440_v44 = vsel %vm439_vm8, %v438_v31, %v437_v0  ;;  %v666_v51 = vrot.slane %v659_v45, %v1581_v22 }
  0xc2   : > { %v420_v32 = vpop.permute.xlu1 %419  ;;  %vm489_vm2 = vcmp.ne.s16.totalorder %v488_v38, 0  ;;  %vm441_vm9 = vcmp.ne.s16.totalorder %v440_v44, 0  ;;  %v454_v49 = vpop.permute.xlu0 %453  ;;  %v651_v62 = vcombine.high %v650_v24, %v650_v24 }
  0xc3   : > { %652 = vrot.lane.b32.xlu1 %v650_v24, %s1448_s14  ;;  %929 = vrot.lane.b32.xlu0 %v923_v29, %s1435_s13  ;;  %v421_v33 = vrot.slane %v420_v32, 6  ;;  %s1449_s13 = smov 109   ;;  %v490_v48 = vsel %vm489_vm2, 0, %v1567_v10  ;;  %v442_v36 = vsel %vm441_vm9, 0, %v1567_v10  ;;  %v455_v53 = vrot.slane %v454_v49, 6 }
  0xc4   : > { %v681_v20 = vrot.slane %v490_v48, %v1581_v22  ;;  %v600_v54 = vcombine.low %v442_v36, %v442_v36  ;;  %v667_v4 = vcombine.high %v666_v51, %v666_v51  ;;  %vm731_vm2 = vcmask 883712  }
  0xc5   : > { %v1734_v41 = vsel %vm422_vm4, %v421_v33, %v420_v32  ;;  %vm517_vm4 = vcmp.ne.s16.totalorder %v516_v9, 0  ;;  %v457_v58 = vsel %vm1902_vm13, %v455_v53, %v454_v49  ;;  %vm1454_vm13 = vmmov 0  }
  0xc6   : > { %v518_v52 = vsel %vm517_vm4, 0, %v1567_v10  ;;  %v682_v56 = vcombine.low %v681_v20, %v681_v20  ;;  %v607_v59 = vrot.slane %v600_v54, %v1581_v22  ;;  %vm458_vm12 = vcmp.ne.s16.totalorder %v457_v58, 0  ;;  %v698_v7 = vpop.permute.xlu1 %697  ;;  %1289 = vmatprep.mubr.msk.bf16.mxu0 %vm1454_vm13, %v1452_v42 }
  0xc7   : > { %713 = vrot.lane.b32.xlu1 %v710_v40, %s1449_s13  ;;  %711 = vrot.lane.b32.xlu0 %v709_v26, %s1449_s13  ;;  %v749_v55 = vcombine.low %v518_v52, %v518_v52  ;;  %v459_v30 = vsel %vm458_vm12, 0, %v1567_v10  ;;  %vm424_vm9 = vcmp.ne.s16.totalorder %v1734_v41, 0  ;;  %vm656_vm4 = vcmask 1014784   ;;  %s348_s13 = sand.u32 1, %s1408_s24  }
  0xc8   : > { %v628_v63 = vcombine.low %v459_v30, %v459_v30  ;;  %v608_v6 = vcombine.high %v607_v59, %v607_v59  ;;  %v425_v9 = vsel %vm424_vm9, 0, %v1567_v10 }
  0xc9   : > { %v756_v60 = vrot.slane %v749_v55, %v1581_v22  ;;  %v597_v36 = vrot.slane %v425_v9, %v1581_v22 }
  0xca   : > { %v635_v2 = vrot.slane %v628_v63, %v1581_v22 }
  0xcb   : > { %742 = vrot.lane.b32.xlu1 %v741_v46, %s1445_s10  ;;  %744 = vrot.lane.b32.xlu0 %v740_v39, %s1445_s10  ;;  %v757_v1 = vcombine.low %v756_v60, %v756_v60  ;;  %v598_v55 = vcombine.high %v597_v36, %v597_v36 }
  0xcc   : > { %v636_v5 = vcombine.low %v635_v2, %v635_v2 }
  0xcf   : > { %668 = vrot.lane.b32.xlu1 %v666_v51, %s1447_s22  ;;  %685 = vrot.lane.b32.xlu0 %v681_v20, %s1440_s19 }
  0xd3   : > { %683 = vrot.lane.b32.xlu1 %v682_v56, %s1440_s19  ;;  %727 = vrot.lane.b32.xlu0 %v725_v57, %s1450_s15  ;;  %s1451_s19 = smov 125  }
  0xd7   : > { %609 = vrot.lane.b32.xlu1 %v607_v59, %s1442_s21  ;;  %760 = vrot.lane.b32.xlu0 %v756_v60, %s1439_s17 }
  0xdb   : > { %729 = vrot.lane.b32.xlu1 %v726_v61, %s1450_s15  ;;  %654 = vrot.lane.b32.xlu0 %v651_v62, %s1448_s14  ;;  %s1251_s14 = sshll.u32 %s1561_s18, 1 }
  0xdc   : > { %s359_s15 = scalar_select %p358_p10, %s1416_s26, 1 }
  0xdf   : > { %758 = vrot.lane.b32.xlu1 %v757_v1, %s1439_s17  ;;  %624 = vrot.lane.b32.xlu0 %v1593_v28, %s1446_s11  ;;  %s1453_s17 = smov 34   ;;  %v765_v28 = vpop.permute.xlu0 %764 }
  0xe3   : > { %670 = vrot.lane.b32.xlu0 %v667_v4, %s1447_s22  ;;  %622 = vrot.lane.b32.xlu1 %v621_v3, %s1446_s11  ;;  %v700_v12 = vpop.permute.xlu0 %699 }
  0xe4   : > { %v701_v22 = vsel %vm480_vm6, %v698_v7, %v700_v12  ;;  %vm971_vm6 = vcmask 818176  }
  0xe7   : > { %611 = vrot.lane.b32.xlu0 %v608_v6, %s1442_s21  ;;  %637 = vrot.lane.b32.xlu1 %v636_v5, %s1451_s19 }
  0xeb   : > { %639 = vrot.lane.b32.xlu0 %v635_v2, %s1451_s19  ;;  %s1248_s19 = sshll.u32 %s348_s13, 4 }
  0xec   : > { %s1840_s24 = scalar_lea.vmem [#allocation3], %s1248_s19 }
 0x10d   : > { %v932_v11 = vpop.permute.xlu1 %931 }
 0x10e   : > { %959 = vrot.lane.b32.xlu1 %v932_v11, %s1453_s17  ;;  %v1025_v11 = vld [vmem:[%s1903_s3] sm:$0xff] }
 0x11d   : > { %v776_v37 = vpop.permute.xlu1 %775 }
 0x11e   : > { %v847_v0 = vsel %vm800_vm15, %v765_v28, %v776_v37  ;;  %v1018_v28 = vld [vmem:[%s1904_s2] sm:$0xff]  ;;  %s1067_s2 = sadd.s32 (%p1541_p5), %s1416_s26, %s1262_s0 }
 0x12d   : > { %v787_v13 = vpop.permute.xlu0 %786 }
 0x12e   : > { %v849_v8 = vsel %vm807_vm7, %v847_v0, %v787_v13 }
 0x131   : > { %v928_v14 = vpop.permute.xlu1 %927  ;;  %v799_v15 = vpop.permute.xlu0 %798 }
 0x132   : > { %955 = vrot.lane.b32.xlu1 %v928_v14, %s1453_s17  ;;  %v851_v21 = vsel %vm812_vm3, %v849_v8, %v799_v15 }
 0x135   : > { %v653_v16 = vpop.permute.xlu1 %652  ;;  %v930_v17 = vpop.permute.xlu0 %929 }
 0x136   : > { %957 = vrot.lane.b32.xlu0 %v930_v17, %s1453_s17 }
 0x139   : > { %v714_v18 = vpop.permute.xlu1 %713  ;;  %v712_v19 = vpop.permute.xlu0 %711 }
 0x13a   : > { %953 = vrot.lane.b32.xlu0 %v851_v21, %s1453_s17  ;;  %v716_v35 = vsel %vm715_vm0, %v712_v19, %v714_v18 }
 0x13d   : > { %v743_v23 = vpop.permute.xlu1 %742  ;;  %v745_v24 = vpop.permute.xlu0 %744 }
 0x13e   : > { %v747_v45 = vsel %vm746_vm14, %v743_v23, %v745_v24 }
 0x141   : > { %v669_v25 = vpop.permute.xlu1 %668  ;;  %v686_v26 = vpop.permute.xlu0 %685 }
 0x145   : > { %v684_v27 = vpop.permute.xlu1 %683  ;;  %v728_v29 = vpop.permute.xlu0 %727 }
 0x146   : > { %v687_v52 = vsel %vm487_vm10, %v684_v27, %v686_v26 }
 0x149   : > { %v610_v31 = vpop.permute.xlu1 %609  ;;  %v761_v32 = vpop.permute.xlu0 %760 }
 0x14d   : > { %v730_v33 = vpop.permute.xlu1 %729  ;;  %v655_v34 = vpop.permute.xlu0 %654 }
 0x14e   : > { %v732_v38 = vsel %vm731_vm2, %v728_v29, %v730_v33  ;;  %v836_v39 = vsel %vm800_vm15, %v714_v18, %v730_v33  ;;  %v657_v10 = vsel %vm656_vm4, %v653_v16, %v655_v34 }
 0x14f   : > { %v833_v40 = vsel %vm800_vm15, %v716_v35, %v732_v38  ;;  %v840_v43 = vsel %vm807_vm7, %v836_v39, %v745_v24 }
 0x150   : > { %v844_v44 = vsel %vm812_vm3, %v840_v43, %v761_v32  ;;  %v838_v48 = vsel %vm807_vm7, %v833_v40, %v747_v45 }
 0x151   : > { %v759_v46 = vpop.permute.xlu1 %758  ;;  %951 = vrot.lane.b32.xlu0 %v844_v44, %s1453_s17  ;;  %v625_v47 = vpop.permute.xlu0 %624 }
 0x152   : > { %v762_v41 = vsel %vm439_vm8, %v759_v46, %v761_v32  ;;  %vm641_vm8 = vcmask 1022976  }
 0x153   : > { %v842_v49 = vsel %vm812_vm3, %v838_v48, %v762_v41 }
 0x154   : > { %949 = vrot.lane.b32.xlu1 %v842_v49, %s1453_s17 }
 0x155   : > { %v671_v50 = vpop.permute.xlu0 %670  ;;  %v623_v58 = vpop.permute.xlu1 %622 }
 0x156   : > { %v673_v51 = vsel %vm672_vm1, %v669_v25, %v671_v50  ;;  %v822_v20 = vsel %vm800_vm15, %v655_v34, %v671_v50  ;;  %v626_v63 = vsel %vm508_vm11, %v623_v58, %v625_v47  ;;  %v933_v25 = vld [vmem:[%s1879_s1] sm:$0xf] }
 0x157   : > { %v819_v53 = vsel %vm800_vm15, %v657_v10, %v673_v51  ;;  %v826_v54 = vsel %vm807_vm7, %v822_v20, %v686_v26 }
 0x158   : > { %v830_v56 = vsel %vm812_vm3, %v826_v54, %v700_v12  ;;  %v824_v57 = vsel %vm807_vm7, %v819_v53, %v687_v52 }
 0x159   : > { %947 = vrot.lane.b32.xlu0 %v830_v56, %s1453_s17  ;;  %v612_v59 = vpop.permute.xlu0 %611  ;;  %v828_v60 = vsel %vm812_vm3, %v824_v57, %v701_v22  ;;  %v638_v1 = vpop.permute.xlu1 %637 }
 0x15a   : > { %v613_v30 = vsel %vm515_vm5, %v610_v31, %v612_v59  ;;  %v806_v61 = vsel %vm800_vm15, %v598_v55, %v612_v59  ;;  %945 = vrot.lane.b32.xlu1 %v828_v60, %s1453_s17  ;;  %vm961_vm5 = vcmask 277504  }
 0x15b   : > { %v803_v62 = vsel %vm800_vm15, %v597_v36, %v613_v30  ;;  %v811_v3 = vsel %vm807_vm7, %v806_v61, %v625_v47 }
 0x15c   : > { %v809_v6 = vsel %vm807_vm7, %v803_v62, %v626_v63 }
 0x15d   : > { %v640_v2 = vpop.permute.xlu0 %639 }
 0x15e   : > { %v642_v4 = vsel %vm641_vm8, %v638_v1, %v640_v2  ;;  %v816_v5 = vsel %vm812_vm3, %v811_v3, %v640_v2 }
 0x15f   : > { %943 = vrot.lane.b32.xlu0 %v816_v5, %s1453_s17  ;;  %v814_v7 = vsel %vm812_vm3, %v809_v6, %v642_v4 }
 0x160   : > { %941 = vrot.lane.b32.xlu1 %v814_v7, %s1453_s17  ;;  %s361_s17 = sadd.s32 %s1251_s14, %s359_s15 }
 0x161   : > { %s1252_s20 = sshll.u32 %s361_s17, 2 }
 0x162   : > { %s363_s10 = scalar_lea.vmem %s1882_s4, %s1252_s20  ;;  %s371_s3 = scalar_lea.vmem %s1883_s5, %s1252_s20 }
 0x163   : > { %1028 = vperm.xlu0 %1371, %v1025_v11   ;;  %s379_s22 = scalar_lea.vmem %s1884_s6, %s1252_s20  ;;  %v1053_v26 = vld [vmem:[%s371_s3] sm:$0xf]  ;;  %s1263_s3 = sshll.u32 (%p1541_p5), %s1067_s2, 2 }
 0x164   : > { %1021 = vperm.xlu1 %1370, %v1018_v28   ;;  %v1057_v27 = vld [vmem:[%s379_s22] sm:$0xf]  ;;  %1054 = vst [vmem:[%s1840_s24 + $0x4] sm:$0xf] %v1053_v26  ;;  %s1069_s14 = scalar_lea.vmem (%p1541_p5), %s1885_s7, %s1263_s3 }
 0x165   : > { %1058 = vst [vmem:[%s1840_s24 + $0xc] sm:$0xf] %v1057_v27 }
 0x16b   : > { %v1088_v56 = vld [vmem:[%s1840_s24 + $0x4] sm:$0xf] (%p1541_p5) }
 0x16c   : > { %v1092_v58 = vld [vmem:[%s1840_s24 + $0xc] sm:$0xf] (%p1541_p5)  ;;  %1089 = vst [vmem:[%s1069_s14 + $0x8] sm:$0xf] (%p1541_p5), %v1088_v56 }
 0x16d   : > { %1093 = vst [vmem:[%s1069_s14 + $0x18] sm:$0xf] (%p1541_p5), %v1092_v58 }
 0x180   : > { %v960_v12 = vpop.permute.xlu1 %959 }
 0x181   : > { %v976_v37 = vsel %vm800_vm15, %v960_v12, 0 }
 0x182   : > { %1276 = vmatpush3.bf16.msra.mxu0 %v976_v37 }
 0x183   : > { %1277 = vmatprep.subr.bf16.mxu0 %v1452_v42 }
 0x1a4   : > { %v956_v14 = vpop.permute.xlu1 %955 }
 0x1a8   : > { %v958_v13 = vpop.permute.xlu0 %957 }
 0x1a9   : > { %1278 = vmatpush3.bf16.msra.mxu0 %v958_v13 }
 0x1aa   : > { %1279 = vmatprep.subr.bf16.mxu0 %v1452_v42 }
 0x1ac   : > { %v954_v15 = vpop.permute.xlu0 %953 }
 0x1ad   : > { %1280 = vmatpush3.bf16.msra.mxu0 %v956_v14 }
 0x1ae   : > { %1281 = vmatprep.subr.bf16.mxu0 %v1452_v42 }
 0x1b1   : > { %1282 = vmatpush3.bf16.msra.mxu0 %v954_v15 }
 0x1b2   : > { %1283 = vmatprep.subr.bf16.mxu0 %v1452_v42 }
 0x1c3   : > { %v952_v16 = vpop.permute.xlu0 %951 }
 0x1c6   : > { %v950_v17 = vpop.permute.xlu1 %949 }
 0x1c7   : > { %v964_v0 = vsel %vm961_vm5, %v950_v17, %v952_v16 }
 0x1c8   : > { %1284 = vmatpush3.bf16.msra.mxu0 %v964_v0 }
 0x1c9   : > { %1285 = vmatprep.subr.bf16.mxu0 %v1452_v42 }
 0x1cb   : > { %v948_v8 = vpop.permute.xlu0 %947 }
 0x1cc   : > { %v946_v18 = vpop.permute.xlu1 %945 }
 0x1cd   : > { %v963_v19 = vsel %vm961_vm5, %v946_v18, %v948_v8 }
 0x1ce   : > { %1286 = vmatpush3.bf16.msra.mxu0 %v963_v19 }
 0x1cf   : > { %1287 = vmatprep.subr.bf16.mxu0 %v1452_v42  ;;  %v1051_v42 = vld [vmem:[%s363_s10] sm:$0xf] }
 0x1d0   : > { %1052 = vst [vmem:[%s1840_s24] sm:$0xf] %v1051_v42 }
 0x1d1   : > { %v944_v21 = vpop.permute.xlu0 %943 }
 0x1d2   : > { %v942_v23 = vpop.permute.xlu1 %941 }
 0x1d3   : > { %v962_v24 = vsel %vm961_vm5, %v942_v23, %v944_v21 }
 0x1d4   : > { %1288 = vmatpush3.bf16.msra.mxu0 %v962_v24 }
 0x1d7   : > { %1290 = vmatmul.mubr.msk.bf16.vlgmr.msra.gmra.mxu0 %vm971_vm6, %v933_v25  ;;  %v1086_v22 = vld [vmem:[%s1840_s24] sm:$0xf] (%p1541_p5) }
 0x1d8   : > { %1087 = vst [vmem:[%s1069_s14] sm:$0xf] (%p1541_p5), %v1086_v22 }
 0x1de   : > { %v1029_v32 = vpop.permute.xlu0 %1028 }
 0x1df   : > { %v1022_v29 = vpop.permute.xlu1 %1021 }
 0x297   : > { %v1012_v31 = vpop.f32.mrf.mxu0 }
 0x298   : > { %v1024_v33 = vmul.f32 %v1022_v29, %v1012_v31 }
 0x299   : > { %v1291_v34 = vpop.f32.mrf.mxu0 }
 0x29a   : > { %v1031_v35 = vadd.f32 %v1029_v32, %v1024_v33 }
 0x29b   : > { %v1015_v38 = vpop.f32.mrf.mxu0 }
 0x29c   : > { %v1032_v39 = vand.u32 2147483647, %v1031_v35  ;;  %vm1036_vm7 = vcmp.ge.f32.partialorder %v1031_v35, 0.0 }
 0x29d   : > { %v1292_v40 = vpop.f32.mrf.mxu0 }
 0x29e   : > { %v1033_v43 = vsub.f32 0.0, %v1032_v39 }
 0x2a0   : > { %v1034_v44 = vmul.f32 1.442695, %v1033_v43 }
 0x2a2   : > { %1374 = vpow2.f32 %v1034_v44 }
 0x2af   : > { %v1375_v9 = vpop.eup %1374 }
 0x2b0   : > { %v1037_v45 = vmul.f32 2.0, %v1375_v9  ;;  %v1045_v48 = vmul.f32 %v1375_v9, %v1375_v9  ;;  %v1039_v10 = vadd.f32 2.0, %v1375_v9 }
 0x2b2   : > { %v1038_v46 = vadd.f32 1.0, %v1037_v45  ;;  %v1042_v47 = vmul.f32 %v1375_v9, %v1037_v45  ;;  %v1044_v41 = vadd.f32 2.0, %v1037_v45  ;;  %v1040_v51 = vmul.f32 %v1375_v9, %v1039_v10 }
 0x2b4   : > { %v1043_v49 = vadd.f32 %v1042_v47, %v1038_v46  ;;  %v1046_v36 = vadd.f32 %v1045_v48, %v1044_v41  ;;  %v1041_v20 = vsel %vm1036_vm7, %v1038_v46, %v1040_v51 }
 0x2b5   : > { %v1048_v52 = vmul.f32 %v1041_v20, %v1031_v35 }
 0x2b6   : > { %v1047_v50 = vsel %vm1036_vm7, %v1043_v49, %v1046_v36 }
 0x2b7   : > { %1376 = vrcp.f32 %v1047_v50 }
 0x2c4   : > { %v1377_v53 = vpop.eup %1376 }
 0x2c5   : > { %v1050_v54 = vmul.f32 %v1377_v53, %v1048_v52  ;;  %1065 = sbr.rel (!%p1541_p5) target bundleno = 722 (0x2d2), region = 52 }
 0x2c7   : > { %v1055_v55 = vpack.c.bf16 %v1050_v54, %v1050_v54 }
 0x2c9   : > { %1056 = vst [vmem:[%s1840_s24 + $0x8] sm:$0xf] %v1055_v55 }
 0x2d0   : > { %v1090_v57 = vld [vmem:[%s1840_s24 + $0x8] sm:$0xf] }
 0x2d1   : > { %1091 = vst [vmem:[%s1069_s14 + $0x10] sm:$0xf] %v1090_v57 }
 0x2d2 PF: > { %s17_s30 = sadd.s32 1, %s1432_s30   ;;  %s1905_s12 = sld [smem:[#allocation4_spill]] }
 0x2d3   : > { %p14_p11 = scmp.ge.s32.totalorder %s17_s30, 6   ;;  %s1906_s24 = smov %s1412_s25 }
 0x2d4   : > { %s1907_s25 = smov %s1552_s16  ;;  %s1908_s26 = smov %s1424_s28 }
 0x2d5   : > { %s1909_s27 = smov %s1428_s29  ;;  %s1910_s28 = smov %s1913_s8 }
 0x2d6   :  { %16 = sbr.rel (!%p14_p11) target bundleno = 8 (0x8), region = 129 }
 0x2d8   : > { %s1911_s29 = smov %s1905_s12 }

</bundles_post_ra>
